<compile_context>
chip_gen: v7x
topology: tpu7x:2x2x1
jax: 0.10.0
libtpu: 0.0.40
codegen_flags: <defaults>
</compile_context>

<pallas_src>
import numpy as np

import jax
import jax.numpy as jnp
from jax.experimental import pallas as pl
from jax.experimental.pallas import tpu as pltpu


# ---------------------------------------------------------------------------
# Fully fused forward kernel. One grid axis over batch tiles; all weights are
# full-array VMEM blocks with constant index maps (resident across tiles).
# ---------------------------------------------------------------------------
def _fused_reward_kernel(
        obs_ref, path_ref, drone_ref,
        ocw_ref, ocs_ref, ocb_ref, ofw_ref, ofb_ref,
        pcw_ref, pcs_ref, pcb_ref, pfw_ref, pfb_ref,
        dw1_ref, db1_ref, dw2_ref, db2_ref,
        rw1o_ref, rw1p_ref, rw1d_ref, rb1_ref,
        rw2_ref, rb2_ref, rw3_ref, rb3_ref,
        rw4_ref, rb4_ref, rw5_ref, rb5_ref,
        o_ref):
    def mm(act, w_ref):
        # Narrow only the matmul operands (bf16 weights); accumulate in f32.
        return jnp.dot(act.astype(w_ref.dtype), w_ref[...],
                       preferred_element_type=jnp.float32)

    def conv_gemm(x_ref, wq_ref, s_ref, b_ref):
        # Frozen conv3x3/s2/p1 (+ReLU) expressed as a dense GEMM with int8
        # per-column-quantized weights: relu((x @ dequant(wq)) * scale + bias).
        # int8 values are exactly representable in bf16, so the cast is lossless.
        wq = wq_ref[...].astype(jnp.bfloat16)
        h = jnp.dot(x_ref[...], wq, preferred_element_type=jnp.float32)
        return jnp.maximum(h * s_ref[...] + b_ref[...], 0.0)

    # Frozen obstacle / path encoders: dense-conv GEMM -> ReLU -> fc_enc.
    obs_h = conv_gemm(obs_ref, ocw_ref, ocs_ref, ocb_ref)          # (TB, 512)
    obs_feat = mm(obs_h, ofw_ref) + ofb_ref[...]                    # (TB, 128)

    path_h = conv_gemm(path_ref, pcw_ref, pcs_ref, pcb_ref)
    path_feat = mm(path_h, pfw_ref) + pfb_ref[...]

    # drone_info_encoder: Linear(46,256) -> ReLU -> Linear(256,128).
    d_h = jnp.maximum(mm(drone_ref[...], dw1_ref) + db1_ref[...], 0.0)
    drone_feat = mm(d_h, dw2_ref) + db2_ref[...]

    # reward_predictor.
    # Linear(384,512) + eval BatchNorm1d(512): concat replaced by split-K dots,
    # BN folded into rw1*/rb1 offline.
    z = (mm(obs_feat, rw1o_ref) + mm(path_feat, rw1p_ref)
         + mm(drone_feat, rw1d_ref) + rb1_ref[...])
    z = jnp.maximum(z, 0.0)
    # Dropout(0.5): identity in eval mode.
    z = jnp.maximum(mm(z, rw2_ref) + rb2_ref[...], 0.0)   # Linear(512,256)+ReLU
    z = jnp.maximum(mm(z, rw3_ref) + rb3_ref[...], 0.0)   # Linear(256,128)+ReLU
    z = jnp.maximum(mm(z, rw4_ref) + rb4_ref[...], 0.0)   # Linear(128,64)+ReLU
    # Linear(64,1): VPU multiply + lane reduction instead of an N=1 MXU matmul.
    z = jnp.sum(z * rw5_ref[...], axis=-1, keepdims=True) + rb5_ref[...]
    # Sigmoid via EUP exp + approximate reciprocal (free slots).
    o_ref[...] = pl.reciprocal(1.0 + jnp.exp(-z), approx=True).astype(o_ref.dtype)


def reward_model_forward(drone_info, obs, path, p):
    batch = drone_info.shape[0]
    # NCHW row-major flatten == torch.flatten(x, start_dim=1); cast to bf16 in
    # the wrapper to halve input DMA bytes (accumulation stays f32 in-kernel).
    obs_flat = obs.reshape(batch, -1).astype(jnp.bfloat16)
    path_flat = path.reshape(batch, -1).astype(jnp.bfloat16)

    # Batch tile: single step for small B; 256-row tiles for serving batches
    # (fits comfortably in the default scoped VMEM on v5e/v6e/v7x: ~2 MiB
    # resident weights + ~2 MiB double-buffered input tiles + <1 MiB activ.).
    if batch <= 256:
        tb = batch
    else:
        tb = 256
        assert batch % tb == 0, "pad batch to a multiple of 256"  # TODO(synk): ragged tail tile

    weight_args = (
        p["obs_conv_w"], p["obs_conv_s"], p["obs_conv_b"], p["obs_fc_w"], p["obs_fc_b"],
        p["path_conv_w"], p["path_conv_s"], p["path_conv_b"], p["path_fc_w"], p["path_fc_b"],
        p["dw1"], p["db1"], p["dw2"], p["db2"],
        p["rw1_obs"], p["rw1_path"], p["rw1_drone"], p["rb1"],
        p["rw2"], p["rb2"], p["rw3"], p["rb3"],
        p["rw4"], p["rb4"], p["rw5"], p["rb5"],
    )

    def resident_spec(a):
        # Full-array block + constant index map: DMA'd once, VMEM-resident
        # across all batch tiles (no re-fetch, no multi-buffering).
        n = a.ndim
        return pl.BlockSpec(a.shape, lambda i, n=n: (0,) * n)

    in_specs = [
        pl.BlockSpec((tb, obs_flat.shape[1]), lambda i: (i, 0)),
        pl.BlockSpec((tb, path_flat.shape[1]), lambda i: (i, 0)),
        pl.BlockSpec((tb, drone_info.shape[1]), lambda i: (i, 0)),
    ] + [resident_spec(a) for a in weight_args]

    return pl.pallas_call(
        _fused_reward_kernel,
        out_shape=jax.ShapeDtypeStruct((batch, 1), jnp.float32),
        grid_spec=pltpu.PrefetchScalarGridSpec(
            num_scalar_prefetch=0,
            grid=(batch // tb,),
            in_specs=in_specs,
            out_specs=pl.BlockSpec((tb, 1), lambda i: (i, 0)),
        ),
        compiler_params=pltpu.CompilerParams(
            dimension_semantics=("parallel",)),   # megacore sharding on v7x
    )(obs_flat, path_flat, drone_info, *weight_args)


# ---------------------------------------------------------------------------
# Offline parameter preparation (one-time, host side).
# ---------------------------------------------------------------------------
def _conv3x3_s2_p1_as_dense(conv_w_oihw, c_in, h, w):
    """Dense (c_in*h*w, c_out*ho*wo) matrix equivalent to Conv2d(k=3,s=2,p=1) acting
    on an NCHW-flattened input; columns follow the NCHW flatten of the conv output,
    so downstream fc weights keep the original PyTorch row order."""
    c_out = conv_w_oihw.shape[0]
    ho, wo = h // 2, w // 2
    dense = np.zeros((c_in * h * w, c_out * ho * wo), dtype=np.float32)
    for oc in range(c_out):
        for oy in range(ho):
            for ox in range(wo):
                col = (oc * ho + oy) * wo + ox
                for ic in range(c_in):
                    for ky in range(3):
                        iy = oy * 2 + ky - 1
                        if iy < 0 or iy >= h:
                            continue
                        for kx in range(3):
                            ix = ox * 2 + kx - 1
                            if ix < 0 or ix >= w:
                                continue
                            row = (ic * h + iy) * w + ix
                            dense[row, col] = conv_w_oihw[oc, ic, ky, kx]
    return dense


def _quantize_int8_per_column(w):
    """Symmetric per-column int8 quantization; returns (int8 weights, f32 scales)."""
    amax = np.max(np.abs(w), axis=0)
    scale = np.where(amax > 0.0, amax / 127.0, 1.0).astype(np.float32)
    q = np.clip(np.rint(w / scale[None, :]), -127, 127).astype(np.int8)
    return q, scale


def prepare_params(raw, c_in=4, h=16, w=16, latent_dim=128):
    """Fold BN, build int8 dense conv matrices, split rw1 for split-K, cast bf16."""
    ho, wo = h // 2, w // 2

    def enc(e):
        dense_w = _conv3x3_s2_p1_as_dense(np.asarray(e["conv_w"]), c_in, h, w)
        q, scale = _quantize_int8_per_column(dense_w)
        dense_b = np.repeat(np.asarray(e["conv_b"]), ho * wo)
        return (jnp.asarray(q),                                        # int8 (CHW, 512)
                jnp.asarray(scale).reshape(1, -1),                     # f32  (1, 512)
                jnp.asarray(dense_b, dtype=np.float32).reshape(1, -1),
                e["fc_w"].astype(jnp.bfloat16),
                e["fc_b"].reshape(1, -1))

    ocw, ocs, ocb, ofw, ofb = enc(raw["obstacle_encoder"])
    pcw, pcs, pcb, pfw, pfb = enc(raw["path_encoder"])

    # Fold eval-mode BatchNorm1d(512) into the first head Linear (f32 math).
    s = raw["bn_g"] * jax.lax.rsqrt(raw["bn_v"] + 1e-5)          # (512,)
    rw1f = raw["rw1"] * s[None, :]                                # (384, 512)
    rb1f = (raw["rb1"] - raw["bn_m"]) * s + raw["bn_b"]           # (512,)

    return {
        "obs_conv_w": ocw, "obs_conv_s": ocs, "obs_conv_b": ocb,
        "obs_fc_w": ofw, "obs_fc_b": ofb,
        "path_conv_w": pcw, "path_conv_s": pcs, "path_conv_b": pcb,
        "path_fc_w": pfw, "path_fc_b": pfb,
        "dw1": raw["dw1"].astype(jnp.bfloat16), "db1": raw["db1"].reshape(1, -1),
        "dw2": raw["dw2"].astype(jnp.bfloat16), "db2": raw["db2"].reshape(1, -1),
        "rw1_obs": rw1f[:latent_dim].astype(jnp.bfloat16),
        "rw1_path": rw1f[latent_dim:2 * latent_dim].astype(jnp.bfloat16),
        "rw1_drone": rw1f[2 * latent_dim:].astype(jnp.bfloat16),
        "rb1": rb1f.reshape(1, -1),
        "rw2": raw["rw2"].astype(jnp.bfloat16), "rb2": raw["rb2"].reshape(1, -1),
        "rw3": raw["rw3"].astype(jnp.bfloat16), "rb3": raw["rb3"].reshape(1, -1),
        "rw4": raw["rw4"].astype(jnp.bfloat16), "rb4": raw["rb4"].reshape(1, -1),
        "rw5": raw["rw5"].reshape(1, -1),        "rb5": raw["rb5"].reshape(1, -1),
    }


# ---------------------------------------------------------------------------
# Deterministic "PyTorch-layout" parameter synthesis + f32 reference.
# ---------------------------------------------------------------------------
def _init(key, shape, scale=0.05):
    return scale * jax.random.normal(key, shape, dtype=jnp.float32)


def make_raw_params(key, c_in=4, h=16, w=16, drone_info_dim=46, latent_dim=128):
    ks = iter(jax.random.split(key, 32))
    cout, ho, wo = 8, h // 2, w // 2
    flat = cout * ho * wo

    def enc():
        return {
            "conv_w": _init(next(ks), (cout, c_in, 3, 3)),   # OIHW (torch layout)
            "conv_b": _init(next(ks), (cout,)),
            "fc_w": _init(next(ks), (flat, latent_dim)),      # == torch fc.weight.T
            "fc_b": _init(next(ks), (latent_dim,)),
        }

    return {
        "obstacle_encoder": enc(),
        "path_encoder": enc(),
        "dw1": _init(next(ks), (drone_info_dim, 256)), "db1": _init(next(ks), (256,)),
        "dw2": _init(next(ks), (256, latent_dim)),     "db2": _init(next(ks), (latent_dim,)),
        "rw1": _init(next(ks), (3 * latent_dim, 512)), "rb1": _init(next(ks), (512,)),
        "bn_g": 1.0 + _init(next(ks), (512,)),         "bn_b": _init(next(ks), (512,)),
        "bn_m": _init(next(ks), (512,)),               "bn_v": 1.0 + jnp.abs(_init(next(ks), (512,))),
        "rw2": _init(next(ks), (512, 256)),            "rb2": _init(next(ks), (256,)),
        "rw3": _init(next(ks), (256, latent_dim)),     "rb3": _init(next(ks), (latent_dim,)),
        "rw4": _init(next(ks), (latent_dim, 64)),      "rb4": _init(next(ks), (64,)),
        "rw5": _init(next(ks), (64, 1)),               "rb5": _init(next(ks), (1,)),
    }


def reference_forward(drone_info, obs, path, raw):
    """Pure-JAX f32 reference with un-folded params (real conv, real BN)."""
    def enc(x, e):
        y = jax.lax.conv_general_dilated(
            x, e["conv_w"], window_strides=(2, 2), padding=((1, 1), (1, 1)),
            dimension_numbers=("NCHW", "OIHW", "NCHW"))
        y = jnp.maximum(y + e["conv_b"][None, :, None, None], 0.0)
        return y.reshape(x.shape[0], -1) @ e["fc_w"] + e["fc_b"]

    obs_f = enc(obs, raw["obstacle_encoder"])
    path_f = enc(path, raw["path_encoder"])
    d_f = jnp.maximum(drone_info @ raw["dw1"] + raw["db1"], 0.0) @ raw["dw2"] + raw["db2"]
    z = jnp.concatenate([obs_f, path_f, d_f], axis=-1) @ raw["rw1"] + raw["rb1"]
    z = (z - raw["bn_m"]) * jax.lax.rsqrt(raw["bn_v"] + 1e-5) * raw["bn_g"] + raw["bn_b"]
    z = jnp.maximum(z, 0.0)
    z = jnp.maximum(z @ raw["rw2"] + raw["rb2"], 0.0)
    z = jnp.maximum(z @ raw["rw3"] + raw["rb3"], 0.0)
    z = jnp.maximum(z @ raw["rw4"] + raw["rb4"], 0.0)
    z = z @ raw["rw5"] + raw["rb5"]
    return jax.nn.sigmoid(z)


if __name__ == "__main__":
    B, C, H, W = 2, 4, 16, 16
    DRONE_DIM = 46

    key = jax.random.PRNGKey(0)
    k_di, k_obs, k_path, k_params = jax.random.split(key, 4)

    drone_info = jax.random.normal(k_di, (B, DRONE_DIM), dtype=jnp.float32)
    obs = jax.random.normal(k_obs, (B, C, H, W), dtype=jnp.float32)
    path = jax.random.normal(k_path, (B, C, H, W), dtype=jnp.float32)

    raw = make_raw_params(k_params, c_in=C, h=H, w=W, drone_info_dim=DRONE_DIM)
    params = prepare_params(raw, c_in=C, h=H, w=W)

    fwd = jax.jit(reward_model_forward)
    reward = jax.block_until_ready(fwd(drone_info, obs, path, params))

    assert reward.shape == (B, 1), reward.shape
    assert reward.dtype == jnp.float32
    assert bool(jnp.all((reward >= 0.0) & (reward <= 1.0)))

    ref = jax.block_until_ready(jax.jit(reference_forward)(drone_info, obs, path, raw))
    max_err = float(jnp.max(jnp.abs(reward - ref)))
    assert max_err < 3e-2, f"mismatch vs f32 reference: {max_err}"

    print("KERNEL_OK")
</pallas_src>

<mosaic_0001>
module attributes {stable_mosaic.version = 11 : i64} {
  func.func @_fused_reward_kernel(%arg0: i32, %arg1: memref<2x1024xbf16, #tpu.memory_space<vmem>>, %arg2: memref<2x1024xbf16, #tpu.memory_space<vmem>>, %arg3: memref<2x46xf32, #tpu.memory_space<vmem>>, %arg4: memref<1024x512xi8, #tpu.memory_space<vmem>>, %arg5: memref<1x512xf32, #tpu.memory_space<vmem>>, %arg6: memref<1x512xf32, #tpu.memory_space<vmem>>, %arg7: memref<512x128xbf16, #tpu.memory_space<vmem>>, %arg8: memref<1x128xf32, #tpu.memory_space<vmem>>, %arg9: memref<1024x512xi8, #tpu.memory_space<vmem>>, %arg10: memref<1x512xf32, #tpu.memory_space<vmem>>, %arg11: memref<1x512xf32, #tpu.memory_space<vmem>>, %arg12: memref<512x128xbf16, #tpu.memory_space<vmem>>, %arg13: memref<1x128xf32, #tpu.memory_space<vmem>>, %arg14: memref<46x256xbf16, #tpu.memory_space<vmem>>, %arg15: memref<1x256xf32, #tpu.memory_space<vmem>>, %arg16: memref<256x128xbf16, #tpu.memory_space<vmem>>, %arg17: memref<1x128xf32, #tpu.memory_space<vmem>>, %arg18: memref<128x512xbf16, #tpu.memory_space<vmem>>, %arg19: memref<128x512xbf16, #tpu.memory_space<vmem>>, %arg20: memref<128x512xbf16, #tpu.memory_space<vmem>>, %arg21: memref<1x512xf32, #tpu.memory_space<vmem>>, %arg22: memref<512x256xbf16, #tpu.memory_space<vmem>>, %arg23: memref<1x256xf32, #tpu.memory_space<vmem>>, %arg24: memref<256x128xbf16, #tpu.memory_space<vmem>>, %arg25: memref<1x128xf32, #tpu.memory_space<vmem>>, %arg26: memref<128x64xbf16, #tpu.memory_space<vmem>>, %arg27: memref<1x64xf32, #tpu.memory_space<vmem>>, %arg28: memref<1x64xf32, #tpu.memory_space<vmem>>, %arg29: memref<1x1xf32, #tpu.memory_space<vmem>>, %arg30: memref<2x1xf32, #tpu.memory_space<vmem>>) attributes {dimension_semantics = [#tpu.dimension_semantics<parallel>], iteration_bounds = array<i64: 1>, scalar_prefetch = 0 : i64, scratch_operands = 0 : i64, tpu.core_type = #tpu.core_type<tc>, window_params = [{transform_indices = @transform_0, window_bounds = array<i64: 2, 1024>}, {transform_indices = @transform_1, window_bounds = array<i64: 2, 1024>}, {transform_indices = @transform_2, window_bounds = array<i64: 2, 46>}, {pipeline_mode = #tpu.pipeline_mode<synchronous>, transform_indices = @transform_3, window_bounds = array<i64: 1024, 512>}, {pipeline_mode = #tpu.pipeline_mode<synchronous>, transform_indices = @transform_4, window_bounds = array<i64: 1, 512>}, {pipeline_mode = #tpu.pipeline_mode<synchronous>, transform_indices = @transform_5, window_bounds = array<i64: 1, 512>}, {pipeline_mode = #tpu.pipeline_mode<synchronous>, transform_indices = @transform_6, window_bounds = array<i64: 512, 128>}, {pipeline_mode = #tpu.pipeline_mode<synchronous>, transform_indices = @transform_7, window_bounds = array<i64: 1, 128>}, {pipeline_mode = #tpu.pipeline_mode<synchronous>, transform_indices = @transform_8, window_bounds = array<i64: 1024, 512>}, {pipeline_mode = #tpu.pipeline_mode<synchronous>, transform_indices = @transform_9, window_bounds = array<i64: 1, 512>}, {pipeline_mode = #tpu.pipeline_mode<synchronous>, transform_indices = @transform_10, window_bounds = array<i64: 1, 512>}, {pipeline_mode = #tpu.pipeline_mode<synchronous>, transform_indices = @transform_11, window_bounds = array<i64: 512, 128>}, {pipeline_mode = #tpu.pipeline_mode<synchronous>, transform_indices = @transform_12, window_bounds = array<i64: 1, 128>}, {pipeline_mode = #tpu.pipeline_mode<synchronous>, transform_indices = @transform_13, window_bounds = array<i64: 46, 256>}, {pipeline_mode = #tpu.pipeline_mode<synchronous>, transform_indices = @transform_14, window_bounds = array<i64: 1, 256>}, {pipeline_mode = #tpu.pipeline_mode<synchronous>, transform_indices = @transform_15, window_bounds = array<i64: 256, 128>}, {pipeline_mode = #tpu.pipeline_mode<synchronous>, transform_indices = @transform_16, window_bounds = array<i64: 1, 128>}, {pipeline_mode = #tpu.pipeline_mode<synchronous>, transform_indices = @transform_17, window_bounds = array<i64: 128, 512>}, {pipeline_mode = #tpu.pipeline_mode<synchronous>, transform_indices = @transform_18, window_bounds = array<i64: 128, 512>}, {pipeline_mode = #tpu.pipeline_mode<synchronous>, transform_indices = @transform_19, window_bounds = array<i64: 128, 512>}, {pipeline_mode = #tpu.pipeline_mode<synchronous>, transform_indices = @transform_20, window_bounds = array<i64: 1, 512>}, {pipeline_mode = #tpu.pipeline_mode<synchronous>, transform_indices = @transform_21, window_bounds = array<i64: 512, 256>}, {pipeline_mode = #tpu.pipeline_mode<synchronous>, transform_indices = @transform_22, window_bounds = array<i64: 1, 256>}, {pipeline_mode = #tpu.pipeline_mode<synchronous>, transform_indices = @transform_23, window_bounds = array<i64: 256, 128>}, {pipeline_mode = #tpu.pipeline_mode<synchronous>, transform_indices = @transform_24, window_bounds = array<i64: 1, 128>}, {pipeline_mode = #tpu.pipeline_mode<synchronous>, transform_indices = @transform_25, window_bounds = array<i64: 128, 64>}, {pipeline_mode = #tpu.pipeline_mode<synchronous>, transform_indices = @transform_26, window_bounds = array<i64: 1, 64>}, {pipeline_mode = #tpu.pipeline_mode<synchronous>, transform_indices = @transform_27, window_bounds = array<i64: 1, 64>}, {pipeline_mode = #tpu.pipeline_mode<synchronous>, transform_indices = @transform_28, window_bounds = array<i64: 1, 1>}, {transform_indices = @transform_29, window_bounds = array<i64: 2, 1>}]} {
    %c0 = arith.constant 0 : index
    %c0_0 = arith.constant 0 : index
    %0 = vector.load %arg4[%c0, %c0_0] : memref<1024x512xi8, #tpu.memory_space<vmem>>, vector<1024x512xi8>
    %1 = arith.sitofp %0 : vector<1024x512xi8> to vector<1024x512xbf16>
    %c0_1 = arith.constant 0 : index
    %c0_2 = arith.constant 0 : index
    %2 = vector.load %arg1[%c0_1, %c0_2] : memref<2x1024xbf16, #tpu.memory_space<vmem>>, vector<2x1024xbf16>
    %cst = arith.constant dense<0.000000e+00> : vector<2x512xf32>
    %3 = tpu.matmul %2, %1, %cst {dimension_numbers = #tpu.dot_dimension_numbers<[1], [0], [0], [1], [0, 0, 1, 1], [], []>} : vector<2x1024xbf16>, vector<1024x512xbf16>, vector<2x512xf32> -> vector<2x512xf32>
    %c0_3 = arith.constant 0 : index
    %c0_4 = arith.constant 0 : index
    %4 = vector.load %arg5[%c0_3, %c0_4] : memref<1x512xf32, #tpu.memory_space<vmem>>, vector<1x512xf32>
    %5 = vector.broadcast %4 : vector<1x512xf32> to vector<2x512xf32>
    %6 = arith.mulf %3, %5 : vector<2x512xf32>
    %c0_5 = arith.constant 0 : index
    %c0_6 = arith.constant 0 : index
    %7 = vector.load %arg6[%c0_5, %c0_6] : memref<1x512xf32, #tpu.memory_space<vmem>>, vector<1x512xf32>
    %8 = vector.broadcast %7 : vector<1x512xf32> to vector<2x512xf32>
    %9 = arith.addf %6, %8 : vector<2x512xf32>
    %cst_7 = arith.constant 0.000000e+00 : f32
    %10 = vector.broadcast %cst_7 : f32 to vector<2x512xf32>
    %11 = arith.maximumf %9, %10 : vector<2x512xf32>
    %12 = arith.truncf %11 : vector<2x512xf32> to vector<2x512xbf16>
    %c0_8 = arith.constant 0 : index
    %c0_9 = arith.constant 0 : index
    %13 = vector.load %arg7[%c0_8, %c0_9] : memref<512x128xbf16, #tpu.memory_space<vmem>>, vector<512x128xbf16>
    %cst_10 = arith.constant dense<0.000000e+00> : vector<2x128xf32>
    %14 = tpu.matmul %12, %13, %cst_10 {dimension_numbers = #tpu.dot_dimension_numbers<[1], [0], [0], [1], [0, 0, 1, 1], [], []>} : vector<2x512xbf16>, vector<512x128xbf16>, vector<2x128xf32> -> vector<2x128xf32>
    %c0_11 = arith.constant 0 : index
    %c0_12 = arith.constant 0 : index
    %15 = vector.load %arg8[%c0_11, %c0_12] : memref<1x128xf32, #tpu.memory_space<vmem>>, vector<1x128xf32>
    %16 = vector.broadcast %15 : vector<1x128xf32> to vector<2x128xf32>
    %17 = arith.addf %14, %16 : vector<2x128xf32>
    %c0_13 = arith.constant 0 : index
    %c0_14 = arith.constant 0 : index
    %18 = vector.load %arg9[%c0_13, %c0_14] : memref<1024x512xi8, #tpu.memory_space<vmem>>, vector<1024x512xi8>
    %19 = arith.sitofp %18 : vector<1024x512xi8> to vector<1024x512xbf16>
    %c0_15 = arith.constant 0 : index
    %c0_16 = arith.constant 0 : index
    %20 = vector.load %arg2[%c0_15, %c0_16] : memref<2x1024xbf16, #tpu.memory_space<vmem>>, vector<2x1024xbf16>
    %cst_17 = arith.constant dense<0.000000e+00> : vector<2x512xf32>
    %21 = tpu.matmul %20, %19, %cst_17 {dimension_numbers = #tpu.dot_dimension_numbers<[1], [0], [0], [1], [0, 0, 1, 1], [], []>} : vector<2x1024xbf16>, vector<1024x512xbf16>, vector<2x512xf32> -> vector<2x512xf32>
    %c0_18 = arith.constant 0 : index
    %c0_19 = arith.constant 0 : index
    %22 = vector.load %arg10[%c0_18, %c0_19] : memref<1x512xf32, #tpu.memory_space<vmem>>, vector<1x512xf32>
    %23 = vector.broadcast %22 : vector<1x512xf32> to vector<2x512xf32>
    %24 = arith.mulf %21, %23 : vector<2x512xf32>
    %c0_20 = arith.constant 0 : index
    %c0_21 = arith.constant 0 : index
    %25 = vector.load %arg11[%c0_20, %c0_21] : memref<1x512xf32, #tpu.memory_space<vmem>>, vector<1x512xf32>
    %26 = vector.broadcast %25 : vector<1x512xf32> to vector<2x512xf32>
    %27 = arith.addf %24, %26 : vector<2x512xf32>
    %cst_22 = arith.constant 0.000000e+00 : f32
    %28 = vector.broadcast %cst_22 : f32 to vector<2x512xf32>
    %29 = arith.maximumf %27, %28 : vector<2x512xf32>
    %30 = arith.truncf %29 : vector<2x512xf32> to vector<2x512xbf16>
    %c0_23 = arith.constant 0 : index
    %c0_24 = arith.constant 0 : index
    %31 = vector.load %arg12[%c0_23, %c0_24] : memref<512x128xbf16, #tpu.memory_space<vmem>>, vector<512x128xbf16>
    %cst_25 = arith.constant dense<0.000000e+00> : vector<2x128xf32>
    %32 = tpu.matmul %30, %31, %cst_25 {dimension_numbers = #tpu.dot_dimension_numbers<[1], [0], [0], [1], [0, 0, 1, 1], [], []>} : vector<2x512xbf16>, vector<512x128xbf16>, vector<2x128xf32> -> vector<2x128xf32>
    %c0_26 = arith.constant 0 : index
    %c0_27 = arith.constant 0 : index
    %33 = vector.load %arg13[%c0_26, %c0_27] : memref<1x128xf32, #tpu.memory_space<vmem>>, vector<1x128xf32>
    %34 = vector.broadcast %33 : vector<1x128xf32> to vector<2x128xf32>
    %35 = arith.addf %32, %34 : vector<2x128xf32>
    %c0_28 = arith.constant 0 : index
    %c0_29 = arith.constant 0 : index
    %36 = vector.load %arg3[%c0_28, %c0_29] : memref<2x46xf32, #tpu.memory_space<vmem>>, vector<2x46xf32>
    %37 = arith.truncf %36 : vector<2x46xf32> to vector<2x46xbf16>
    %c0_30 = arith.constant 0 : index
    %c0_31 = arith.constant 0 : index
    %38 = vector.load %arg14[%c0_30, %c0_31] : memref<46x256xbf16, #tpu.memory_space<vmem>>, vector<46x256xbf16>
    %cst_32 = arith.constant dense<0.000000e+00> : vector<2x256xf32>
    %39 = tpu.matmul %37, %38, %cst_32 {dimension_numbers = #tpu.dot_dimension_numbers<[1], [0], [0], [1], [0, 0, 1, 1], [], []>} : vector<2x46xbf16>, vector<46x256xbf16>, vector<2x256xf32> -> vector<2x256xf32>
    %c0_33 = arith.constant 0 : index
    %c0_34 = arith.constant 0 : index
    %40 = vector.load %arg15[%c0_33, %c0_34] : memref<1x256xf32, #tpu.memory_space<vmem>>, vector<1x256xf32>
    %41 = vector.broadcast %40 : vector<1x256xf32> to vector<2x256xf32>
    %42 = arith.addf %39, %41 : vector<2x256xf32>
    %cst_35 = arith.constant 0.000000e+00 : f32
    %43 = vector.broadcast %cst_35 : f32 to vector<2x256xf32>
    %44 = arith.maximumf %42, %43 : vector<2x256xf32>
    %45 = arith.truncf %44 : vector<2x256xf32> to vector<2x256xbf16>
    %c0_36 = arith.constant 0 : index
    %c0_37 = arith.constant 0 : index
    %46 = vector.load %arg16[%c0_36, %c0_37] : memref<256x128xbf16, #tpu.memory_space<vmem>>, vector<256x128xbf16>
    %cst_38 = arith.constant dense<0.000000e+00> : vector<2x128xf32>
    %47 = tpu.matmul %45, %46, %cst_38 {dimension_numbers = #tpu.dot_dimension_numbers<[1], [0], [0], [1], [0, 0, 1, 1], [], []>} : vector<2x256xbf16>, vector<256x128xbf16>, vector<2x128xf32> -> vector<2x128xf32>
    %c0_39 = arith.constant 0 : index
    %c0_40 = arith.constant 0 : index
    %48 = vector.load %arg17[%c0_39, %c0_40] : memref<1x128xf32, #tpu.memory_space<vmem>>, vector<1x128xf32>
    %49 = vector.broadcast %48 : vector<1x128xf32> to vector<2x128xf32>
    %50 = arith.addf %47, %49 : vector<2x128xf32>
    %51 = arith.truncf %17 : vector<2x128xf32> to vector<2x128xbf16>
    %c0_41 = arith.constant 0 : index
    %c0_42 = arith.constant 0 : index
    %52 = vector.load %arg18[%c0_41, %c0_42] : memref<128x512xbf16, #tpu.memory_space<vmem>>, vector<128x512xbf16>
    %cst_43 = arith.constant dense<0.000000e+00> : vector<2x512xf32>
    %53 = tpu.matmul %51, %52, %cst_43 {dimension_numbers = #tpu.dot_dimension_numbers<[1], [0], [0], [1], [0, 0, 1, 1], [], []>} : vector<2x128xbf16>, vector<128x512xbf16>, vector<2x512xf32> -> vector<2x512xf32>
    %54 = arith.truncf %35 : vector<2x128xf32> to vector<2x128xbf16>
    %c0_44 = arith.constant 0 : index
    %c0_45 = arith.constant 0 : index
    %55 = vector.load %arg19[%c0_44, %c0_45] : memref<128x512xbf16, #tpu.memory_space<vmem>>, vector<128x512xbf16>
    %cst_46 = arith.constant dense<0.000000e+00> : vector<2x512xf32>
    %56 = tpu.matmul %54, %55, %cst_46 {dimension_numbers = #tpu.dot_dimension_numbers<[1], [0], [0], [1], [0, 0, 1, 1], [], []>} : vector<2x128xbf16>, vector<128x512xbf16>, vector<2x512xf32> -> vector<2x512xf32>
    %57 = arith.addf %53, %56 : vector<2x512xf32>
    %58 = arith.truncf %50 : vector<2x128xf32> to vector<2x128xbf16>
    %c0_47 = arith.constant 0 : index
    %c0_48 = arith.constant 0 : index
    %59 = vector.load %arg20[%c0_47, %c0_48] : memref<128x512xbf16, #tpu.memory_space<vmem>>, vector<128x512xbf16>
    %cst_49 = arith.constant dense<0.000000e+00> : vector<2x512xf32>
    %60 = tpu.matmul %58, %59, %cst_49 {dimension_numbers = #tpu.dot_dimension_numbers<[1], [0], [0], [1], [0, 0, 1, 1], [], []>} : vector<2x128xbf16>, vector<128x512xbf16>, vector<2x512xf32> -> vector<2x512xf32>
    %61 = arith.addf %57, %60 : vector<2x512xf32>
    %c0_50 = arith.constant 0 : index
    %c0_51 = arith.constant 0 : index
    %62 = vector.load %arg21[%c0_50, %c0_51] : memref<1x512xf32, #tpu.memory_space<vmem>>, vector<1x512xf32>
    %63 = vector.broadcast %62 : vector<1x512xf32> to vector<2x512xf32>
    %64 = arith.addf %61, %63 : vector<2x512xf32>
    %cst_52 = arith.constant 0.000000e+00 : f32
    %65 = vector.broadcast %cst_52 : f32 to vector<2x512xf32>
    %66 = arith.maximumf %64, %65 : vector<2x512xf32>
    %67 = arith.truncf %66 : vector<2x512xf32> to vector<2x512xbf16>
    %c0_53 = arith.constant 0 : index
    %c0_54 = arith.constant 0 : index
    %68 = vector.load %arg22[%c0_53, %c0_54] : memref<512x256xbf16, #tpu.memory_space<vmem>>, vector<512x256xbf16>
    %cst_55 = arith.constant dense<0.000000e+00> : vector<2x256xf32>
    %69 = tpu.matmul %67, %68, %cst_55 {dimension_numbers = #tpu.dot_dimension_numbers<[1], [0], [0], [1], [0, 0, 1, 1], [], []>} : vector<2x512xbf16>, vector<512x256xbf16>, vector<2x256xf32> -> vector<2x256xf32>
    %c0_56 = arith.constant 0 : index
    %c0_57 = arith.constant 0 : index
    %70 = vector.load %arg23[%c0_56, %c0_57] : memref<1x256xf32, #tpu.memory_space<vmem>>, vector<1x256xf32>
    %71 = vector.broadcast %70 : vector<1x256xf32> to vector<2x256xf32>
    %72 = arith.addf %69, %71 : vector<2x256xf32>
    %cst_58 = arith.constant 0.000000e+00 : f32
    %73 = vector.broadcast %cst_58 : f32 to vector<2x256xf32>
    %74 = arith.maximumf %72, %73 : vector<2x256xf32>
    %75 = arith.truncf %74 : vector<2x256xf32> to vector<2x256xbf16>
    %c0_59 = arith.constant 0 : index
    %c0_60 = arith.constant 0 : index
    %76 = vector.load %arg24[%c0_59, %c0_60] : memref<256x128xbf16, #tpu.memory_space<vmem>>, vector<256x128xbf16>
    %cst_61 = arith.constant dense<0.000000e+00> : vector<2x128xf32>
    %77 = tpu.matmul %75, %76, %cst_61 {dimension_numbers = #tpu.dot_dimension_numbers<[1], [0], [0], [1], [0, 0, 1, 1], [], []>} : vector<2x256xbf16>, vector<256x128xbf16>, vector<2x128xf32> -> vector<2x128xf32>
    %c0_62 = arith.constant 0 : index
    %c0_63 = arith.constant 0 : index
    %78 = vector.load %arg25[%c0_62, %c0_63] : memref<1x128xf32, #tpu.memory_space<vmem>>, vector<1x128xf32>
    %79 = vector.broadcast %78 : vector<1x128xf32> to vector<2x128xf32>
    %80 = arith.addf %77, %79 : vector<2x128xf32>
    %cst_64 = arith.constant 0.000000e+00 : f32
    %81 = vector.broadcast %cst_64 : f32 to vector<2x128xf32>
    %82 = arith.maximumf %80, %81 : vector<2x128xf32>
    %83 = arith.truncf %82 : vector<2x128xf32> to vector<2x128xbf16>
    %c0_65 = arith.constant 0 : index
    %c0_66 = arith.constant 0 : index
    %84 = vector.load %arg26[%c0_65, %c0_66] : memref<128x64xbf16, #tpu.memory_space<vmem>>, vector<128x64xbf16>
    %cst_67 = arith.constant dense<0.000000e+00> : vector<2x64xf32>
    %85 = tpu.matmul %83, %84, %cst_67 {dimension_numbers = #tpu.dot_dimension_numbers<[1], [0], [0], [1], [0, 0, 1, 1], [], []>} : vector<2x128xbf16>, vector<128x64xbf16>, vector<2x64xf32> -> vector<2x64xf32>
    %c0_68 = arith.constant 0 : index
    %c0_69 = arith.constant 0 : index
    %86 = vector.load %arg27[%c0_68, %c0_69] : memref<1x64xf32, #tpu.memory_space<vmem>>, vector<1x64xf32>
    %87 = vector.broadcast %86 : vector<1x64xf32> to vector<2x64xf32>
    %88 = arith.addf %85, %87 : vector<2x64xf32>
    %cst_70 = arith.constant 0.000000e+00 : f32
    %89 = vector.broadcast %cst_70 : f32 to vector<2x64xf32>
    %90 = arith.maximumf %88, %89 : vector<2x64xf32>
    %c0_71 = arith.constant 0 : index
    %c0_72 = arith.constant 0 : index
    %91 = vector.load %arg28[%c0_71, %c0_72] : memref<1x64xf32, #tpu.memory_space<vmem>>, vector<1x64xf32>
    %92 = vector.broadcast %91 : vector<1x64xf32> to vector<2x64xf32>
    %93 = arith.mulf %90, %92 : vector<2x64xf32>
    %cst_73 = arith.constant dense<0.000000e+00> : vector<2xf32>
    %94 = vector.multi_reduction <add>, %93, %cst_73 [1] : vector<2x64xf32> to vector<2xf32>
    %95 = vector.shape_cast %94 : vector<2xf32> to vector<2x1xf32>
    %c0_74 = arith.constant 0 : index
    %c0_75 = arith.constant 0 : index
    %96 = vector.load %arg29[%c0_74, %c0_75] : memref<1x1xf32, #tpu.memory_space<vmem>>, vector<1x1xf32>
    %97 = vector.broadcast %96 : vector<1x1xf32> to vector<2x1xf32>
    %98 = arith.addf %95, %97 : vector<2x1xf32>
    %cst_76 = arith.constant 0.000000e+00 : f32
    %99 = vector.broadcast %cst_76 : f32 to vector<2x1xf32>
    %100 = arith.subf %99, %98 : vector<2x1xf32>
    %101 = math.exp %100 : vector<2x1xf32>
    %cst_77 = arith.constant 1.000000e+00 : f32
    %102 = vector.broadcast %cst_77 : f32 to vector<2x1xf32>
    %103 = arith.addf %102, %101 : vector<2x1xf32>
    %104 = tpu.reciprocal %103 {approx = true} : vector<2x1xf32> -> vector<2x1xf32>
    %c0_78 = arith.constant 0 : index
    %c0_79 = arith.constant 0 : index
    %105 = vector.load %arg30[%c0_78, %c0_79] : memref<2x1xf32, #tpu.memory_space<vmem>>, vector<2x1xf32>
    tpu.vector_store %arg30[%c0_78, %c0_79], %104 {strides = array<i32>} : memref<2x1xf32, #tpu.memory_space<vmem>>, vector<2x1xf32>,
    return
  }
  func.func @transform_0(%arg0: i32) -> (i32, i32) {
    %c0_i32 = arith.constant 0 : i32
    %c0_i32_0 = arith.constant 0 : i32
    return %arg0, %c0_i32 : i32, i32
  }
  func.func @transform_1(%arg0: i32) -> (i32, i32) {
    %c0_i32 = arith.constant 0 : i32
    %c0_i32_0 = arith.constant 0 : i32
    return %arg0, %c0_i32 : i32, i32
  }
  func.func @transform_2(%arg0: i32) -> (i32, i32) {
    %c0_i32 = arith.constant 0 : i32
    %c0_i32_0 = arith.constant 0 : i32
    return %arg0, %c0_i32 : i32, i32
  }
  func.func @transform_3(%arg0: i32) -> (i32, i32) {
    %c0_i32 = arith.constant 0 : i32
    %c0_i32_0 = arith.constant 0 : i32
    %c0_i32_1 = arith.constant 0 : i32
    return %c0_i32, %c0_i32_0 : i32, i32
  }
  func.func @transform_4(%arg0: i32) -> (i32, i32) {
    %c0_i32 = arith.constant 0 : i32
    %c0_i32_0 = arith.constant 0 : i32
    %c0_i32_1 = arith.constant 0 : i32
    return %c0_i32, %c0_i32_0 : i32, i32
  }
  func.func @transform_5(%arg0: i32) -> (i32, i32) {
    %c0_i32 = arith.constant 0 : i32
    %c0_i32_0 = arith.constant 0 : i32
    %c0_i32_1 = arith.constant 0 : i32
    return %c0_i32, %c0_i32_0 : i32, i32
  }
  func.func @transform_6(%arg0: i32) -> (i32, i32) {
    %c0_i32 = arith.constant 0 : i32
    %c0_i32_0 = arith.constant 0 : i32
    %c0_i32_1 = arith.constant 0 : i32
    return %c0_i32, %c0_i32_0 : i32, i32
  }
  func.func @transform_7(%arg0: i32) -> (i32, i32) {
    %c0_i32 = arith.constant 0 : i32
    %c0_i32_0 = arith.constant 0 : i32
    %c0_i32_1 = arith.constant 0 : i32
    return %c0_i32, %c0_i32_0 : i32, i32
  }
  func.func @transform_8(%arg0: i32) -> (i32, i32) {
    %c0_i32 = arith.constant 0 : i32
    %c0_i32_0 = arith.constant 0 : i32
    %c0_i32_1 = arith.constant 0 : i32
    return %c0_i32, %c0_i32_0 : i32, i32
  }
  func.func @transform_9(%arg0: i32) -> (i32, i32) {
    %c0_i32 = arith.constant 0 : i32
    %c0_i32_0 = arith.constant 0 : i32
    %c0_i32_1 = arith.constant 0 : i32
    return %c0_i32, %c0_i32_0 : i32, i32
  }
  func.func @transform_10(%arg0: i32) -> (i32, i32) {
    %c0_i32 = arith.constant 0 : i32
    %c0_i32_0 = arith.constant 0 : i32
    %c0_i32_1 = arith.constant 0 : i32
    return %c0_i32, %c0_i32_0 : i32, i32
  }
  func.func @transform_11(%arg0: i32) -> (i32, i32) {
    %c0_i32 = arith.constant 0 : i32
    %c0_i32_0 = arith.constant 0 : i32
    %c0_i32_1 = arith.constant 0 : i32
    return %c0_i32, %c0_i32_0 : i32, i32
  }
  func.func @transform_12(%arg0: i32) -> (i32, i32) {
    %c0_i32 = arith.constant 0 : i32
    %c0_i32_0 = arith.constant 0 : i32
    %c0_i32_1 = arith.constant 0 : i32
    return %c0_i32, %c0_i32_0 : i32, i32
  }
  func.func @transform_13(%arg0: i32) -> (i32, i32) {
    %c0_i32 = arith.constant 0 : i32
    %c0_i32_0 = arith.constant 0 : i32
    %c0_i32_1 = arith.constant 0 : i32
    return %c0_i32, %c0_i32_0 : i32, i32
  }
  func.func @transform_14(%arg0: i32) -> (i32, i32) {
    %c0_i32 = arith.constant 0 : i32
    %c0_i32_0 = arith.constant 0 : i32
    %c0_i32_1 = arith.constant 0 : i32
    return %c0_i32, %c0_i32_0 : i32, i32
  }
  func.func @transform_15(%arg0: i32) -> (i32, i32) {
    %c0_i32 = arith.constant 0 : i32
    %c0_i32_0 = arith.constant 0 : i32
    %c0_i32_1 = arith.constant 0 : i32
    return %c0_i32, %c0_i32_0 : i32, i32
  }
  func.func @transform_16(%arg0: i32) -> (i32, i32) {
    %c0_i32 = arith.constant 0 : i32
    %c0_i32_0 = arith.constant 0 : i32
    %c0_i32_1 = arith.constant 0 : i32
    return %c0_i32, %c0_i32_0 : i32, i32
  }
  func.func @transform_17(%arg0: i32) -> (i32, i32) {
    %c0_i32 = arith.constant 0 : i32
    %c0_i32_0 = arith.constant 0 : i32
    %c0_i32_1 = arith.constant 0 : i32
    return %c0_i32, %c0_i32_0 : i32, i32
  }
  func.func @transform_18(%arg0: i32) -> (i32, i32) {
    %c0_i32 = arith.constant 0 : i32
    %c0_i32_0 = arith.constant 0 : i32
    %c0_i32_1 = arith.constant 0 : i32
    return %c0_i32, %c0_i32_0 : i32, i32
  }
  func.func @transform_19(%arg0: i32) -> (i32, i32) {
    %c0_i32 = arith.constant 0 : i32
    %c0_i32_0 = arith.constant 0 : i32
    %c0_i32_1 = arith.constant 0 : i32
    return %c0_i32, %c0_i32_0 : i32, i32
  }
  func.func @transform_20(%arg0: i32) -> (i32, i32) {
    %c0_i32 = arith.constant 0 : i32
    %c0_i32_0 = arith.constant 0 : i32
    %c0_i32_1 = arith.constant 0 : i32
    return %c0_i32, %c0_i32_0 : i32, i32
  }
  func.func @transform_21(%arg0: i32) -> (i32, i32) {
    %c0_i32 = arith.constant 0 : i32
    %c0_i32_0 = arith.constant 0 : i32
    %c0_i32_1 = arith.constant 0 : i32
    return %c0_i32, %c0_i32_0 : i32, i32
  }
  func.func @transform_22(%arg0: i32) -> (i32, i32) {
    %c0_i32 = arith.constant 0 : i32
    %c0_i32_0 = arith.constant 0 : i32
    %c0_i32_1 = arith.constant 0 : i32
    return %c0_i32, %c0_i32_0 : i32, i32
  }
  func.func @transform_23(%arg0: i32) -> (i32, i32) {
    %c0_i32 = arith.constant 0 : i32
    %c0_i32_0 = arith.constant 0 : i32
    %c0_i32_1 = arith.constant 0 : i32
    return %c0_i32, %c0_i32_0 : i32, i32
  }
  func.func @transform_24(%arg0: i32) -> (i32, i32) {
    %c0_i32 = arith.constant 0 : i32
    %c0_i32_0 = arith.constant 0 : i32
    %c0_i32_1 = arith.constant 0 : i32
    return %c0_i32, %c0_i32_0 : i32, i32
  }
  func.func @transform_25(%arg0: i32) -> (i32, i32) {
    %c0_i32 = arith.constant 0 : i32
    %c0_i32_0 = arith.constant 0 : i32
    %c0_i32_1 = arith.constant 0 : i32
    return %c0_i32, %c0_i32_0 : i32, i32
  }
  func.func @transform_26(%arg0: i32) -> (i32, i32) {
    %c0_i32 = arith.constant 0 : i32
    %c0_i32_0 = arith.constant 0 : i32
    %c0_i32_1 = arith.constant 0 : i32
    return %c0_i32, %c0_i32_0 : i32, i32
  }
  func.func @transform_27(%arg0: i32) -> (i32, i32) {
    %c0_i32 = arith.constant 0 : i32
    %c0_i32_0 = arith.constant 0 : i32
    %c0_i32_1 = arith.constant 0 : i32
    return %c0_i32, %c0_i32_0 : i32, i32
  }
  func.func @transform_28(%arg0: i32) -> (i32, i32) {
    %c0_i32 = arith.constant 0 : i32
    %c0_i32_0 = arith.constant 0 : i32
    %c0_i32_1 = arith.constant 0 : i32
    return %c0_i32, %c0_i32_0 : i32, i32
  }
  func.func @transform_29(%arg0: i32) -> (i32, i32) {
    %c0_i32 = arith.constant 0 : i32
    %c0_i32_0 = arith.constant 0 : i32
    return %arg0, %c0_i32 : i32, i32
  }
}

</mosaic_0001>

<bundles_post_ra>
// kernel: reward_model_forward.1
= control target key start
LH: loop header
LB: loop body
LE: loop exit
PB: predicated region body
PF: predicated region fallthrough
CT: control target
= control target key end

     0   :  { %s6078_s6 = smov 1   ;;  %s6079_s10 = smov 2   ;;  %s6715_s0 = inlined_call_operand.smem [shape: u32[30], index: -1, kind: input, shape index: {}] }
   0x1   :  { %s6145_s5 = sld [smem:[%s6715_s0]]   ;;  %s6080_s14 = smov 3  }
   0x2   :  { %s6150_s9 = sld [smem:[%s6715_s0 + %s6078_s6]]   ;;  %s6081_s18 = smov 4  }
   0x3   :  { %s6155_s13 = sld [smem:[%s6715_s0 + %s6079_s10]]   ;;  %s6082_s22 = smov 5  }
   0x4   :  { %s6160_s17 = sld [smem:[%s6715_s0 + %s6080_s14]]   ;;  %s6083_s26 = smov 6  }
   0x5   :  { %s6165_s21 = sld [smem:[%s6715_s0 + %s6081_s18]]   ;;  %s6084_s30 = smov 7  }
   0x6   :  { %s6170_s25 = sld [smem:[%s6715_s0 + %s6082_s22]]   ;;  %s6085_s4 = smov 8  }
   0x7   :  { %6725 = sst [smem:[#allocation45_spill]] %s6145_s5  ;;  %s6086_s10 = smov 9  }
   0x8   :  { %6726 = sst [smem:[#allocation46_spill]] %s6150_s9  ;;  %s6087_s15 = smov 10  }
   0x9   :  { %6727 = sst [smem:[#allocation47_spill]] %s6155_s13  ;;  %s6088_s20 = smov 11  }
   0xa   :  { %s6175_s29 = sld [smem:[%s6715_s0 + %s6083_s26]]   ;;  %s6089_s26 = smov 12  }
   0xb   :  { %s6180_s3 = sld [smem:[%s6715_s0 + %s6084_s30]]   ;;  %s6090_s1 = smov 13  }
   0xc   :  { %s6185_s8 = sld [smem:[%s6715_s0 + %s6085_s4]]   ;;  %s6091_s7 = smov 14  }
   0xd   :  { %s6190_s14 = sld [smem:[%s6715_s0 + %s6086_s10]]   ;;  %s6093_s22 = smov 16  }
   0xe   :  { %s6195_s19 = sld [smem:[%s6715_s0 + %s6087_s15]]   ;;  %s6092_s15 = smov 15  }
   0xf   :  { %s6200_s24 = sld [smem:[%s6715_s0 + %s6088_s20]]   ;;  %s6094_s28 = smov 17  }
  0x10   :  { %s6205_s30 = sld [smem:[%s6715_s0 + %s6089_s26]]  }
  0x11   :  { %s6210_s6 = sld [smem:[%s6715_s0 + %s6090_s1]]   ;;  %s6106_s1 = smov 29  }
  0x12   :  { %s6215_s12 = sld [smem:[%s6715_s0 + %s6091_s7]]   ;;  %s6095_s7 = smov 18  }
  0x13   :  { %s6220_s20 = sld [smem:[%s6715_s0 + %s6092_s15]]   ;;  %s6096_s15 = smov 19  }
  0x14   :  { %s6225_s27 = sld [smem:[%s6715_s0 + %s6093_s22]]   ;;  %s6097_s22 = smov 20  }
  0x15   :  { %s6230_s4 = sld [smem:[%s6715_s0 + %s6094_s28]]   ;;  %s6098_s28 = smov 21  }
  0x16   :  { %s6235_s13 = sld [smem:[%s6715_s0 + %s6095_s7]]   ;;  %s6099_s7 = smov 22  }
  0x17   :  { %6728 = sst [smem:[#allocation48_spill]] %s6210_s6 }
  0x18   :  { %6729 = sst [smem:[#allocation49_spill]] %s6215_s12 }
  0x19   :  { %6730 = sst [smem:[#allocation50_spill]] %s6220_s20 }
  0x1a   :  { %s6240_s20 = sld [smem:[%s6715_s0 + %s6096_s15]]   ;;  %s6100_s15 = smov 23  }
  0x1b   :  { %6731 = sst [smem:[#allocation51_spill]] %s6230_s4 }
  0x1c   :  { %s6245_s6 = sld [smem:[%s6715_s0 + %s6097_s22]]   ;;  %s6101_s22 = smov 24  }
  0x1d   :  { %s6250_s9 = sld [smem:[%s6715_s0 + %s6098_s28]]   ;;  %s6102_s28 = smov 25  }
  0x1e   :  { %s6255_s5 = sld [smem:[%s6715_s0 + %s6099_s7]]   ;;  %s6103_s7 = smov 26  }
  0x1f   :  { %s6265_s4 = sld [smem:[%s6715_s0 + %s6101_s22]]   ;;  %s6105_s22 = smov 28  }
  0x20   :  { %6732 = sst [smem:[#allocation52_spill]] %s6240_s20 }
  0x21   :  { %s6260_s20 = sld [smem:[%s6715_s0 + %s6100_s15]]   ;;  %s6104_s15 = smov 27  }
  0x22   :  { %s6280_s12 = sld [smem:[%s6715_s0 + %s6104_s15]]  }
  0x23   :  { %6733 = sst [smem:[#allocation53_spill]] %s6250_s9 }
  0x24   :  { %6734 = sst [smem:[#allocation54_spill]] %s6255_s5 }
  0x25   :  { %6735 = sst [smem:[#allocation55_spill]] %s6265_s4 }
  0x26   :  { %s6270_s9 = sld [smem:[%s6715_s0 + %s6102_s28]]  }
  0x27   :  { %s6275_s5 = sld [smem:[%s6715_s0 + %s6103_s7]]  }
  0x28   :  { %s4702_s4 = sld [smem:[%s6715_s0 + %s6105_s22]]  }
  0x2c   :  { %6736 = sst [smem:[#allocation56_spill]] %s6270_s9 }
  0x2d   :  { %s6288_s9 = sld [smem:[%s6715_s0 + %s6106_s1]]  }
  0x2e   :  { %v64_v0 = vstv %s4702_s4 }
  0x2f   :  { %65 = vst [vmem:[#allocation2] sm:$0x1] %v64_v0 }
  0x30   :  { %66 = vsyncpa [#allocation4], 0 }
  0x31   :  { %67 = vsyncpa [#allocation6], 0 }
  0x32   :  { %68 = vsyncpa [#allocation9], 0 }
  0x33   :  { %69 = vsyncpa [#allocation12], 0 }
  0x34   :  { %70 = vsyncpa [#allocation15], 0 }
  0x35   :  { %71 = vsyncpa [#allocation18], 0 }
  0x36   :  { %72 = vsyncpa [#allocation21], 0 }
  0x37   :  { %73 = vsyncpa [#allocation24], 0 }
  0x38   :  { %74 = vsyncpa [#allocation27], 0 }
  0x39   :  { %75 = vsyncpa [#allocation30], 0 }
  0x3a   :  { %76 = vsyncpa [#allocation33], 0  ;;  %s6107_s7 = smov [#allocation5]   ;;  %s6108_s0 = smov [#allocation8]  }
  0x3b   :  { %s101_s10 = sshll.u32 %s6107_s7, 4  ;;  %s120_s11 = sshll.u32 %s6108_s0, 4  ;;  %s102_s10 = int_to_ptr.vmem [resolvable:$true] %s101_s10  ;;  %s6290_s11 = int_to_ptr.vmem [resolvable:$true] %s120_s11 }
  0x3c   :  { %s5616_s4 = scalar_lea.hbm %s6165_s21, 64 }
  0x3d   :  { %p5617_p0 = scmp.ne.s32.totalorder %s6165_s21, %s5616_s4  ;;  %p5620_p1 = scmp.lt.u32.totalorder %s5616_s4, %s6165_s21 }
  0x3f   :  { %p5622_p2 = pnand %p5620_p1, %p5617_p0 }
  0x41   :  { %5625 = shalt.err (!%p5622_p2)
}
  0x42   :  { %s5626_s15 = scalar_lea.vmem %s102_s10, 64  ;;  %p5631_p4 = scmp.lt.s32.totalorder %s102_s10, %s102_s10 }
  0x43   :  { %p5627_p3 = scmp.ne.s32.totalorder %s102_s10, %s5626_s15  ;;  %p5632_p5 = scmp.lt.s32.totalorder %s5626_s15, %s5626_s15 }
  0x45   :  { %p5633_p6 = por %p5632_p5, %p5631_p4 }
  0x47   :  { %p5634_p7 = pnand %p5633_p6, %p5627_p3 }
  0x49   :  { %5637 = shalt.err (!%p5634_p7)
}
  0x4a   :  { %104 = dma.hbm_to_vmem [thread:$0]  %s6165_s21, 64, %s102_s10, [#allocation6]  }
  0x4b   :  { %s5638_s16 = scalar_lea.hbm %s6175_s29, 4096 }
  0x4c   :  { %p5639_p8 = scmp.ne.s32.totalorder %s6175_s29, %s5638_s16  ;;  %p5642_p9 = scmp.lt.u32.totalorder %s5638_s16, %s6175_s29 }
  0x4e   :  { %p5644_p10 = pnand %p5642_p9, %p5639_p8 }
  0x50   :  { %5647 = shalt.err (!%p5644_p10)
}
  0x51   :  { %s5648_s18 = scalar_lea.vmem %s6290_s11, 4096  ;;  %p5653_p12 = scmp.lt.s32.totalorder %s6290_s11, %s6290_s11 }
  0x52   :  { %p5649_p11 = scmp.ne.s32.totalorder %s6290_s11, %s5648_s18  ;;  %p5654_p13 = scmp.lt.s32.totalorder %s5648_s18, %s5648_s18 }
  0x54   :  { %p5655_p0 = por %p5654_p13, %p5653_p12 }
  0x56   :  { %p5656_p1 = pnand %p5655_p0, %p5649_p11 }
  0x58   :  { %5659 = shalt.err (!%p5656_p1)
}
  0x59   :  { %s6109_s22 = smov 64   ;;  %s6110_s21 = smov 4  }
  0x5a   :  { %126 = dma.hbm_to_vmem [thread:$0]  %s6175_s29, 4096, %s6290_s11, [#allocation9], %s6109_s22, %s6109_s22, %s6110_s21  }
  0x5b   :  { %s6111_s23 = smov [#allocation11]   ;;  %s6112_s1 = smov [#allocation14]  }
  0x5c   :  { %s142_s26 = sshll.u32 %s6111_s23, 4  ;;  %s165_s28 = sshll.u32 %s6112_s1, 4  ;;  %s143_s26 = int_to_ptr.vmem [resolvable:$true] %s142_s26  ;;  %s166_s28 = int_to_ptr.vmem [resolvable:$true] %s165_s28 }
  0x5d   :  { %s5660_s2 = scalar_lea.hbm %s6185_s8, 16384 }
  0x5e   :  { %p5661_p2 = scmp.ne.s32.totalorder %s6185_s8, %s5660_s2  ;;  %p5664_p3 = scmp.lt.u32.totalorder %s5660_s2, %s6185_s8 }
  0x60   :  { %p5666_p4 = pnand %p5664_p3, %p5661_p2 }
  0x62   :  { %5669 = shalt.err (!%p5666_p4)
}
  0x63   :  { %s5670_s7 = scalar_lea.vmem %s143_s26, 16384  ;;  %p5675_p6 = scmp.lt.s32.totalorder %s143_s26, %s143_s26 }
  0x64   :  { %p5671_p5 = scmp.ne.s32.totalorder %s143_s26, %s5670_s7  ;;  %p5676_p7 = scmp.lt.s32.totalorder %s5670_s7, %s5670_s7 }
  0x66   :  { %p5677_p8 = por %p5676_p7, %p5675_p6 }
  0x68   :  { %p5678_p9 = pnand %p5677_p8, %p5671_p5 }
  0x6a   :  { %5681 = shalt.err (!%p5678_p9)
}
  0x6b   :  { %s6113_s10 = smov 512   ;;  %s6114_s29 = smov 32  }
  0x6c   :  { %148 = dma.hbm_to_vmem [thread:$0]  %s6185_s8, 16384, %s143_s26, [#allocation12], %s6113_s10, %s6113_s10, %s6114_s29  }
  0x6d   :  { %s5682_s0 = scalar_lea.hbm %s6195_s19, 64 }
  0x6e   :  { %p5683_p10 = scmp.ne.s32.totalorder %s6195_s19, %s5682_s0  ;;  %p5686_p11 = scmp.lt.u32.totalorder %s5682_s0, %s6195_s19 }
  0x70   :  { %p5688_p12 = pnand %p5686_p11, %p5683_p10 }
  0x72   :  { %5691 = shalt.err (!%p5688_p12)
}
  0x73   :  { %s5692_s11 = scalar_lea.vmem %s166_s28, 64  ;;  %p5697_p0 = scmp.lt.s32.totalorder %s166_s28, %s166_s28 }
  0x74   :  { %p5693_p13 = scmp.ne.s32.totalorder %s166_s28, %s5692_s11  ;;  %p5698_p1 = scmp.lt.s32.totalorder %s5692_s11, %s5692_s11 }
  0x76   :  { %p5699_p2 = por %p5698_p1, %p5697_p0 }
  0x78   :  { %p5700_p3 = pnand %p5699_p2, %p5693_p13 }
  0x7a   :  { %5703 = shalt.err (!%p5700_p3)
}
  0x7b   :  { %168 = dma.hbm_to_vmem [thread:$0]  %s6195_s19, 64, %s166_s28, [#allocation15]  }
  0x7c   :  { %s6115_s4 = smov [#allocation17]   ;;  %s6116_s8 = smov [#allocation20]  }
  0x7d   :  { %s187_s15 = sshll.u32 %s6115_s4, 4  ;;  %s211_s16 = sshll.u32 %s6116_s8, 4  ;;  %s188_s15 = int_to_ptr.vmem [resolvable:$true] %s187_s15  ;;  %s212_s16 = int_to_ptr.vmem [resolvable:$true] %s211_s16 }
  0x7e   :  { %s5704_s18 = scalar_lea.hbm %s6205_s30, 16 }
  0x7f   :  { %p5705_p4 = scmp.ne.s32.totalorder %s6205_s30, %s5704_s18  ;;  %p5708_p5 = scmp.lt.u32.totalorder %s5704_s18, %s6205_s30 }
  0x81   :  { %p5710_p6 = pnand %p5708_p5, %p5705_p4 }
  0x83   :  { %5713 = shalt.err (!%p5710_p6)
}
  0x84   :  { %s5714_s23 = scalar_lea.vmem %s188_s15, 16  ;;  %s5718_s26 = scalar_lea.vmem %s188_s15, 32 }
  0x85   :  { %p5715_p7 = scmp.ne.s32.totalorder %s188_s15, %s5714_s23  ;;  %p5719_p8 = scmp.lt.s32.totalorder %s188_s15, %s188_s15 }
  0x86   :  { %p5720_p9 = scmp.lt.s32.totalorder %s5718_s26, %s5714_s23 }
  0x88   :  { %p5721_p10 = por %p5720_p9, %p5719_p8 }
  0x8a   :  { %p5722_p11 = pnand %p5721_p10, %p5715_p7 }
  0x8c   :  { %5725 = shalt.err (!%p5722_p11)
}
  0x8d   :  { %190 = dma.hbm_to_vmem [thread:$0]  %s6205_s30, 16, %s188_s15, [#allocation18]  }
  0x8e   :  { %s5726_s19 = scalar_lea.hbm %s6225_s27, 16 }
  0x8f   :  { %p5727_p12 = scmp.ne.s32.totalorder %s6225_s27, %s5726_s19  ;;  %p5730_p13 = scmp.lt.u32.totalorder %s5726_s19, %s6225_s27 }
  0x91   :  { %p5732_p0 = pnand %p5730_p13, %p5727_p12 }
  0x93   :  { %5735 = shalt.err (!%p5732_p0)
}
  0x94   :  { %s5736_s1 = scalar_lea.vmem %s212_s16, 16  ;;  %s5740_s28 = scalar_lea.vmem %s212_s16, 32 }
  0x95   :  { %p5737_p1 = scmp.ne.s32.totalorder %s212_s16, %s5736_s1  ;;  %p5741_p2 = scmp.lt.s32.totalorder %s212_s16, %s212_s16 }
  0x96   :  { %p5742_p3 = scmp.lt.s32.totalorder %s5740_s28, %s5736_s1 }
  0x98   :  { %p5743_p4 = por %p5742_p3, %p5741_p2 }
  0x9a   :  { %p5744_p5 = pnand %p5743_p4, %p5737_p1 }
  0x9c   :  { %5747 = shalt.err (!%p5744_p5)
}
  0x9d   :  { %214 = dma.hbm_to_vmem [thread:$0]  %s6225_s27, 16, %s212_s16, [#allocation21]  }
  0x9e   :  { %s6117_s2 = smov [#allocation23]   ;;  %s6118_s7 = smov [#allocation26]  }
  0x9f   :  { %s232_s30 = sshll.u32 %s6117_s2, 4  ;;  %s257_s0 = sshll.u32 %s6118_s7, 4  ;;  %s233_s30 = int_to_ptr.vmem [resolvable:$true] %s232_s30  ;;  %s258_s0 = int_to_ptr.vmem [resolvable:$true] %s257_s0 }
  0xa0   :  { %s5748_s11 = scalar_lea.hbm %s6235_s13, 4096 }
  0xa1   :  { %p5749_p6 = scmp.ne.s32.totalorder %s6235_s13, %s5748_s11  ;;  %p5752_p7 = scmp.lt.u32.totalorder %s5748_s11, %s6235_s13 }
  0xa3   :  { %p5754_p8 = pnand %p5752_p7, %p5749_p6 }
  0xa5   :  { %5757 = shalt.err (!%p5754_p8)
}
  0xa6   :  { %s5758_s4 = scalar_lea.vmem %s233_s30, 4096  ;;  %p5763_p10 = scmp.lt.s32.totalorder %s233_s30, %s233_s30 }
  0xa7   :  { %p5759_p9 = scmp.ne.s32.totalorder %s233_s30, %s5758_s4  ;;  %p5764_p11 = scmp.lt.s32.totalorder %s5758_s4, %s5758_s4 }
  0xa9   :  { %p5765_p12 = por %p5764_p11, %p5763_p10 }
  0xab   :  { %p5766_p13 = pnand %p5765_p12, %p5759_p9 }
  0xad   :  { %5769 = shalt.err (!%p5766_p13)
}
  0xae   :  { %s6119_s15 = smov 256   ;;  %s6120_s27 = smov 16  }
  0xaf   :  { %238 = dma.hbm_to_vmem [thread:$0]  %s6235_s13, 4096, %s233_s30, [#allocation24], %s6119_s15, %s6119_s15, %s6120_s27  }
  0xb0   :  { %s5770_s8 = scalar_lea.hbm %s6245_s6, 64 }
  0xb1   :  { %p5771_p0 = scmp.ne.s32.totalorder %s6245_s6, %s5770_s8  ;;  %p5774_p1 = scmp.lt.u32.totalorder %s5770_s8, %s6245_s6 }
  0xb3   :  { %p5776_p2 = pnand %p5774_p1, %p5771_p0 }
  0xb5   :  { %5779 = shalt.err (!%p5776_p2)
}
  0xb6   :  { %s5780_s16 = scalar_lea.vmem %s258_s0, 64  ;;  %p5785_p4 = scmp.lt.s32.totalorder %s258_s0, %s258_s0 }
  0xb7   :  { %p5781_p3 = scmp.ne.s32.totalorder %s258_s0, %s5780_s16  ;;  %p5786_p5 = scmp.lt.s32.totalorder %s5780_s16, %s5780_s16 }
  0xb9   :  { %p5787_p6 = por %p5786_p5, %p5785_p4 }
  0xbb   :  { %p5788_p7 = pnand %p5787_p6, %p5781_p3 }
  0xbd   :  { %5791 = shalt.err (!%p5788_p7)
}
  0xbe   :  { %260 = dma.hbm_to_vmem [thread:$0]  %s6245_s6, 64, %s258_s0, [#allocation27]  }
  0xbf   :  { %s6121_s18 = smov [#allocation29]   ;;  %s6122_s13 = smov [#allocation3]  }
  0xc0   :  { %s278_s23 = sshll.u32 %s6121_s18, 4  ;;  %s88_s26 = sshll.u32 %s6122_s13, 4  ;;  %s279_s23 = int_to_ptr.vmem [resolvable:$true] %s278_s23  ;;  %s6338_s26 = int_to_ptr.vmem [resolvable:$true] %s88_s26 }
  0xc1   :  { %s5792_s19 = scalar_lea.hbm %s6260_s20, 2048 }
  0xc2   :  { %p5793_p8 = scmp.ne.s32.totalorder %s6260_s20, %s5792_s19  ;;  %p5796_p9 = scmp.lt.u32.totalorder %s5792_s19, %s6260_s20 }
  0xc4   :  { %p5798_p10 = pnand %p5796_p9, %p5793_p8 }
  0xc6   :  { %5801 = shalt.err (!%p5798_p10)
}
  0xc7   :  { %s5802_s1 = scalar_lea.vmem %s279_s23, 2048  ;;  %p5807_p12 = scmp.lt.s32.totalorder %s279_s23, %s279_s23 }
  0xc8   :  { %p5803_p11 = scmp.ne.s32.totalorder %s279_s23, %s5802_s1  ;;  %p5808_p13 = scmp.lt.s32.totalorder %s5802_s1, %s5802_s1 }
  0xca   :  { %p5809_p0 = por %p5808_p13, %p5807_p12 }
  0xcc   :  { %p5810_p1 = pnand %p5809_p0, %p5803_p11 }
  0xce   :  { %5813 = shalt.err (!%p5810_p1)
}
  0xcf   :  { %284 = dma.hbm_to_vmem [thread:$0]  %s6260_s20, 2048, %s279_s23, [#allocation30], %s6109_s22, %s6109_s22, %s6110_s21  }
  0xd0   :  { %s5814_s6 = scalar_lea.hbm %s6160_s17, 16384 }
  0xd1   :  { %p5815_p2 = scmp.ne.s32.totalorder %s6160_s17, %s5814_s6  ;;  %p5818_p3 = scmp.lt.u32.totalorder %s5814_s6, %s6160_s17 }
  0xd3   :  { %p5820_p4 = pnand %p5818_p3, %p5815_p2 }
  0xd5   :  { %5823 = shalt.err (!%p5820_p4)
}
  0xd6   :  { %s5824_s28 = scalar_lea.vmem %s6338_s26, 16384  ;;  %p5829_p6 = scmp.lt.s32.totalorder %s6338_s26, %s6338_s26 }
  0xd7   :  { %p5825_p5 = scmp.ne.s32.totalorder %s6338_s26, %s5824_s28  ;;  %p5830_p7 = scmp.lt.s32.totalorder %s5824_s28, %s5824_s28 }
  0xd9   :  { %p5831_p8 = por %p5830_p7, %p5829_p6 }
  0xdb   :  { %p5832_p9 = pnand %p5831_p8, %p5825_p5 }
  0xdd   :  { %5835 = shalt.err (!%p5832_p9)
}
  0xde   :  { %94 = dma.hbm_to_vmem [thread:$0]  %s6160_s17, 16384, %s6338_s26, [#allocation4], %s6113_s10, %s6113_s10, %s6114_s29  }
  0xdf   :  { %s6123_s20 = smov [#allocation7]   ;;  %s6124_s30 = smov [#allocation10]  }
  0xe0   :  { %s111_s2 = sshll.u32 %s6123_s20, 4  ;;  %s133_s7 = sshll.u32 %s6124_s30, 4  ;;  %s112_s2 = int_to_ptr.vmem [resolvable:$true] %s111_s2  ;;  %s134_s7 = int_to_ptr.vmem [resolvable:$true] %s133_s7 }
  0xe1   :  { %s5836_s0 = scalar_lea.hbm %s6170_s25, 64 }
  0xe2   :  { %p5837_p10 = scmp.ne.s32.totalorder %s6170_s25, %s5836_s0  ;;  %p5840_p11 = scmp.lt.u32.totalorder %s5836_s0, %s6170_s25 }
  0xe4   :  { %p5842_p12 = pnand %p5840_p11, %p5837_p10 }
  0xe6   :  { %5845 = shalt.err (!%p5842_p12)
}
  0xe7   :  { %s5846_s11 = scalar_lea.vmem %s112_s2, 64  ;;  %p5851_p0 = scmp.lt.s32.totalorder %s112_s2, %s112_s2 }
  0xe8   :  { %p5847_p13 = scmp.ne.s32.totalorder %s112_s2, %s5846_s11  ;;  %p5852_p1 = scmp.lt.s32.totalorder %s5846_s11, %s5846_s11 }
  0xea   :  { %p5853_p2 = por %p5852_p1, %p5851_p0 }
  0xec   :  { %p5854_p3 = pnand %p5853_p2, %p5847_p13 }
  0xee   :  { %5857 = shalt.err (!%p5854_p3)
}
  0xef   :  { %114 = dma.hbm_to_vmem [thread:$0]  %s6170_s25, 64, %s112_s2, [#allocation6]  }
  0xf0   :  { %s5858_s17 = scalar_lea.hbm %s6180_s3, 16 }
  0xf1   :  { %p5859_p4 = scmp.ne.s32.totalorder %s6180_s3, %s5858_s17  ;;  %p5862_p5 = scmp.lt.u32.totalorder %s5858_s17, %s6180_s3 }
  0xf3   :  { %p5864_p6 = pnand %p5862_p5, %p5859_p4 }
  0xf5   :  { %5867 = shalt.err (!%p5864_p6)
}
  0xf6   :  { %s5868_s10 = scalar_lea.vmem %s134_s7, 16  ;;  %s5872_s29 = scalar_lea.vmem %s134_s7, 32 }
  0xf7   :  { %p5869_p7 = scmp.ne.s32.totalorder %s134_s7, %s5868_s10  ;;  %p5873_p8 = scmp.lt.s32.totalorder %s134_s7, %s134_s7 }
  0xf8   :  { %p5874_p9 = scmp.lt.s32.totalorder %s5872_s29, %s5868_s10 }
  0xfa   :  { %p5875_p10 = por %p5874_p9, %p5873_p8 }
  0xfc   :  { %p5876_p11 = pnand %p5875_p10, %p5869_p7 }
  0xfe   :  { %5879 = shalt.err (!%p5876_p11)
}
  0xff   :  { %136 = dma.hbm_to_vmem [thread:$0]  %s6180_s3, 16, %s134_s7, [#allocation9]  }
 0x100   :  { %s6125_s4 = smov [#allocation13]   ;;  %s6126_s8 = smov [#allocation16]  }
 0x101   :  { %s155_s25 = sshll.u32 %s6125_s4, 4  ;;  %s174_s16 = sshll.u32 %s6126_s8, 4  ;;  %s156_s25 = int_to_ptr.vmem [resolvable:$true] %s155_s25  ;;  %s6367_s16 = int_to_ptr.vmem [resolvable:$true] %s174_s16 }
 0x102   :  { %s5880_s18 = scalar_lea.hbm %s6190_s14, 64 }
 0x103   :  { %p5881_p12 = scmp.ne.s32.totalorder %s6190_s14, %s5880_s18  ;;  %p5884_p13 = scmp.lt.u32.totalorder %s5880_s18, %s6190_s14 }
 0x105   :  { %p5886_p0 = pnand %p5884_p13, %p5881_p12 }
 0x107   :  { %5889 = shalt.err (!%p5886_p0)
}
 0x108   :  { %s5890_s23 = scalar_lea.vmem %s156_s25, 64  ;;  %p5895_p2 = scmp.lt.s32.totalorder %s156_s25, %s156_s25 }
 0x109   :  { %p5891_p1 = scmp.ne.s32.totalorder %s156_s25, %s5890_s23  ;;  %p5896_p3 = scmp.lt.s32.totalorder %s5890_s23, %s5890_s23 }
 0x10b   :  { %p5897_p4 = por %p5896_p3, %p5895_p2 }
 0x10d   :  { %p5898_p5 = pnand %p5897_p4, %p5891_p1 }
 0x10f   :  { %5901 = shalt.err (!%p5898_p5)
}
 0x110   :  { %158 = dma.hbm_to_vmem [thread:$0]  %s6190_s14, 64, %s156_s25, [#allocation12]  }
 0x111   :  { %s5902_s3 = scalar_lea.hbm %s6200_s24, 4096 }
 0x112   :  { %p5903_p6 = scmp.ne.s32.totalorder %s6200_s24, %s5902_s3  ;;  %p5906_p7 = scmp.lt.u32.totalorder %s5902_s3, %s6200_s24 }
 0x114   :  { %p5908_p8 = pnand %p5906_p7, %p5903_p6 }
 0x116   :  { %5911 = shalt.err (!%p5908_p8)
}
 0x117   :  { %s5912_s13 = scalar_lea.vmem %s6367_s16, 4096  ;;  %p5917_p10 = scmp.lt.s32.totalorder %s6367_s16, %s6367_s16 }
 0x118   :  { %p5913_p9 = scmp.ne.s32.totalorder %s6367_s16, %s5912_s13  ;;  %p5918_p11 = scmp.lt.s32.totalorder %s5912_s13, %s5912_s13 }
 0x11a   :  { %p5919_p12 = por %p5918_p11, %p5917_p10 }
 0x11c   :  { %p5920_p13 = pnand %p5919_p12, %p5913_p9 }
 0x11e   :  { %5923 = shalt.err (!%p5920_p13)
}
 0x11f   :  { %s6737_s14 = sld [smem:[#allocation49_spill]]  ;;  %s6127_s26 = smov [#allocation19]  }
 0x120   :  { %180 = dma.hbm_to_vmem [thread:$0]  %s6200_s24, 4096, %s6367_s16, [#allocation15], %s6109_s22, %s6109_s22, %s6110_s21  }
 0x121   :  { %s199_s19 = sshll.u32 %s6127_s26, 4  ;;  %s6128_s1 = smov [#allocation22]   ;;  %s200_s19 = int_to_ptr.vmem [resolvable:$true] %s199_s19 }
 0x122   :  { %s220_s6 = sshll.u32 %s6128_s1, 4  ;;  %s6385_s6 = int_to_ptr.vmem [resolvable:$true] %s220_s6 }
 0x125   :  { %s5924_s28 = scalar_lea.hbm %s6737_s14, 32 }
 0x126   :  { %p5925_p0 = scmp.ne.s32.totalorder %s6737_s14, %s5924_s28  ;;  %p5928_p1 = scmp.lt.u32.totalorder %s5924_s28, %s6737_s14 }
 0x128   :  { %p5930_p2 = pnand %p5928_p1, %p5925_p0 }
 0x12a   :  { %5933 = shalt.err (!%p5930_p2)
}
 0x12b   :  { %s5934_s20 = scalar_lea.vmem %s200_s19, 32  ;;  %p5939_p4 = scmp.lt.s32.totalorder %s200_s19, %s200_s19 }
 0x12c   :  { %p5935_p3 = scmp.ne.s32.totalorder %s200_s19, %s5934_s20  ;;  %p5940_p5 = scmp.lt.s32.totalorder %s5934_s20, %s5934_s20 }
 0x12e   :  { %p5941_p6 = por %p5940_p5, %p5939_p4 }
 0x130   :  { %p5942_p7 = pnand %p5941_p6, %p5935_p3 }
 0x132   :  { %5945 = shalt.err (!%p5942_p7)
}
 0x133   :  { %s6738_s24 = sld [smem:[#allocation51_spill]] }
 0x134   :  { %202 = dma.hbm_to_vmem [thread:$0]  %s6737_s14, 32, %s200_s19, [#allocation18]  }
 0x139   :  { %s5946_s22 = scalar_lea.hbm %s6738_s24, 4096 }
 0x13a   :  { %p5947_p8 = scmp.ne.s32.totalorder %s6738_s24, %s5946_s22  ;;  %p5950_p9 = scmp.lt.u32.totalorder %s5946_s22, %s6738_s24 }
 0x13c   :  { %p5952_p10 = pnand %p5950_p9, %p5947_p8 }
 0x13e   :  { %5955 = shalt.err (!%p5952_p10)
}
 0x13f   :  { %s5956_s21 = scalar_lea.vmem %s6385_s6, 4096  ;;  %p5961_p12 = scmp.lt.s32.totalorder %s6385_s6, %s6385_s6 }
 0x140   :  { %p5957_p11 = scmp.ne.s32.totalorder %s6385_s6, %s5956_s21  ;;  %p5962_p13 = scmp.lt.s32.totalorder %s5956_s21, %s5956_s21 }
 0x142   :  { %p5963_p0 = por %p5962_p13, %p5961_p12 }
 0x144   :  { %p5964_p1 = pnand %p5963_p0, %p5957_p11 }
 0x146   :  { %5967 = shalt.err (!%p5964_p1)
}
 0x147   :  { %s6739_s2 = sld [smem:[#allocation52_spill]]  ;;  %s6129_s30 = smov [#allocation25]  }
 0x148   :  { %226 = dma.hbm_to_vmem [thread:$0]  %s6738_s24, 4096, %s6385_s6, [#allocation21], %s6119_s15, %s6119_s15, %s6120_s27  }
 0x149   :  { %s244_s7 = sshll.u32 %s6129_s30, 4  ;;  %s6130_s0 = smov [#allocation28]   ;;  %s245_s7 = int_to_ptr.vmem [resolvable:$true] %s244_s7 }
 0x14a   :  { %s269_s11 = sshll.u32 %s6130_s0, 4  ;;  %s270_s11 = int_to_ptr.vmem [resolvable:$true] %s269_s11 }
 0x14d   :  { %s5968_s17 = scalar_lea.hbm %s6739_s2, 4096 }
 0x14e   :  { %p5969_p2 = scmp.ne.s32.totalorder %s6739_s2, %s5968_s17  ;;  %p5972_p3 = scmp.lt.u32.totalorder %s5968_s17, %s6739_s2 }
 0x150   :  { %p5974_p4 = pnand %p5972_p3, %p5969_p2 }
 0x152   :  { %5977 = shalt.err (!%p5974_p4)
}
 0x153   :  { %s5978_s10 = scalar_lea.vmem %s245_s7, 4096  ;;  %p5983_p6 = scmp.lt.s32.totalorder %s245_s7, %s245_s7 }
 0x154   :  { %p5979_p5 = scmp.ne.s32.totalorder %s245_s7, %s5978_s10  ;;  %p5984_p7 = scmp.lt.s32.totalorder %s5978_s10, %s5978_s10 }
 0x156   :  { %p5985_p8 = por %p5984_p7, %p5983_p6 }
 0x158   :  { %p5986_p9 = pnand %p5985_p8, %p5979_p5 }
 0x15a   :  { %5989 = shalt.err (!%p5986_p9)
}
 0x15b   :  { %s6740_s29 = sld [smem:[#allocation54_spill]] }
 0x15c   :  { %250 = dma.hbm_to_vmem [thread:$0]  %s6739_s2, 4096, %s245_s7, [#allocation24], %s6119_s15, %s6119_s15, %s6120_s27  }
 0x161   :  { %s5990_s4 = scalar_lea.hbm %s6740_s29, 32 }
 0x162   :  { %p5991_p10 = scmp.ne.s32.totalorder %s6740_s29, %s5990_s4  ;;  %p5994_p11 = scmp.lt.u32.totalorder %s5990_s4, %s6740_s29 }
 0x164   :  { %p5996_p12 = pnand %p5994_p11, %p5991_p10 }
 0x166   :  { %5999 = shalt.err (!%p5996_p12)
}
 0x167   :  { %s6000_s25 = scalar_lea.vmem %s270_s11, 32  ;;  %p6005_p0 = scmp.lt.s32.totalorder %s270_s11, %s270_s11 }
 0x168   :  { %p6001_p13 = scmp.ne.s32.totalorder %s270_s11, %s6000_s25  ;;  %p6006_p1 = scmp.lt.s32.totalorder %s6000_s25, %s6000_s25 }
 0x16a   :  { %p6007_p2 = por %p6006_p1, %p6005_p0 }
 0x16c   :  { %p6008_p3 = pnand %p6007_p2, %p6001_p13 }
 0x16e   :  { %6011 = shalt.err (!%p6008_p3)
}
 0x16f   :  { %s6741_s8 = sld [smem:[#allocation55_spill]]  ;;  %s6131_s16 = smov [#allocation31]  }
 0x170   :  { %272 = dma.hbm_to_vmem [thread:$0]  %s6740_s29, 32, %s270_s11, [#allocation27]  }
 0x171   :  { %s291_s18 = sshll.u32 %s6131_s16, 4  ;;  %s6132_s15 = smov [#allocation32]   ;;  %s292_s18 = int_to_ptr.vmem [resolvable:$true] %s291_s18 }
 0x172   :  { %s303_s27 = sshll.u32 %s6132_s15, 4  ;;  %s304_s27 = int_to_ptr.vmem [resolvable:$true] %s303_s27 }
 0x175   :  { %s6012_s23 = scalar_lea.hbm %s6741_s8, 16 }
 0x176   :  { %p6013_p4 = scmp.ne.s32.totalorder %s6741_s8, %s6012_s23  ;;  %p6016_p5 = scmp.lt.u32.totalorder %s6012_s23, %s6741_s8 }
 0x178   :  { %p6018_p6 = pnand %p6016_p5, %p6013_p4 }
 0x17a   :  { %6021 = shalt.err (!%p6018_p6)
}
 0x17b   :  { %s6022_s3 = scalar_lea.vmem %s292_s18, 16  ;;  %s6026_s13 = scalar_lea.vmem %s292_s18, 32 }
 0x17c   :  { %p6023_p7 = scmp.ne.s32.totalorder %s292_s18, %s6022_s3  ;;  %p6027_p8 = scmp.lt.s32.totalorder %s292_s18, %s292_s18 }
 0x17d   :  { %p6028_p9 = scmp.lt.s32.totalorder %s6026_s13, %s6022_s3 }
 0x17f   :  { %p6029_p10 = por %p6028_p9, %p6027_p8 }
 0x181   :  { %p6030_p11 = pnand %p6029_p10, %p6023_p7 }
 0x183   :  { %6033 = shalt.err (!%p6030_p11)
}
 0x184   :  { %294 = dma.hbm_to_vmem [thread:$0]  %s6741_s8, 16, %s292_s18, [#allocation30]  }
 0x185   :  { %s6034_s14 = scalar_lea.hbm %s6275_s5, 16 }
 0x186   :  { %p6035_p12 = scmp.ne.s32.totalorder %s6275_s5, %s6034_s14  ;;  %p6038_p13 = scmp.lt.u32.totalorder %s6034_s14, %s6275_s5 }
 0x188   :  { %p6040_p0 = pnand %p6038_p13, %p6035_p12 }
 0x18a   :  { %6043 = shalt.err (!%p6040_p0)
}
 0x18b   :  { %s6044_s26 = scalar_lea.vmem %s304_s27, 16  ;;  %s6048_s19 = scalar_lea.vmem %s304_s27, 32 }
 0x18c   :  { %p6045_p1 = scmp.ne.s32.totalorder %s304_s27, %s6044_s26  ;;  %p6049_p2 = scmp.lt.s32.totalorder %s304_s27, %s304_s27 }
 0x18d   :  { %p6050_p3 = scmp.lt.s32.totalorder %s6048_s19, %s6044_s26 }
 0x18f   :  { %p6051_p4 = por %p6050_p3, %p6049_p2 }
 0x191   :  { %p6052_p5 = pnand %p6051_p4, %p6045_p1 }
 0x193   :  { %6055 = shalt.err (!%p6052_p5)
}
 0x194   :  { %306 = dma.hbm_to_vmem [thread:$0]  %s6275_s5, 16, %s304_s27, [#allocation33]  }
 0x195   :  { %6056 = dma.done.wait [#allocation4], 16384  }
 0x196   :  { %6057 = vsyncadd [#allocation4], 4294950912 }
 0x197   :  { %6058 = dma.done.wait [#allocation6], 128  }
 0x198   :  { %6059 = vsyncadd [#allocation6], 4294967168 }
 0x199   :  { %6060 = dma.done.wait [#allocation9], 4112  }
 0x19a   :  { %6061 = vsyncadd [#allocation9], 4294963184 }
 0x19b   :  { %6062 = dma.done.wait [#allocation12], 16448  }
 0x19c   :  { %6063 = vsyncadd [#allocation12], 4294950848 }
 0x19d   :  { %6064 = dma.done.wait [#allocation15], 4160  }
 0x19e   :  { %6065 = vsyncadd [#allocation15], 4294963136 }
 0x19f   :  { %6066 = dma.done.wait [#allocation18], 48  }
 0x1a0   :  { %6067 = vsyncadd [#allocation18], 4294967248 }
 0x1a1   :  { %6068 = dma.done.wait [#allocation21], 4112  }
 0x1a2   :  { %6069 = vsyncadd [#allocation21], 4294963184 }
 0x1a3   :  { %6070 = dma.done.wait [#allocation24], 8192  }
 0x1a4   :  { %6071 = vsyncadd [#allocation24], 4294959104 }
 0x1a5   :  { %6072 = dma.done.wait [#allocation27], 96  }
 0x1a6   :  { %6073 = vsyncadd [#allocation27], 4294967200 }
 0x1a7   :  { %6074 = dma.done.wait [#allocation30], 2064  }
 0x1a8   :  { %6075 = vsyncadd [#allocation30], 4294965232 }
 0x1a9   :  { %6076 = dma.done.wait [#allocation33], 16  }
 0x1aa   :  { %6077 = vsyncadd [#allocation33], 4294967280  ;;  %v373_v1 = vld [vmem:[#allocation3 + $0x8] sm:$0xff]  ;;  %v375_v2 = vld [vmem:[#allocation3 + $0x18] sm:$0xff]  ;;  %v6133_v19 = vmov 1966171168   ;;  %v762_v21 = vlaneseq }
 0x1ab   :  { %v372_v3 = vld [vmem:[#allocation3] sm:$0xff]  ;;  %v501_v4 = vunpack.c.l.s8.bf16 %v373_v1  ;;  %v505_v5 = vunpack.c.h.s8.bf16 %v373_v1  ;;  %v503_v6 = vunpack.c.l.s8.bf16 %v375_v2  ;;  %v507_v7 = vunpack.c.h.s8.bf16 %v375_v2  ;;  %v374_v8 = vld [vmem:[#allocation3 + $0x10] sm:$0xff]  ;;  %v377_v11 = vld [vmem:[#allocation3 + $0x28] sm:$0xff]  ;;  %s6742_s5 = sld [smem:[#allocation45_spill]]  ;;  %s6743_s1 = sld [smem:[#allocation46_spill]] }
 0x1ac   :  { %v500_v9 = vunpack.c.l.s8.bf16 %v372_v3  ;;  %v502_v10 = vunpack.c.l.s8.bf16 %v374_v8  ;;  %v379_v12 = vld [vmem:[#allocation3 + $0x38] sm:$0xff]  ;;  %v504_v13 = vunpack.c.h.s8.bf16 %v372_v3  ;;  %v506_v14 = vunpack.c.h.s8.bf16 %v374_v8  ;;  %v376_v17 = vld [vmem:[#allocation3 + $0x20] sm:$0xff]  ;;  %v378_v18 = vld [vmem:[#allocation3 + $0x30] sm:$0xff]  ;;  %s6744_s6 = sld [smem:[#allocation48_spill]]  ;;  %s6745_s28 = sld [smem:[#allocation47_spill]] }
 0x1ad   :  { %815 = vmatprep.subr.bf16.mxu0 %v501_v4  ;;  %979 = vmatprep.subr.bf16.mxu1 %v503_v6  ;;  %v509_v15 = vunpack.c.l.s8.bf16 %v377_v11  ;;  %v511_v16 = vunpack.c.l.s8.bf16 %v379_v12  ;;  %v760_v20 = vunpack.c.l.s4 %v6133_v19  ;;  %v508_v22 = vunpack.c.l.s8.bf16 %v376_v17  ;;  %v381_v28 = vld [vmem:[#allocation3 + $0x48] sm:$0xff]  ;;  %v383_v29 = vld [vmem:[#allocation3 + $0x58] sm:$0xff]  ;;  %v380_v34 = vld [vmem:[#allocation3 + $0x40] sm:$0xff]  ;;  %s6746_s20 = sld [smem:[#allocation50_spill]]  ;;  %s6747_s24 = sld [smem:[#allocation53_spill]] }
 0x1ae   :  { %816 = vmatpush1.bf16.msra.mxu0 %v500_v9  ;;  %980 = vmatpush1.bf16.msra.mxu1 %v502_v10  ;;  %v510_v23 = vunpack.c.l.s8.bf16 %v378_v18  ;;  %v513_v24 = vunpack.c.h.s8.bf16 %v377_v11  ;;  %v515_v25 = vunpack.c.h.s8.bf16 %v379_v12  ;;  %v6422_v27 = vshrl.u32 %v762_v21, 7  ;;  %v382_v35 = vld [vmem:[#allocation3 + $0x50] sm:$0xff]  ;;  %v385_v43 = vld [vmem:[#allocation3 + $0x68] sm:$0xff]  ;;  %v387_v44 = vld [vmem:[#allocation3 + $0x78] sm:$0xff]  ;;  %s6748_s22 = sld [smem:[#allocation56_spill]] }
 0x1af   :  { %817 = vmatprep.subr.bf16.mxu0 %v505_v5  ;;  %981 = vmatprep.subr.bf16.mxu1 %v507_v7  ;;  %v761_v26 = vunpack.c.0.s8 %v760_v20  ;;  %v512_v30 = vunpack.c.h.s8.bf16 %v376_v17  ;;  %v514_v31 = vunpack.c.h.s8.bf16 %v378_v18  ;;  %v517_v32 = vunpack.c.l.s8.bf16 %v381_v28  ;;  %v384_v50 = vld [vmem:[#allocation3 + $0x60] sm:$0xff]  ;;  %v386_v51 = vld [vmem:[#allocation3 + $0x70] sm:$0xff]  ;;  %v389_v57 = vld [vmem:[#allocation3 + $0x88] sm:$0xff] }
 0x1b0   :  { %v519_v33 = vunpack.c.l.s8.bf16 %v383_v29  ;;  %v516_v38 = vunpack.c.l.s8.bf16 %v380_v34  ;;  %v518_v39 = vunpack.c.l.s8.bf16 %v382_v35  ;;  %v521_v40 = vunpack.c.h.s8.bf16 %v381_v28  ;;  %v391_v58 = vld [vmem:[#allocation3 + $0x98] sm:$0xff]  ;;  %v388_v59 = vld [vmem:[#allocation3 + $0x80] sm:$0xff]  ;;  %v390_v60 = vld [vmem:[#allocation3 + $0x90] sm:$0xff] }
 0x1b1   :  { %v6425_v36 = vsub.s32 %v761_v26, %v6422_v27  ;;  %v6428_v37 = vld [vmem:[%s6742_s5] sm:$0xff]  ;;  %v523_v41 = vunpack.c.h.s8.bf16 %v383_v29  ;;  %v520_v46 = vunpack.c.h.s8.bf16 %v380_v34  ;;  %v522_v47 = vunpack.c.h.s8.bf16 %v382_v35  ;;  %v393_v5 = vld [vmem:[#allocation3 + $0xa8] sm:$0xff]  ;;  %v394_v8 = vld [vmem:[#allocation3 + $0xb0] sm:$0xff] }
 0x1b2   :  { %818 = vmatpush1.bf16.msra.mxu0 %v504_v13  ;;  %982 = vmatpush1.bf16.msra.mxu1 %v506_v14  ;;  %v525_v48 = vunpack.c.l.s8.bf16 %v385_v43  ;;  %v527_v49 = vunpack.c.l.s8.bf16 %v387_v44  ;;  %v524_v53 = vunpack.c.l.s8.bf16 %v384_v50  ;;  %v526_v54 = vunpack.c.l.s8.bf16 %v386_v51  ;;  %v395_v6 = vld [vmem:[#allocation3 + $0xb8] sm:$0xff]  ;;  %v392_v7 = vld [vmem:[#allocation3 + $0xa0] sm:$0xff]  ;;  %v397_v17 = vld [vmem:[#allocation3 + $0xc8] sm:$0xff] }
 0x1b3   :  { %819 = vmatprep.subr.bf16.mxu0 %v509_v15  ;;  %983 = vmatprep.subr.bf16.mxu1 %v511_v16  ;;  %v6432_v42 = vrot.slane %v6428_v37, %v6425_v36  ;;  %v529_v55 = vunpack.c.h.s8.bf16 %v385_v43  ;;  %v531_v56 = vunpack.c.h.s8.bf16 %v387_v44  ;;  %v528_v61 = vunpack.c.h.s8.bf16 %v384_v50  ;;  %v399_v18 = vld [vmem:[#allocation3 + $0xd8] sm:$0xff]  ;;  %v396_v19 = vld [vmem:[#allocation3 + $0xc0] sm:$0xff]  ;;  %v398_v20 = vld [vmem:[#allocation3 + $0xd0] sm:$0xff] }
 0x1b4   :  { %v530_v62 = vunpack.c.h.s8.bf16 %v386_v51  ;;  %v533_v63 = vunpack.c.l.s8.bf16 %v389_v57  ;;  %v535_v0 = vunpack.c.l.s8.bf16 %v391_v58  ;;  %v532_v1 = vunpack.c.l.s8.bf16 %v388_v59 }
 0x1b5   :  { %v773_v45 = vcombine.high %v6432_v42, %v6432_v42  ;;  %v534_v2 = vunpack.c.l.s8.bf16 %v390_v60  ;;  %v537_v3 = vunpack.c.h.s8.bf16 %v389_v57  ;;  %v539_v4 = vunpack.c.h.s8.bf16 %v391_v58 }
 0x1b6   :  { %820 = vmatpush1.bf16.msra.mxu0 %v508_v22  ;;  %984 = vmatpush1.bf16.msra.mxu1 %v510_v23  ;;  %v536_v9 = vunpack.c.h.s8.bf16 %v388_v59  ;;  %v538_v10 = vunpack.c.h.s8.bf16 %v390_v60  ;;  %v541_v11 = vunpack.c.l.s8.bf16 %v393_v5  ;;  %v543_v12 = vunpack.c.l.s8.bf16 %v395_v6  ;;  %v409_v59 = vld [vmem:[#allocation3 + $0x128] sm:$0xff]  ;;  %v411_v60 = vld [vmem:[#allocation3 + $0x138] sm:$0xff] }
 0x1b7   :  { %821 = vmatprep.subr.bf16.mxu0 %v513_v24  ;;  %985 = vmatprep.subr.bf16.mxu1 %v515_v25  ;;  %v6437_v52 = vrot.slane %v773_v45, %v6425_v36  ;;  %v540_v13 = vunpack.c.l.s8.bf16 %v392_v7  ;;  %v542_v14 = vunpack.c.l.s8.bf16 %v394_v8  ;;  %v545_v15 = vunpack.c.h.s8.bf16 %v393_v5  ;;  %v405_v45 = vld [vmem:[#allocation3 + $0x108] sm:$0xff] }
 0x1b8   :  { %v547_v16 = vunpack.c.h.s8.bf16 %v395_v6  ;;  %v544_v21 = vunpack.c.h.s8.bf16 %v392_v7  ;;  %v546_v22 = vunpack.c.h.s8.bf16 %v394_v8  ;;  %v549_v23 = vunpack.c.l.s8.bf16 %v397_v17  ;;  %v413_v6 = vld [vmem:[#allocation3 + $0x148] sm:$0xff]  ;;  %v415_v7 = vld [vmem:[#allocation3 + $0x158] sm:$0xff]  ;;  %v412_v8 = vld [vmem:[#allocation3 + $0x140] sm:$0xff] }
 0x1b9   :  { %847 = vmatprep.mubr.bf16.mxu0 %v6437_v52  ;;  %1011 = vmatprep.mubr.bf16.mxu1 %v6437_v52  ;;  %v551_v24 = vunpack.c.l.s8.bf16 %v399_v18  ;;  %v548_v25 = vunpack.c.l.s8.bf16 %v396_v19  ;;  %v550_v26 = vunpack.c.l.s8.bf16 %v398_v20  ;;  %v553_v28 = vunpack.c.h.s8.bf16 %v397_v17 }
 0x1ba   :  { %822 = vmatpush1.bf16.msra.mxu0 %v512_v30  ;;  %986 = vmatpush1.bf16.msra.mxu1 %v514_v31  ;;  %v555_v29 = vunpack.c.h.s8.bf16 %v399_v18  ;;  %v401_v30 = vld [vmem:[#allocation3 + $0xe8] sm:$0xff]  ;;  %v403_v31 = vld [vmem:[#allocation3 + $0xf8] sm:$0xff]  ;;  %v552_v34 = vunpack.c.h.s8.bf16 %v396_v19  ;;  %v554_v35 = vunpack.c.h.s8.bf16 %v398_v20  ;;  %v565_v51 = vunpack.c.l.s8.bf16 %v405_v45  ;;  %v416_v20 = vld [vmem:[#allocation3 + $0x160] sm:$0xff] }
 0x1bb   :  { %823 = vmatprep.subr.bf16.mxu0 %v517_v32  ;;  %987 = vmatprep.subr.bf16.mxu1 %v519_v33  ;;  %v400_v32 = vld [vmem:[#allocation3 + $0xe0] sm:$0xff]  ;;  %v402_v33 = vld [vmem:[#allocation3 + $0xf0] sm:$0xff]  ;;  %v561_v43 = vunpack.c.h.s8.bf16 %v401_v30  ;;  %v563_v44 = vunpack.c.h.s8.bf16 %v403_v31  ;;  %v569_v57 = vunpack.c.h.s8.bf16 %v405_v45  ;;  %v579_v5 = vunpack.c.h.s8.bf16 %v411_v60  ;;  %v417_v18 = vld [vmem:[#allocation3 + $0x168] sm:$0xff] }
 0x1bc   :  { %v562_v50 = vunpack.c.h.s8.bf16 %v402_v33  ;;  %v587_v17 = vunpack.c.h.s8.bf16 %v415_v7  ;;  %v419_v19 = vld [vmem:[#allocation3 + $0x178] sm:$0xff]  ;;  %vm2772_vm0 = vcmask 1046528   ;;  %vm2768_vm1 = vcmask 375808  }
 0x1bd   :  { %vm6136_vm2 = vmmov 0   ;;  %vm4641_vm3 = vcmask 517120   ;;  %vm4658_vm4 = vcmask 1024  }
 0x1be   :  { %824 = vmatpush1.bf16.msra.mxu0 %v516_v38  ;;  %988 = vmatpush1.bf16.msra.mxu1 %v518_v39  ;;  %v557_v38 = vunpack.c.l.s8.bf16 %v401_v30  ;;  %v559_v39 = vunpack.c.l.s8.bf16 %v403_v31  ;;  %v595_v30 = vunpack.c.h.s8.bf16 %v419_v19  ;;  %v421_v31 = vld [vmem:[#allocation3 + $0x188] sm:$0xff] }
 0x1bf   :  { %825 = vmatprep.subr.bf16.mxu0 %v521_v40  ;;  %989 = vmatprep.subr.bf16.mxu1 %v523_v41  ;;  %v556_v40 = vunpack.c.l.s8.bf16 %v400_v32  ;;  %v558_v41 = vunpack.c.l.s8.bf16 %v402_v33  ;;  %v420_v33 = vld [vmem:[#allocation3 + $0x180] sm:$0xff] }
 0x1c2   :  { %826 = vmatpush1.bf16.msra.mxu0 %v520_v46  ;;  %990 = vmatpush1.bf16.msra.mxu1 %v522_v47  ;;  %v407_v46 = vld [vmem:[#allocation3 + $0x118] sm:$0xff]  ;;  %v404_v47 = vld [vmem:[#allocation3 + $0x100] sm:$0xff] }
 0x1c3   :  { %827 = vmatprep.subr.bf16.mxu0 %v525_v48  ;;  %991 = vmatprep.subr.bf16.mxu1 %v527_v49  ;;  %v406_v48 = vld [vmem:[#allocation3 + $0x110] sm:$0xff]  ;;  %v560_v49 = vunpack.c.h.s8.bf16 %v400_v32  ;;  %v571_v58 = vunpack.c.h.s8.bf16 %v407_v46  ;;  %v423_v32 = vld [vmem:[#allocation3 + $0x198] sm:$0xff] }
 0x1c4   :  { %v603_v45 = vunpack.c.h.s8.bf16 %v423_v32 }
 0x1c6   :  { %828 = vmatpush1.bf16.msra.mxu0 %v524_v53  ;;  %992 = vmatpush1.bf16.msra.mxu1 %v526_v54  ;;  %v567_v53 = vunpack.c.l.s8.bf16 %v407_v46  ;;  %v6443_v54 = vrot.slane %v6432_v42, %v6425_v36  ;;  %v410_v42 = vld [vmem:[#allocation3 + $0x130] sm:$0xff]  ;;  %v425_v46 = vld [vmem:[#allocation3 + $0x1a8] sm:$0xff] }
 0x1c7   :  { %829 = vmatprep.subr.bf16.mxu0 %v529_v55  ;;  %993 = vmatprep.subr.bf16.mxu1 %v531_v56  ;;  %v564_v55 = vunpack.c.l.s8.bf16 %v404_v47  ;;  %v566_v56 = vunpack.c.l.s8.bf16 %v406_v48 }
 0x1ca   :  { %830 = vmatpush1.bf16.msra.mxu0 %v528_v61  ;;  %994 = vmatpush1.bf16.msra.mxu1 %v530_v62  ;;  %v805_v61 = vcombine.high %v6437_v52, %v6437_v52  ;;  %v408_v62 = vld [vmem:[#allocation3 + $0x120] sm:$0xff]  ;;  %v574_v52 = vunpack.c.l.s8.bf16 %v410_v42 }
 0x1cb   :  { %831 = vmatprep.subr.bf16.mxu0 %v533_v63  ;;  %995 = vmatprep.subr.bf16.mxu1 %v535_v0  ;;  %v568_v63 = vunpack.c.h.s8.bf16 %v404_v47  ;;  %v570_v0 = vunpack.c.h.s8.bf16 %v406_v48  ;;  %v427_v47 = vld [vmem:[#allocation3 + $0x1b8] sm:$0xff]  ;;  %v424_v48 = vld [vmem:[#allocation3 + $0x1a0] sm:$0xff] }
 0x1ce   :  { %832 = vmatpush1.bf16.msra.mxu0 %v532_v1  ;;  %996 = vmatpush1.bf16.msra.mxu1 %v534_v2  ;;  %v573_v1 = vunpack.c.l.s8.bf16 %v409_v59  ;;  %v575_v2 = vunpack.c.l.s8.bf16 %v411_v60  ;;  %v429_v60 = vld [vmem:[#allocation3 + $0x1c8] sm:$0xff] }
 0x1cf   :  { %833 = vmatprep.subr.bf16.mxu0 %v537_v3  ;;  %997 = vmatprep.subr.bf16.mxu1 %v539_v4  ;;  %v572_v3 = vunpack.c.l.s8.bf16 %v408_v62  ;;  %v577_v4 = vunpack.c.h.s8.bf16 %v409_v59  ;;  %v611_v59 = vunpack.c.h.s8.bf16 %v427_v47 }
 0x1d2   :  { %834 = vmatpush1.bf16.msra.mxu0 %v536_v9  ;;  %998 = vmatpush1.bf16.msra.mxu1 %v538_v10  ;;  %v414_v9 = vld [vmem:[#allocation3 + $0x150] sm:$0xff]  ;;  %v576_v10 = vunpack.c.h.s8.bf16 %v408_v62  ;;  %v428_v62 = vld [vmem:[#allocation3 + $0x1c0] sm:$0xff] }
 0x1d3   :  { %835 = vmatprep.subr.bf16.mxu0 %v541_v11  ;;  %999 = vmatprep.subr.bf16.mxu1 %v543_v12  ;;  %v578_v11 = vunpack.c.h.s8.bf16 %v410_v42  ;;  %v581_v12 = vunpack.c.l.s8.bf16 %v413_v6  ;;  %v430_v42 = vld [vmem:[#allocation3 + $0x1d0] sm:$0xff] }
 0x1d6   :  { %836 = vmatpush1.bf16.msra.mxu0 %v540_v13  ;;  %1000 = vmatpush1.bf16.msra.mxu1 %v542_v14  ;;  %v583_v13 = vunpack.c.l.s8.bf16 %v415_v7  ;;  %v580_v14 = vunpack.c.l.s8.bf16 %v412_v8  ;;  %v435_v7 = vld [vmem:[#allocation3 + $0x1f8] sm:$0xff] }
 0x1d7   :  { %837 = vmatprep.subr.bf16.mxu0 %v545_v15  ;;  %1001 = vmatprep.subr.bf16.mxu1 %v547_v16  ;;  %v582_v15 = vunpack.c.l.s8.bf16 %v414_v9  ;;  %v585_v16 = vunpack.c.h.s8.bf16 %v413_v6  ;;  %v433_v6 = vld [vmem:[#allocation3 + $0x1e8] sm:$0xff] }
 0x1da   :  { %838 = vmatpush1.bf16.msra.mxu0 %v544_v21  ;;  %1002 = vmatpush1.bf16.msra.mxu1 %v546_v22  ;;  %v418_v21 = vld [vmem:[#allocation3 + $0x170] sm:$0xff]  ;;  %v584_v22 = vunpack.c.h.s8.bf16 %v412_v8  ;;  %v432_v8 = vld [vmem:[#allocation3 + $0x1e0] sm:$0xff] }
 0x1db   :  { %839 = vmatprep.subr.bf16.mxu0 %v549_v23  ;;  %1003 = vmatprep.subr.bf16.mxu1 %v551_v24  ;;  %v586_v23 = vunpack.c.h.s8.bf16 %v414_v9  ;;  %v589_v24 = vunpack.c.l.s8.bf16 %v417_v18  ;;  %v434_v9 = vld [vmem:[#allocation3 + $0x1f0] sm:$0xff] }
 0x1de   :  { %840 = vmatpush1.bf16.msra.mxu0 %v548_v25  ;;  %1004 = vmatpush1.bf16.msra.mxu1 %v550_v26  ;;  %v591_v25 = vunpack.c.l.s8.bf16 %v419_v19  ;;  %v588_v26 = vunpack.c.l.s8.bf16 %v416_v20  ;;  %v437_v19 = vld [vmem:[#allocation3 + $0x208] sm:$0xff] }
 0x1df   :  { %841 = vmatprep.subr.bf16.mxu0 %v553_v28  ;;  %1005 = vmatprep.subr.bf16.mxu1 %v555_v29  ;;  %v590_v28 = vunpack.c.l.s8.bf16 %v418_v21  ;;  %v593_v29 = vunpack.c.h.s8.bf16 %v417_v18  ;;  %v627_v18 = vunpack.c.h.s8.bf16 %v435_v7 }
 0x1e2   :  { %842 = vmatpush1.bf16.msra.mxu0 %v552_v34  ;;  %1006 = vmatpush1.bf16.msra.mxu1 %v554_v35  ;;  %v422_v34 = vld [vmem:[#allocation3 + $0x190] sm:$0xff]  ;;  %v592_v35 = vunpack.c.h.s8.bf16 %v416_v20  ;;  %v439_v20 = vld [vmem:[#allocation3 + $0x218] sm:$0xff] }
 0x1e3   :  { %843 = vmatprep.subr.bf16.mxu0 %v557_v38  ;;  %1007 = vmatprep.subr.bf16.mxu1 %v559_v39  ;;  %v594_v38 = vunpack.c.h.s8.bf16 %v418_v21  ;;  %v597_v39 = vunpack.c.l.s8.bf16 %v421_v31 }
 0x1e6   :  { %844 = vmatpush1.bf16.msra.mxu0 %v556_v40  ;;  %1008 = vmatpush1.bf16.msra.mxu1 %v558_v41  ;;  %v599_v40 = vunpack.c.l.s8.bf16 %v423_v32  ;;  %v596_v41 = vunpack.c.l.s8.bf16 %v420_v33  ;;  %v441_v32 = vld [vmem:[#allocation3 + $0x228] sm:$0xff] }
 0x1e7   :  { %845 = vmatprep.subr.bf16.mxu0 %v561_v43  ;;  %1009 = vmatprep.subr.bf16.mxu1 %v563_v44  ;;  %v598_v43 = vunpack.c.l.s8.bf16 %v422_v34  ;;  %v601_v44 = vunpack.c.h.s8.bf16 %v421_v31 }
 0x1ea   :  { %846 = vmatpush1.bf16.msra.mxu0 %v560_v49  ;;  %1010 = vmatpush1.bf16.msra.mxu1 %v562_v50  ;;  %v426_v49 = vld [vmem:[#allocation3 + $0x1b0] sm:$0xff]  ;;  %v600_v50 = vunpack.c.h.s8.bf16 %v420_v33  ;;  %v633_v33 = vunpack.c.h.s8.bf16 %v437_v19 }
 0x1eb   :  { %856 = vmatprep.subr.bf16.mxu0 %v565_v51  ;;  %1020 = vmatprep.subr.bf16.mxu1 %v567_v53  ;;  %v602_v51 = vunpack.c.h.s8.bf16 %v422_v34  ;;  %v605_v53 = vunpack.c.l.s8.bf16 %v425_v46  ;;  %v635_v34 = vunpack.c.h.s8.bf16 %v439_v20 }
 0x1ed   :  { %848 = vmatmul.mubr.bf16.vlgmr.msra.gmra.mrb[0].mxu0 %v6443_v54  ;;  %1012 = vmatmul.mubr.bf16.vlgmr.msra.gmra.mrb[0].mxu1 %v6443_v54 }
 0x1ee   :  { %857 = vmatpush1.bf16.msra.mxu0 %v564_v55  ;;  %1021 = vmatpush1.bf16.msra.mxu1 %v566_v56  ;;  %v607_v55 = vunpack.c.l.s8.bf16 %v427_v47  ;;  %v604_v56 = vunpack.c.l.s8.bf16 %v424_v48  ;;  %v445_v47 = vld [vmem:[#allocation3 + $0x248] sm:$0xff] }
 0x1ef   :  { %858 = vmatprep.subr.bf16.mxu0 %v569_v57  ;;  %1022 = vmatprep.subr.bf16.mxu1 %v571_v58  ;;  %v606_v57 = vunpack.c.l.s8.bf16 %v426_v49  ;;  %v609_v58 = vunpack.c.h.s8.bf16 %v425_v46 }
 0x1f0   :  { %888 = vmatprep.mubr.bf16.mxu0 %v805_v61  ;;  %1052 = vmatprep.mubr.bf16.mxu1 %v805_v61  ;;  %v431_v61 = vld [vmem:[#allocation3 + $0x1d8] sm:$0xff] }
 0x1f2   :  { %859 = vmatpush1.bf16.msra.mxu0 %v568_v63  ;;  %1023 = vmatpush1.bf16.msra.mxu1 %v570_v0  ;;  %v608_v63 = vunpack.c.h.s8.bf16 %v424_v48  ;;  %v610_v0 = vunpack.c.h.s8.bf16 %v426_v49  ;;  %v641_v48 = vunpack.c.h.s8.bf16 %v441_v32 }
 0x1f3   :  { %860 = vmatprep.subr.bf16.mxu0 %v573_v1  ;;  %1024 = vmatprep.subr.bf16.mxu1 %v575_v2  ;;  %v613_v1 = vunpack.c.l.s8.bf16 %v429_v60  ;;  %v615_v2 = vunpack.c.l.s8.bf16 %v431_v61 }
 0x1f6   :  { %861 = vmatpush1.bf16.msra.mxu0 %v572_v3  ;;  %1025 = vmatpush1.bf16.msra.mxu1 %v574_v52  ;;  %v612_v3 = vunpack.c.l.s8.bf16 %v428_v62  ;;  %v614_v52 = vunpack.c.l.s8.bf16 %v430_v42 }
 0x1f7   :  { %862 = vmatprep.subr.bf16.mxu0 %v577_v4  ;;  %1026 = vmatprep.subr.bf16.mxu1 %v579_v5  ;;  %v617_v4 = vunpack.c.h.s8.bf16 %v429_v60  ;;  %v619_v5 = vunpack.c.h.s8.bf16 %v431_v61  ;;  %v449_v61 = vld [vmem:[#allocation3 + $0x268] sm:$0xff] }
 0x1fa   :  { %863 = vmatpush1.bf16.msra.mxu0 %v576_v10  ;;  %1027 = vmatpush1.bf16.msra.mxu1 %v578_v11  ;;  %v616_v10 = vunpack.c.h.s8.bf16 %v428_v62  ;;  %v618_v11 = vunpack.c.h.s8.bf16 %v430_v42  ;;  %v649_v62 = vunpack.c.h.s8.bf16 %v445_v47 }
 0x1fb   :  { %864 = vmatprep.subr.bf16.mxu0 %v581_v12  ;;  %1028 = vmatprep.subr.bf16.mxu1 %v583_v13  ;;  %v621_v12 = vunpack.c.l.s8.bf16 %v433_v6  ;;  %v623_v13 = vunpack.c.l.s8.bf16 %v435_v7  ;;  %v453_v7 = vld [vmem:[#allocation3 + $0x288] sm:$0xff] }
 0x1fe   :  { %865 = vmatpush1.bf16.msra.mxu0 %v580_v14  ;;  %1029 = vmatpush1.bf16.msra.mxu1 %v582_v15  ;;  %v758_v14 = vcombine.high %v6428_v37, %v6428_v37  ;;  %v620_v15 = vunpack.c.l.s8.bf16 %v432_v8  ;;  %v629_v37 = vunpack.c.l.s8.bf16 %v437_v19  ;;  %v457_v19 = vld [vmem:[#allocation3 + $0x2a8] sm:$0xff] }
 0x1ff   :  { %866 = vmatprep.subr.bf16.mxu0 %v585_v16  ;;  %1030 = vmatprep.subr.bf16.mxu1 %v587_v17  ;;  %v622_v16 = vunpack.c.l.s8.bf16 %v434_v9  ;;  %v625_v17 = vunpack.c.h.s8.bf16 %v433_v6 }
 0x200   :  { %v6452_v21 = vrot.slane %v758_v14, %v6425_v36 }
 0x202   :  { %867 = vmatpush1.bf16.msra.mxu0 %v584_v22  ;;  %1031 = vmatpush1.bf16.msra.mxu1 %v586_v23  ;;  %v436_v22 = vld [vmem:[#allocation3 + $0x200] sm:$0xff]  ;;  %v438_v23 = vld [vmem:[#allocation3 + $0x210] sm:$0xff] }
 0x203   :  { %868 = vmatprep.subr.bf16.mxu0 %v589_v24  ;;  %1032 = vmatprep.subr.bf16.mxu1 %v591_v25  ;;  %v624_v24 = vunpack.c.h.s8.bf16 %v432_v8  ;;  %v626_v25 = vunpack.c.h.s8.bf16 %v434_v9  ;;  %v630_v31 = vunpack.c.l.s8.bf16 %v438_v23  ;;  %v657_v8 = vunpack.c.h.s8.bf16 %v449_v61 }
 0x206   :  { %869 = vmatpush1.bf16.msra.mxu0 %v588_v26  ;;  %1033 = vmatpush1.bf16.msra.mxu1 %v590_v28  ;;  %v631_v26 = vunpack.c.l.s8.bf16 %v439_v20  ;;  %v774_v28 = vcombine.high %v6452_v21, %v6452_v21  ;;  %v665_v20 = vunpack.c.h.s8.bf16 %v453_v7 }
 0x207   :  { %870 = vmatprep.subr.bf16.mxu0 %v593_v29  ;;  %1034 = vmatprep.subr.bf16.mxu1 %v595_v30  ;;  %v803_v29 = vcombine.high %v6443_v54, %v6443_v54  ;;  %v628_v30 = vunpack.c.l.s8.bf16 %v436_v22  ;;  %v632_v54 = vunpack.c.h.s8.bf16 %v436_v22 }
 0x20a   :  { %871 = vmatpush1.bf16.msra.mxu0 %v592_v35  ;;  %1035 = vmatpush1.bf16.msra.mxu1 %v594_v38  ;;  %v443_v35 = vld [vmem:[#allocation3 + $0x238] sm:$0xff]  ;;  %v6459_v38 = vrot.slane %v774_v28, %v6425_v36  ;;  %v669_v28 = vunpack.c.l.s8.bf16 %v457_v19 }
 0x20b   :  { %872 = vmatprep.subr.bf16.mxu0 %v597_v39  ;;  %1036 = vmatprep.subr.bf16.mxu1 %v599_v40  ;;  %v440_v39 = vld [vmem:[#allocation3 + $0x220] sm:$0xff]  ;;  %v442_v40 = vld [vmem:[#allocation3 + $0x230] sm:$0xff]  ;;  %v643_v49 = vunpack.c.h.s8.bf16 %v443_v35 }
 0x20c   :  { %v638_v46 = vunpack.c.l.s8.bf16 %v442_v40 }
 0x20e   :  { %873 = vmatpush1.bf16.msra.mxu0 %v596_v41  ;;  %1037 = vmatpush1.bf16.msra.mxu1 %v598_v43  ;;  %v634_v41 = vunpack.c.h.s8.bf16 %v438_v23  ;;  %v637_v43 = vunpack.c.l.s8.bf16 %v441_v32  ;;  %v459_v23 = vld [vmem:[#allocation3 + $0x2b8] sm:$0xff]  ;;  %v461_v32 = vld [vmem:[#allocation3 + $0x2c8] sm:$0xff] }
 0x20f   :  { %874 = vmatprep.subr.bf16.mxu0 %v601_v44  ;;  %1038 = vmatprep.subr.bf16.mxu1 %v603_v45  ;;  %v639_v44 = vunpack.c.l.s8.bf16 %v443_v35  ;;  %v636_v45 = vunpack.c.l.s8.bf16 %v440_v39  ;;  %v463_v35 = vld [vmem:[#allocation3 + $0x2d8] sm:$0xff] }
 0x212   :  { %875 = vmatpush1.bf16.msra.mxu0 %v600_v50  ;;  %1039 = vmatpush1.bf16.msra.mxu1 %v602_v51  ;;  %v447_v50 = vld [vmem:[#allocation3 + $0x258] sm:$0xff]  ;;  %v444_v51 = vld [vmem:[#allocation3 + $0x240] sm:$0xff] }
 0x213   :  { %876 = vmatprep.subr.bf16.mxu0 %v605_v53  ;;  %1040 = vmatprep.subr.bf16.mxu1 %v607_v55  ;;  %v446_v53 = vld [vmem:[#allocation3 + $0x250] sm:$0xff]  ;;  %v640_v55 = vunpack.c.h.s8.bf16 %v440_v39  ;;  %v651_v42 = vunpack.c.h.s8.bf16 %v447_v50 }
 0x214   :  { %v646_v60 = vunpack.c.l.s8.bf16 %v446_v53 }
 0x216   :  { %877 = vmatpush1.bf16.msra.mxu0 %v604_v56  ;;  %1041 = vmatpush1.bf16.msra.mxu1 %v606_v57  ;;  %v642_v56 = vunpack.c.h.s8.bf16 %v442_v40  ;;  %v645_v57 = vunpack.c.l.s8.bf16 %v445_v47  ;;  %v681_v47 = vunpack.c.h.s8.bf16 %v461_v32 }
 0x217   :  { %878 = vmatprep.subr.bf16.mxu0 %v609_v58  ;;  %1042 = vmatprep.subr.bf16.mxu1 %v611_v59  ;;  %v647_v58 = vunpack.c.l.s8.bf16 %v447_v50  ;;  %v644_v59 = vunpack.c.l.s8.bf16 %v444_v51  ;;  %v467_v50 = vld [vmem:[#allocation3 + $0x2f8] sm:$0xff] }
 0x21a   :  { %879 = vmatpush1.bf16.msra.mxu0 %v608_v63  ;;  %1043 = vmatpush1.bf16.msra.mxu1 %v610_v0  ;;  %v451_v63 = vld [vmem:[#allocation3 + $0x278] sm:$0xff]  ;;  %v448_v0 = vld [vmem:[#allocation3 + $0x260] sm:$0xff] }
 0x21b   :  { %880 = vmatprep.subr.bf16.mxu0 %v613_v1  ;;  %1044 = vmatprep.subr.bf16.mxu1 %v615_v2  ;;  %v450_v1 = vld [vmem:[#allocation3 + $0x270] sm:$0xff]  ;;  %v648_v2 = vunpack.c.h.s8.bf16 %v444_v51  ;;  %v659_v9 = vunpack.c.h.s8.bf16 %v451_v63 }
 0x21c   :  { %v654_v6 = vunpack.c.l.s8.bf16 %v450_v1  ;;  %v658_v14 = vunpack.c.h.s8.bf16 %v450_v1 }
 0x21e   :  { %881 = vmatpush1.bf16.msra.mxu0 %v612_v3  ;;  %1045 = vmatpush1.bf16.msra.mxu1 %v614_v52  ;;  %v650_v3 = vunpack.c.h.s8.bf16 %v446_v53  ;;  %v653_v52 = vunpack.c.l.s8.bf16 %v449_v61 }
 0x21f   :  { %882 = vmatprep.subr.bf16.mxu0 %v617_v4  ;;  %1046 = vmatprep.subr.bf16.mxu1 %v619_v5  ;;  %v655_v4 = vunpack.c.l.s8.bf16 %v451_v63  ;;  %v652_v5 = vunpack.c.l.s8.bf16 %v448_v0  ;;  %v471_v63 = vld [vmem:[#allocation3 + $0x318] sm:$0xff] }
 0x222   :  { %883 = vmatpush1.bf16.msra.mxu0 %v616_v10  ;;  %1047 = vmatpush1.bf16.msra.mxu1 %v618_v11  ;;  %v455_v10 = vld [vmem:[#allocation3 + $0x298] sm:$0xff]  ;;  %v452_v11 = vld [vmem:[#allocation3 + $0x280] sm:$0xff] }
 0x223   :  { %884 = vmatprep.subr.bf16.mxu0 %v621_v12  ;;  %1048 = vmatprep.subr.bf16.mxu1 %v623_v13  ;;  %v454_v12 = vld [vmem:[#allocation3 + $0x290] sm:$0xff]  ;;  %v656_v13 = vunpack.c.h.s8.bf16 %v448_v0  ;;  %v667_v22 = vunpack.c.h.s8.bf16 %v455_v10 }
 0x226   :  { %885 = vmatpush1.bf16.msra.mxu0 %v620_v15  ;;  %1049 = vmatpush1.bf16.msra.mxu1 %v622_v16  ;;  %v661_v15 = vunpack.c.l.s8.bf16 %v453_v7  ;;  %v663_v16 = vunpack.c.l.s8.bf16 %v455_v10  ;;  %v473_v10 = vld [vmem:[#allocation3 + $0x328] sm:$0xff] }
 0x227   :  { %886 = vmatprep.subr.bf16.mxu0 %v625_v17  ;;  %1050 = vmatprep.subr.bf16.mxu1 %v627_v18  ;;  %v660_v17 = vunpack.c.l.s8.bf16 %v452_v11  ;;  %v662_v18 = vunpack.c.l.s8.bf16 %v454_v12 }
 0x22a   :  { %887 = vmatpush1.bf16.msra.mxu0 %v624_v24  ;;  %1051 = vmatpush1.bf16.msra.mxu1 %v626_v25  ;;  %v456_v24 = vld [vmem:[#allocation3 + $0x2a0] sm:$0xff]  ;;  %v458_v25 = vld [vmem:[#allocation3 + $0x2b0] sm:$0xff] }
 0x22b   :  { %897 = vmatprep.subr.bf16.mxu0 %v629_v37  ;;  %1061 = vmatprep.subr.bf16.mxu1 %v631_v26  ;;  %v664_v37 = vunpack.c.h.s8.bf16 %v452_v11  ;;  %v666_v26 = vunpack.c.h.s8.bf16 %v454_v12  ;;  %v672_v39 = vunpack.c.h.s8.bf16 %v456_v24  ;;  %v674_v40 = vunpack.c.h.s8.bf16 %v458_v25  ;;  %v475_v11 = vld [vmem:[#allocation3 + $0x338] sm:$0xff] }
 0x22c   :  { %v806_v12 = vcombine.high %v6459_v38, %v6459_v38 }
 0x22d   :  { %889 = vmatmul.mubr.bf16.vlgmr.msra.gmra.mrb[0].mxu0 %v803_v29  ;;  %1053 = vmatmul.mubr.bf16.vlgmr.msra.gmra.mrb[0].mxu1 %v803_v29  ;;  %v671_v29 = vunpack.c.l.s8.bf16 %v459_v23 }
 0x22e   :  { %898 = vmatpush1.bf16.msra.mxu0 %v628_v30  ;;  %1062 = vmatpush1.bf16.msra.mxu1 %v630_v31  ;;  %v668_v30 = vunpack.c.l.s8.bf16 %v456_v24  ;;  %v670_v31 = vunpack.c.l.s8.bf16 %v458_v25 }
 0x22f   :  { %899 = vmatprep.subr.bf16.mxu0 %v633_v33  ;;  %1063 = vmatprep.subr.bf16.mxu1 %v635_v34  ;;  %v673_v33 = vunpack.c.h.s8.bf16 %v457_v19  ;;  %v675_v34 = vunpack.c.h.s8.bf16 %v459_v23  ;;  %v705_v19 = vunpack.c.h.s8.bf16 %v473_v10  ;;  %v479_v23 = vld [vmem:[#allocation3 + $0x358] sm:$0xff] }
 0x230   :  { %929 = vmatprep.mubr.bf16.mxu0 %v6459_v38  ;;  %1093 = vmatprep.mubr.bf16.mxu1 %v6459_v38 }
 0x232   :  { %900 = vmatpush1.bf16.msra.mxu0 %v632_v54  ;;  %1064 = vmatpush1.bf16.msra.mxu1 %v634_v41  ;;  %v677_v54 = vunpack.c.l.s8.bf16 %v461_v32  ;;  %v679_v41 = vunpack.c.l.s8.bf16 %v463_v35 }
 0x233   :  { %901 = vmatprep.subr.bf16.mxu0 %v637_v43  ;;  %1065 = vmatprep.subr.bf16.mxu1 %v639_v44  ;;  %v460_v43 = vld [vmem:[#allocation3 + $0x2c0] sm:$0xff]  ;;  %v462_v44 = vld [vmem:[#allocation3 + $0x2d0] sm:$0xff] }
 0x234   :  { %v680_v51 = vunpack.c.h.s8.bf16 %v460_v43  ;;  %v682_v53 = vunpack.c.h.s8.bf16 %v462_v44 }
 0x236   :  { %902 = vmatpush1.bf16.msra.mxu0 %v636_v45  ;;  %1066 = vmatpush1.bf16.msra.mxu1 %v638_v46  ;;  %v676_v45 = vunpack.c.l.s8.bf16 %v460_v43  ;;  %v678_v46 = vunpack.c.l.s8.bf16 %v462_v44  ;;  %v480_v43 = vld [vmem:[#allocation3 + $0x360] sm:$0xff]  ;;  %v482_v44 = vld [vmem:[#allocation3 + $0x370] sm:$0xff] }
 0x237   :  { %903 = vmatprep.subr.bf16.mxu0 %v641_v48  ;;  %1067 = vmatprep.subr.bf16.mxu1 %v643_v49  ;;  %v683_v48 = vunpack.c.h.s8.bf16 %v463_v35  ;;  %v465_v49 = vld [vmem:[#allocation3 + $0x2e8] sm:$0xff]  ;;  %v483_v35 = vld [vmem:[#allocation3 + $0x378] sm:$0xff] }
 0x238   :  { %v689_v61 = vunpack.c.h.s8.bf16 %v465_v49 }
 0x23a   :  { %904 = vmatpush1.bf16.msra.mxu0 %v640_v55  ;;  %1068 = vmatpush1.bf16.msra.mxu1 %v642_v56  ;;  %v685_v55 = vunpack.c.l.s8.bf16 %v465_v49  ;;  %v687_v56 = vunpack.c.l.s8.bf16 %v467_v50  ;;  %v485_v49 = vld [vmem:[#allocation3 + $0x388] sm:$0xff] }
 0x23b   :  { %905 = vmatprep.subr.bf16.mxu0 %v645_v57  ;;  %1069 = vmatprep.subr.bf16.mxu1 %v647_v58  ;;  %v464_v57 = vld [vmem:[#allocation3 + $0x2e0] sm:$0xff]  ;;  %v466_v58 = vld [vmem:[#allocation3 + $0x2f0] sm:$0xff] }
 0x23c   :  { %v688_v0 = vunpack.c.h.s8.bf16 %v464_v57  ;;  %v690_v1 = vunpack.c.h.s8.bf16 %v466_v58 }
 0x23e   :  { %906 = vmatpush1.bf16.msra.mxu0 %v644_v59  ;;  %1070 = vmatpush1.bf16.msra.mxu1 %v646_v60  ;;  %v684_v59 = vunpack.c.l.s8.bf16 %v464_v57  ;;  %v686_v60 = vunpack.c.l.s8.bf16 %v466_v58  ;;  %v484_v57 = vld [vmem:[#allocation3 + $0x380] sm:$0xff]  ;;  %v486_v58 = vld [vmem:[#allocation3 + $0x390] sm:$0xff] }
 0x23f   :  { %907 = vmatprep.subr.bf16.mxu0 %v649_v62  ;;  %1071 = vmatprep.subr.bf16.mxu1 %v651_v42  ;;  %v691_v62 = vunpack.c.h.s8.bf16 %v467_v50  ;;  %v469_v42 = vld [vmem:[#allocation3 + $0x308] sm:$0xff]  ;;  %v487_v50 = vld [vmem:[#allocation3 + $0x398] sm:$0xff] }
 0x242   :  { %908 = vmatpush1.bf16.msra.mxu0 %v648_v2  ;;  %1072 = vmatpush1.bf16.msra.mxu1 %v650_v3  ;;  %v693_v2 = vunpack.c.l.s8.bf16 %v469_v42  ;;  %v695_v3 = vunpack.c.l.s8.bf16 %v471_v63 }
 0x243   :  { %909 = vmatprep.subr.bf16.mxu0 %v653_v52  ;;  %1073 = vmatprep.subr.bf16.mxu1 %v655_v4  ;;  %v468_v52 = vld [vmem:[#allocation3 + $0x300] sm:$0xff]  ;;  %v470_v4 = vld [vmem:[#allocation3 + $0x310] sm:$0xff] }
 0x244   :  { %v694_v7 = vunpack.c.l.s8.bf16 %v470_v4 }
 0x246   :  { %910 = vmatpush1.bf16.msra.mxu0 %v652_v5  ;;  %1074 = vmatpush1.bf16.msra.mxu1 %v654_v6  ;;  %v6465_v5 = vrot.slane %v6452_v21, %v6425_v36  ;;  %v692_v6 = vunpack.c.l.s8.bf16 %v468_v52  ;;  %v696_v21 = vunpack.c.h.s8.bf16 %v468_v52  ;;  %v488_v52 = vld [vmem:[#allocation3 + $0x3a0] sm:$0xff] }
 0x247   :  { %911 = vmatprep.subr.bf16.mxu0 %v657_v8  ;;  %1075 = vmatprep.subr.bf16.mxu1 %v659_v9  ;;  %v697_v8 = vunpack.c.h.s8.bf16 %v469_v42  ;;  %v699_v9 = vunpack.c.h.s8.bf16 %v471_v63  ;;  %v489_v42 = vld [vmem:[#allocation3 + $0x3a8] sm:$0xff]  ;;  %v491_v63 = vld [vmem:[#allocation3 + $0x3b8] sm:$0xff] }
 0x24a   :  { %912 = vmatpush1.bf16.msra.mxu0 %v656_v13  ;;  %1076 = vmatpush1.bf16.msra.mxu1 %v658_v14  ;;  %v698_v13 = vunpack.c.h.s8.bf16 %v470_v4  ;;  %v701_v14 = vunpack.c.l.s8.bf16 %v473_v10  ;;  %v490_v4 = vld [vmem:[#allocation3 + $0x3b0] sm:$0xff]  ;;  %v493_v10 = vld [vmem:[#allocation3 + $0x3c8] sm:$0xff] }
 0x24b   :  { %913 = vmatprep.subr.bf16.mxu0 %v661_v15  ;;  %1077 = vmatprep.subr.bf16.mxu1 %v663_v16  ;;  %v703_v15 = vunpack.c.l.s8.bf16 %v475_v11  ;;  %v472_v16 = vld [vmem:[#allocation3 + $0x320] sm:$0xff] }
 0x24c   :  { %v704_v24 = vunpack.c.h.s8.bf16 %v472_v16 }
 0x24e   :  { %914 = vmatpush1.bf16.msra.mxu0 %v660_v17  ;;  %1078 = vmatpush1.bf16.msra.mxu1 %v662_v18  ;;  %v474_v17 = vld [vmem:[#allocation3 + $0x330] sm:$0xff]  ;;  %v700_v18 = vunpack.c.l.s8.bf16 %v472_v16 }
 0x24f   :  { %915 = vmatprep.subr.bf16.mxu0 %v665_v20  ;;  %1079 = vmatprep.subr.bf16.mxu1 %v667_v22  ;;  %v702_v38 = vunpack.c.l.s8.bf16 %v474_v17  ;;  %v707_v20 = vunpack.c.h.s8.bf16 %v475_v11  ;;  %v477_v22 = vld [vmem:[#allocation3 + $0x348] sm:$0xff]  ;;  %v706_v25 = vunpack.c.h.s8.bf16 %v474_v17  ;;  %v495_v11 = vld [vmem:[#allocation3 + $0x3d8] sm:$0xff]  ;;  %v494_v16 = vld [vmem:[#allocation3 + $0x3d0] sm:$0xff] }
 0x250   :  { %v713_v32 = vunpack.c.h.s8.bf16 %v477_v22 }
 0x252   :  { %916 = vmatpush1.bf16.msra.mxu0 %v664_v37  ;;  %1080 = vmatpush1.bf16.msra.mxu1 %v666_v26  ;;  %v709_v37 = vunpack.c.l.s8.bf16 %v477_v22  ;;  %v711_v26 = vunpack.c.l.s8.bf16 %v479_v23  ;;  %v499_v22 = vld [vmem:[#allocation3 + $0x3f8] sm:$0xff] }
 0x253   :  { %917 = vmatprep.subr.bf16.mxu0 %v669_v28  ;;  %1081 = vmatprep.subr.bf16.mxu1 %v671_v29  ;;  %v476_v28 = vld [vmem:[#allocation3 + $0x340] sm:$0xff]  ;;  %v478_v29 = vld [vmem:[#allocation3 + $0x350] sm:$0xff] }
 0x256   :  { %918 = vmatpush1.bf16.msra.mxu0 %v668_v30  ;;  %1082 = vmatpush1.bf16.msra.mxu1 %v670_v31  ;;  %v708_v30 = vunpack.c.l.s8.bf16 %v476_v28  ;;  %v710_v31 = vunpack.c.l.s8.bf16 %v478_v29 }
 0x257   :  { %919 = vmatprep.subr.bf16.mxu0 %v673_v33  ;;  %1083 = vmatprep.subr.bf16.mxu1 %v675_v34  ;;  %v715_v33 = vunpack.c.h.s8.bf16 %v479_v23  ;;  %v481_v34 = vld [vmem:[#allocation3 + $0x368] sm:$0xff] }
 0x25a   :  { %920 = vmatpush1.bf16.msra.mxu0 %v672_v39  ;;  %1084 = vmatpush1.bf16.msra.mxu1 %v674_v40  ;;  %v712_v39 = vunpack.c.h.s8.bf16 %v476_v28  ;;  %v714_v40 = vunpack.c.h.s8.bf16 %v478_v29  ;;  %v498_v28 = vld [vmem:[#allocation3 + $0x3f0] sm:$0xff]  ;;  %v6472_v29 = vld [vmem:[%s6743_s1] sm:$0xff] }
 0x25b   :  { %921 = vmatprep.subr.bf16.mxu0 %v677_v54  ;;  %1085 = vmatprep.subr.bf16.mxu1 %v679_v41  ;;  %v717_v54 = vunpack.c.l.s8.bf16 %v481_v34  ;;  %v719_v41 = vunpack.c.l.s8.bf16 %v483_v35 }
 0x25e   :  { %922 = vmatpush1.bf16.msra.mxu0 %v676_v45  ;;  %1086 = vmatpush1.bf16.msra.mxu1 %v678_v46  ;;  %v716_v45 = vunpack.c.l.s8.bf16 %v480_v43  ;;  %v718_v46 = vunpack.c.l.s8.bf16 %v482_v44 }
 0x25f   :  { %923 = vmatprep.subr.bf16.mxu0 %v681_v47  ;;  %1087 = vmatprep.subr.bf16.mxu1 %v683_v48  ;;  %v721_v47 = vunpack.c.h.s8.bf16 %v481_v34  ;;  %v723_v48 = vunpack.c.h.s8.bf16 %v483_v35  ;;  %v755_v34 = vunpack.c.h.s8.bf16 %v499_v22  ;;  %v1547_v35 = vld [vmem:[#allocation11 + $0x8] sm:$0xff] }
 0x262   :  { %924 = vmatpush1.bf16.msra.mxu0 %v680_v51  ;;  %1088 = vmatpush1.bf16.msra.mxu1 %v682_v53  ;;  %v720_v51 = vunpack.c.h.s8.bf16 %v480_v43  ;;  %v722_v53 = vunpack.c.h.s8.bf16 %v482_v44  ;;  %v1546_v43 = vld [vmem:[#allocation11] sm:$0xff]  ;;  %v804_v44 = vcombine.high %v6465_v5, %v6465_v5 }
 0x263   :  { %925 = vmatprep.subr.bf16.mxu0 %v685_v55  ;;  %1089 = vmatprep.subr.bf16.mxu1 %v687_v56  ;;  %v725_v55 = vunpack.c.l.s8.bf16 %v485_v49  ;;  %v727_v56 = vunpack.c.l.s8.bf16 %v487_v50 }
 0x266   :  { %926 = vmatpush1.bf16.msra.mxu0 %v684_v59  ;;  %1090 = vmatpush1.bf16.msra.mxu1 %v686_v60  ;;  %v724_v59 = vunpack.c.l.s8.bf16 %v484_v57  ;;  %v726_v60 = vunpack.c.l.s8.bf16 %v486_v58 }
 0x267   :  { %927 = vmatprep.subr.bf16.mxu0 %v689_v61  ;;  %1091 = vmatprep.subr.bf16.mxu1 %v691_v62  ;;  %v729_v61 = vunpack.c.h.s8.bf16 %v485_v49  ;;  %v731_v62 = vunpack.c.h.s8.bf16 %v487_v50  ;;  %v1678_v49 = vunpack.c.h.s8.bf16 %v1546_v43 }
 0x26a   :  { %928 = vmatpush1.bf16.msra.mxu0 %v688_v0  ;;  %1092 = vmatpush1.bf16.msra.mxu1 %v690_v1  ;;  %v728_v0 = vunpack.c.h.s8.bf16 %v484_v57  ;;  %v730_v1 = vunpack.c.h.s8.bf16 %v486_v58  ;;  %v1554_v58 = vld [vmem:[#allocation11 + $0x40] sm:$0xff] }
 0x26b   :  { %938 = vmatprep.subr.bf16.mxu0 %v693_v2  ;;  %1102 = vmatprep.subr.bf16.mxu1 %v695_v3  ;;  %v733_v2 = vunpack.c.l.s8.bf16 %v489_v42  ;;  %v735_v3 = vunpack.c.l.s8.bf16 %v491_v63 }
 0x26d   :  { %930 = vmatmul.mubr.bf16.vlgmr.msra.gmra.mrb[0].mxu0 %v6465_v5  ;;  %1094 = vmatmul.mubr.bf16.vlgmr.msra.gmra.mrb[0].mxu1 %v6465_v5 }
 0x26e   :  { %939 = vmatpush1.bf16.msra.mxu0 %v692_v6  ;;  %1103 = vmatpush1.bf16.msra.mxu1 %v694_v7  ;;  %v732_v6 = vunpack.c.l.s8.bf16 %v488_v52  ;;  %v734_v7 = vunpack.c.l.s8.bf16 %v490_v4 }
 0x26f   :  { %940 = vmatprep.subr.bf16.mxu0 %v697_v8  ;;  %1104 = vmatprep.subr.bf16.mxu1 %v699_v9  ;;  %v737_v8 = vunpack.c.h.s8.bf16 %v489_v42  ;;  %v739_v9 = vunpack.c.h.s8.bf16 %v491_v63  ;;  %v1558_v63 = vld [vmem:[#allocation11 + $0x60] sm:$0xff] }
 0x270   :  { %970 = vmatprep.mubr.bf16.mxu0 %v806_v12  ;;  %1134 = vmatprep.mubr.bf16.mxu1 %v806_v12  ;;  %v736_v12 = vunpack.c.h.s8.bf16 %v488_v52 }
 0x272   :  { %941 = vmatpush1.bf16.msra.mxu0 %v696_v21  ;;  %1105 = vmatpush1.bf16.msra.mxu1 %v698_v13  ;;  %v738_v21 = vunpack.c.h.s8.bf16 %v490_v4  ;;  %v741_v13 = vunpack.c.l.s8.bf16 %v493_v10  ;;  %v1562_v4 = vld [vmem:[#allocation11 + $0x80] sm:$0xff] }
 0x273   :  { %942 = vmatprep.subr.bf16.mxu0 %v701_v14  ;;  %1106 = vmatprep.subr.bf16.mxu1 %v703_v15  ;;  %v743_v14 = vunpack.c.l.s8.bf16 %v495_v11  ;;  %v492_v15 = vld [vmem:[#allocation3 + $0x3c0] sm:$0xff] }
 0x274   :  { %v740_v17 = vunpack.c.l.s8.bf16 %v492_v15  ;;  %v744_v23 = vunpack.c.h.s8.bf16 %v492_v15 }
 0x276   :  { %943 = vmatpush1.bf16.msra.mxu0 %v700_v18  ;;  %1107 = vmatpush1.bf16.msra.mxu1 %v702_v38  ;;  %v742_v18 = vunpack.c.l.s8.bf16 %v494_v16  ;;  %v745_v38 = vunpack.c.h.s8.bf16 %v493_v10 }
 0x277   :  { %944 = vmatprep.subr.bf16.mxu0 %v705_v19  ;;  %1108 = vmatprep.subr.bf16.mxu1 %v707_v20  ;;  %v747_v19 = vunpack.c.h.s8.bf16 %v495_v11  ;;  %v497_v20 = vld [vmem:[#allocation3 + $0x3e8] sm:$0xff] }
 0x278   :  { %v1566_v11 = vld [vmem:[#allocation11 + $0xa0] sm:$0xff] }
 0x27a   :  { %945 = vmatpush1.bf16.msra.mxu0 %v704_v24  ;;  %1109 = vmatpush1.bf16.msra.mxu1 %v706_v25  ;;  %v746_v24 = vunpack.c.h.s8.bf16 %v494_v16  ;;  %v749_v25 = vunpack.c.l.s8.bf16 %v497_v20  ;;  %v1570_v16 = vld [vmem:[#allocation11 + $0xc0] sm:$0xff] }
 0x27b   :  { %946 = vmatprep.subr.bf16.mxu0 %v709_v37  ;;  %1110 = vmatprep.subr.bf16.mxu1 %v711_v26  ;;  %v751_v37 = vunpack.c.l.s8.bf16 %v499_v22  ;;  %v496_v26 = vld [vmem:[#allocation3 + $0x3e0] sm:$0xff]  ;;  %v1574_v22 = vld [vmem:[#allocation11 + $0xe0] sm:$0xff] }
 0x27e   :  { %947 = vmatpush1.bf16.msra.mxu0 %v708_v30  ;;  %1111 = vmatpush1.bf16.msra.mxu1 %v710_v31  ;;  %v748_v30 = vunpack.c.l.s8.bf16 %v496_v26  ;;  %v750_v31 = vunpack.c.l.s8.bf16 %v498_v28 }
 0x27f   :  { %948 = vmatprep.subr.bf16.mxu0 %v713_v32  ;;  %1112 = vmatprep.subr.bf16.mxu1 %v715_v33  ;;  %v6476_v32 = vrot.slane %v6472_v29, %v6425_v36  ;;  %v753_v33 = vunpack.c.h.s8.bf16 %v497_v20 }
 0x282   :  { %949 = vmatpush1.bf16.msra.mxu0 %v712_v39  ;;  %1113 = vmatpush1.bf16.msra.mxu1 %v714_v40  ;;  %v752_v39 = vunpack.c.h.s8.bf16 %v496_v26  ;;  %v754_v40 = vunpack.c.h.s8.bf16 %v498_v28  ;;  %v1578_v28 = vld [vmem:[#allocation11 + $0x100] sm:$0xff] }
 0x283   :  { %950 = vmatprep.subr.bf16.mxu0 %v717_v54  ;;  %1114 = vmatprep.subr.bf16.mxu1 %v719_v41  ;;  %v1947_v54 = vcombine.high %v6476_v32, %v6476_v32  ;;  %v1675_v41 = vunpack.c.l.s8.bf16 %v1547_v35 }
 0x286   :  { %951 = vmatpush1.bf16.msra.mxu0 %v716_v45  ;;  %1115 = vmatpush1.bf16.msra.mxu1 %v718_v46  ;;  %v1674_v45 = vunpack.c.l.s8.bf16 %v1546_v43  ;;  %v6483_v46 = vrot.slane %v1947_v54, %v6425_v36  ;;  %v1583_v54 = vld [vmem:[#allocation11 + $0x128] sm:$0xff] }
 0x287   :  { %952 = vmatprep.subr.bf16.mxu0 %v721_v47  ;;  %1116 = vmatprep.subr.bf16.mxu1 %v723_v48  ;;  %v1679_v47 = vunpack.c.h.s8.bf16 %v1547_v35  ;;  %v1551_v48 = vld [vmem:[#allocation11 + $0x28] sm:$0xff]  ;;  %v1747_v43 = vunpack.c.l.s8.bf16 %v1583_v54 }
 0x288   :  { %v1683_v50 = vunpack.c.l.s8.bf16 %v1551_v48  ;;  %v6492_v35 = vcombine.high %v6483_v46, %v6483_v46 }
 0x28a   :  { %953 = vmatpush1.bf16.msra.mxu0 %v720_v51  ;;  %1117 = vmatpush1.bf16.msra.mxu1 %v722_v53  ;;  %v1550_v51 = vld [vmem:[#allocation11 + $0x20] sm:$0xff]  ;;  %v1687_v53 = vunpack.c.h.s8.bf16 %v1551_v48 }
 0x28b   :  { %954 = vmatprep.subr.bf16.mxu0 %v725_v55  ;;  %1118 = vmatprep.subr.bf16.mxu1 %v727_v56  ;;  %v1682_v5 = vunpack.c.l.s8.bf16 %v1550_v51  ;;  %v1555_v55 = vld [vmem:[#allocation11 + $0x48] sm:$0xff]  ;;  %v1686_v56 = vunpack.c.h.s8.bf16 %v1550_v51 }
 0x28c   :  { %v1691_v57 = vunpack.c.l.s8.bf16 %v1555_v55  ;;  %v1587_v51 = vld [vmem:[#allocation11 + $0x148] sm:$0xff] }
 0x28e   :  { %955 = vmatpush1.bf16.msra.mxu0 %v724_v59  ;;  %1119 = vmatpush1.bf16.msra.mxu1 %v726_v60  ;;  %v1690_v59 = vunpack.c.l.s8.bf16 %v1554_v58  ;;  %v1695_v60 = vunpack.c.h.s8.bf16 %v1555_v55  ;;  %v1755_v55 = vunpack.c.l.s8.bf16 %v1587_v51 }
 0x28f   :  { %956 = vmatprep.subr.bf16.mxu0 %v729_v61  ;;  %1120 = vmatprep.subr.bf16.mxu1 %v731_v62  ;;  %v1559_v61 = vld [vmem:[#allocation11 + $0x68] sm:$0xff]  ;;  %v1694_v62 = vunpack.c.h.s8.bf16 %v1554_v58  ;;  %v5268_v58 = vld [vmem:[#allocation8 + $0x20] sm:$0xff]  }
 0x290   :  { %v1699_v42 = vunpack.c.l.s8.bf16 %v1559_v61 }
 0x292   :  { %957 = vmatpush1.bf16.msra.mxu0 %v728_v0  ;;  %1121 = vmatpush1.bf16.msra.mxu1 %v730_v1  ;;  %v1698_v0 = vunpack.c.l.s8.bf16 %v1558_v63  ;;  %v1703_v1 = vunpack.c.h.s8.bf16 %v1559_v61  ;;  %v5269_v61 = vld [vmem:[#allocation8 + $0x68] sm:$0xff]  }
 0x293   :  { %958 = vmatprep.subr.bf16.mxu0 %v733_v2  ;;  %1122 = vmatprep.subr.bf16.mxu1 %v735_v3  ;;  %v1563_v2 = vld [vmem:[#allocation11 + $0x88] sm:$0xff]  ;;  %v1702_v3 = vunpack.c.h.s8.bf16 %v1558_v63 }
 0x294   :  { %v1707_v52 = vunpack.c.l.s8.bf16 %v1563_v2 }
 0x296   :  { %959 = vmatpush1.bf16.msra.mxu0 %v732_v6  ;;  %1123 = vmatpush1.bf16.msra.mxu1 %v734_v7  ;;  %v1706_v6 = vunpack.c.l.s8.bf16 %v1562_v4  ;;  %v1711_v7 = vunpack.c.h.s8.bf16 %v1563_v2  ;;  %v5271_v2 = vld [vmem:[#allocation8 + $0x70] sm:$0xff]  }
 0x297   :  { %960 = vmatprep.subr.bf16.mxu0 %v737_v8  ;;  %1124 = vmatprep.subr.bf16.mxu1 %v739_v9  ;;  %v1567_v8 = vld [vmem:[#allocation11 + $0xa8] sm:$0xff]  ;;  %v1710_v9 = vunpack.c.h.s8.bf16 %v1562_v4 }
 0x298   :  { %v1715_v10 = vunpack.c.l.s8.bf16 %v1567_v8 }
 0x29a   :  { %961 = vmatpush1.bf16.msra.mxu0 %v736_v12  ;;  %1125 = vmatpush1.bf16.msra.mxu1 %v738_v21  ;;  %v1714_v12 = vunpack.c.l.s8.bf16 %v1566_v11  ;;  %v1719_v21 = vunpack.c.h.s8.bf16 %v1567_v8  ;;  %v5274_v8 = vld [vmem:[#allocation8 + $0x38] sm:$0xff]  }
 0x29b   :  { %962 = vmatprep.subr.bf16.mxu0 %v741_v13  ;;  %1126 = vmatprep.subr.bf16.mxu1 %v743_v14  ;;  %v1571_v13 = vld [vmem:[#allocation11 + $0xc8] sm:$0xff]  ;;  %v1718_v14 = vunpack.c.h.s8.bf16 %v1566_v11  ;;  %v1594_v11 = vld [vmem:[#allocation11 + $0x180] sm:$0xff] }
 0x29c   :  { %v1723_v15 = vunpack.c.l.s8.bf16 %v1571_v13 }
 0x29e   :  { %963 = vmatpush1.bf16.msra.mxu0 %v740_v17  ;;  %1127 = vmatpush1.bf16.msra.mxu1 %v742_v18  ;;  %v1722_v17 = vunpack.c.l.s8.bf16 %v1570_v16  ;;  %v1727_v18 = vunpack.c.h.s8.bf16 %v1571_v13 }
 0x29f   :  { %964 = vmatprep.subr.bf16.mxu0 %v745_v38  ;;  %1128 = vmatprep.subr.bf16.mxu1 %v747_v19  ;;  %v1575_v38 = vld [vmem:[#allocation11 + $0xe8] sm:$0xff]  ;;  %v1726_v19 = vunpack.c.h.s8.bf16 %v1570_v16 }
 0x2a0   :  { %v1731_v20 = vunpack.c.l.s8.bf16 %v1575_v38 }
 0x2a2   :  { %965 = vmatpush1.bf16.msra.mxu0 %v744_v23  ;;  %1129 = vmatpush1.bf16.msra.mxu1 %v746_v24  ;;  %v1730_v23 = vunpack.c.l.s8.bf16 %v1574_v22  ;;  %v1735_v24 = vunpack.c.h.s8.bf16 %v1575_v38 }
 0x2a3   :  { %966 = vmatprep.subr.bf16.mxu0 %v749_v25  ;;  %1130 = vmatprep.subr.bf16.mxu1 %v751_v37  ;;  %v1579_v25 = vld [vmem:[#allocation11 + $0x108] sm:$0xff]  ;;  %v1734_v37 = vunpack.c.h.s8.bf16 %v1574_v22 }
 0x2a4   :  { %v1739_v26 = vunpack.c.l.s8.bf16 %v1579_v25 }
 0x2a6   :  { %967 = vmatpush1.bf16.msra.mxu0 %v748_v30  ;;  %1131 = vmatpush1.bf16.msra.mxu1 %v750_v31  ;;  %v5258_v30 = vld [vmem:[#allocation8 + $0x40] sm:$0xff]   ;;  %v6488_v31 = vrot.slane %v6476_v32, %v6425_v36  ;;  %v1742_v32 = vunpack.c.h.s8.bf16 %v1578_v28 }
 0x2a7   :  { %968 = vmatprep.subr.bf16.mxu0 %v753_v33  ;;  %1132 = vmatprep.subr.bf16.mxu1 %v755_v34  ;;  %v5259_v33 = vld [vmem:[#allocation8] sm:$0xff]   ;;  %v1738_v34 = vunpack.c.l.s8.bf16 %v1578_v28  ;;  %v1932_v28 = vcombine.high %v6472_v29, %v6472_v29 }
 0x2a8   :  { %v6505_v29 = vcombine.high %v6488_v31, %v6488_v31 }
 0x2aa   :  { %969 = vmatpush1.bf16.msra.mxu0 %v752_v39  ;;  %1133 = vmatpush1.bf16.msra.mxu1 %v754_v40  ;;  %v1743_v39 = vunpack.c.h.s8.bf16 %v1579_v25  ;;  %v5261_v40 = vld [vmem:[#allocation8 + $0x48] sm:$0xff]  }
 0x2ab   :  { %1989 = vmatprep.subr.bf16.mxu0 %v1675_v41  ;;  %4983 = vmatprep.subr.bf16.mxu1 %v5258_v30  ;;  %v5262_v41 = vld [vmem:[#allocation8 + $0x8] sm:$0xff]  }
 0x2ad   :  { %971 = vmatmul.mubr.bf16.vlgmr.msra.gmra.mrb[0].mxu0 %v804_v44  ;;  %1135 = vmatmul.mubr.bf16.vlgmr.msra.gmra.mrb[0].mxu1 %v804_v44  ;;  %v1582_v44 = vld [vmem:[#allocation11 + $0x120] sm:$0xff] }
 0x2ae   :  { %1990 = vmatpush1.bf16.msra.mxu0 %v1674_v45  ;;  %2021 = vmatprep.mubr.bf16.mxu0 %v6483_v46  ;;  %v5263_v45 = vld [vmem:[#allocation8 + $0x50] sm:$0xff]   ;;  %v1746_v48 = vunpack.c.l.s8.bf16 %v1582_v44 }
 0x2af   :  { %1991 = vmatprep.subr.bf16.mxu0 %v1679_v47  ;;  %4984 = vmatpush3.bf16.msra.mxu1 %v5259_v33  ;;  %v5264_v47 = vld [vmem:[#allocation8 + $0x10] sm:$0xff]   ;;  %v1606_v33 = vld [vmem:[#allocation11 + $0x1e0] sm:$0xff] }
 0x2b0   :  { %4985 = vmatprep.subr.bf16.mxu1 %v5261_v40 }
 0x2b2   :  { %1992 = vmatpush1.bf16.msra.mxu0 %v1678_v49  ;;  %v1751_v49 = vunpack.c.h.s8.bf16 %v1583_v54  ;;  %v1611_v54 = vld [vmem:[#allocation11 + $0x208] sm:$0xff] }
 0x2b3   :  { %1993 = vmatprep.subr.bf16.mxu0 %v1683_v50  ;;  %4986 = vmatpush3.bf16.msra.mxu1 %v5262_v41  ;;  %v5265_v50 = vld [vmem:[#allocation8 + $0x58] sm:$0xff]   ;;  %v1798_v41 = vunpack.c.h.s8.bf16 %v1606_v33 }
 0x2b4   :  { %4987 = vmatprep.subr.bf16.mxu1 %v5263_v45 }
 0x2b6   :  { %1994 = vmatpush1.bf16.msra.mxu0 %v1682_v5  ;;  %v5266_v5 = vld [vmem:[#allocation8 + $0x18] sm:$0xff]  }
 0x2b7   :  { %1995 = vmatprep.subr.bf16.mxu0 %v1687_v53  ;;  %4988 = vmatpush3.bf16.msra.mxu1 %v5264_v47  ;;  %v1750_v53 = vunpack.c.h.s8.bf16 %v1582_v44  ;;  %v1610_v44 = vld [vmem:[#allocation11 + $0x200] sm:$0xff] }
 0x2b8   :  { %4989 = vmatprep.subr.bf16.mxu1 %v5265_v50  ;;  %v1802_v45 = vunpack.c.l.s8.bf16 %v1610_v44  ;;  %v1806_v50 = vunpack.c.h.s8.bf16 %v1610_v44  ;;  %v1646_v44 = vld [vmem:[#allocation11 + $0x320] sm:$0xff] }
 0x2ba   :  { %1996 = vmatpush1.bf16.msra.mxu0 %v1686_v56  ;;  %v1586_v56 = vld [vmem:[#allocation11 + $0x140] sm:$0xff] }
 0x2bb   :  { %1997 = vmatprep.subr.bf16.mxu0 %v1691_v57  ;;  %4990 = vmatpush3.bf16.msra.mxu1 %v5266_v5  ;;  %v5267_v57 = vld [vmem:[#allocation8 + $0x60] sm:$0xff]   ;;  %v1758_v63 = vunpack.c.h.s8.bf16 %v1586_v56 }
 0x2bc   :  { %4991 = vmatprep.subr.bf16.mxu1 %v5267_v57  ;;  %v1614_v5 = vld [vmem:[#allocation11 + $0x220] sm:$0xff] }
 0x2bd   :  { %v1814_v57 = vunpack.c.h.s8.bf16 %v1614_v5 }
 0x2be   :  { %1998 = vmatpush1.bf16.msra.mxu0 %v1690_v59  ;;  %v1754_v59 = vunpack.c.l.s8.bf16 %v1586_v56  ;;  %v1619_v56 = vld [vmem:[#allocation11 + $0x248] sm:$0xff] }
 0x2bf   :  { %1999 = vmatprep.subr.bf16.mxu0 %v1695_v60  ;;  %v1759_v60 = vunpack.c.h.s8.bf16 %v1587_v51  ;;  %4992 = vmatpush3.bf16.msra.mxu1 %v5268_v58  ;;  %v1819_v58 = vunpack.c.l.s8.bf16 %v1619_v56 }
 0x2c0   :  { %4993 = vmatprep.subr.bf16.mxu1 %v5269_v61  ;;  %v1823_v61 = vunpack.c.h.s8.bf16 %v1619_v56  ;;  %v6531_v56 = vsub.s32 3, %v6422_v27 }
 0x2c2   :  { %2000 = vmatpush1.bf16.msra.mxu0 %v1694_v62  ;;  %v1591_v62 = vld [vmem:[#allocation11 + $0x168] sm:$0xff] }
 0x2c3   :  { %2001 = vmatprep.subr.bf16.mxu0 %v1699_v42  ;;  %v5270_v42 = vld [vmem:[#allocation8 + $0x28] sm:$0xff]   ;;  %v1767_v4 = vunpack.c.h.s8.bf16 %v1591_v62 }
 0x2c4   :  { %4994 = vmatpush3.bf16.msra.mxu1 %v5270_v42 }
 0x2c5   :  { %4995 = vmatprep.subr.bf16.mxu1 %v5271_v2 }
 0x2c6   :  { %2002 = vmatpush1.bf16.msra.mxu0 %v1698_v0  ;;  %v1763_v0 = vunpack.c.l.s8.bf16 %v1591_v62  ;;  %v1623_v62 = vld [vmem:[#allocation11 + $0x268] sm:$0xff] }
 0x2c7   :  { %2003 = vmatprep.subr.bf16.mxu0 %v1703_v1  ;;  %v1590_v1 = vld [vmem:[#allocation11 + $0x160] sm:$0xff]  ;;  %v1831_v2 = vunpack.c.h.s8.bf16 %v1623_v62 }
 0x2ca   :  { %2004 = vmatpush1.bf16.msra.mxu0 %v1702_v3  ;;  %v5272_v3 = vld [vmem:[#allocation8 + $0x30] sm:$0xff]  }
 0x2cb   :  { %2005 = vmatprep.subr.bf16.mxu0 %v1707_v52  ;;  %v1762_v52 = vunpack.c.l.s8.bf16 %v1590_v1  ;;  %4996 = vmatpush3.bf16.msra.mxu1 %v5272_v3  ;;  %v1627_v3 = vld [vmem:[#allocation11 + $0x288] sm:$0xff] }
 0x2ce   :  { %2006 = vmatpush1.bf16.msra.mxu0 %v1706_v6  ;;  %v1595_v6 = vld [vmem:[#allocation11 + $0x188] sm:$0xff] }
 0x2cf   :  { %2007 = vmatprep.subr.bf16.mxu0 %v1711_v7  ;;  %v5273_v7 = vld [vmem:[#allocation8 + $0x78] sm:$0xff]   ;;  %v1775_v13 = vunpack.c.h.s8.bf16 %v1595_v6 }
 0x2d0   :  { %4997 = vmatprep.subr.bf16.mxu1 %v5273_v7 }
 0x2d1   :  { %4998 = vmatpush3.bf16.msra.mxu1 %v5274_v8  ;;  %v1839_v8 = vunpack.c.h.s8.bf16 %v1627_v3 }
 0x2d2   :  { %2008 = vmatpush1.bf16.msra.mxu0 %v1710_v9  ;;  %v1766_v9 = vunpack.c.h.s8.bf16 %v1590_v1 }
 0x2d3   :  { %2009 = vmatprep.subr.bf16.mxu0 %v1715_v10  ;;  %v1771_v10 = vunpack.c.l.s8.bf16 %v1595_v6  ;;  %v1626_v6 = vld [vmem:[#allocation11 + $0x280] sm:$0xff] }
 0x2d4   :  { %v1834_v7 = vunpack.c.l.s8.bf16 %v1626_v6 }
 0x2d6   :  { %2010 = vmatpush1.bf16.msra.mxu0 %v1714_v12  ;;  %v5275_v12 = vld [vmem:[#allocation8 + $0xc0] sm:$0xff]  }
 0x2d7   :  { %2011 = vmatprep.subr.bf16.mxu0 %v1719_v21  ;;  %v1770_v21 = vunpack.c.l.s8.bf16 %v1594_v11  ;;  %5005 = vmatprep.subr.bf16.mxu1 %v5275_v12  ;;  %v1630_v12 = vld [vmem:[#allocation11 + $0x2a0] sm:$0xff] }
 0x2da   :  { %2012 = vmatpush1.bf16.msra.mxu0 %v1718_v14  ;;  %v1599_v14 = vld [vmem:[#allocation11 + $0x1a8] sm:$0xff] }
 0x2db   :  { %2013 = vmatprep.subr.bf16.mxu0 %v1723_v15  ;;  %v1774_v15 = vunpack.c.h.s8.bf16 %v1594_v11  ;;  %v1779_v16 = vunpack.c.l.s8.bf16 %v1599_v14  ;;  %v1783_v38 = vunpack.c.h.s8.bf16 %v1599_v14  ;;  %v1635_v14 = vld [vmem:[#allocation11 + $0x2c8] sm:$0xff] }
 0x2de   :  { %2014 = vmatpush1.bf16.msra.mxu0 %v1722_v17  ;;  %v1598_v17 = vld [vmem:[#allocation11 + $0x1a0] sm:$0xff] }
 0x2df   :  { %2015 = vmatprep.subr.bf16.mxu0 %v1727_v18  ;;  %v1778_v18 = vunpack.c.l.s8.bf16 %v1598_v17 }
 0x2e2   :  { %2016 = vmatpush1.bf16.msra.mxu0 %v1726_v19  ;;  %v1603_v19 = vld [vmem:[#allocation11 + $0x1c8] sm:$0xff] }
 0x2e3   :  { %2017 = vmatprep.subr.bf16.mxu0 %v1731_v20  ;;  %v1782_v20 = vunpack.c.h.s8.bf16 %v1598_v17  ;;  %v1787_v22 = vunpack.c.l.s8.bf16 %v1603_v19  ;;  %v1791_v25 = vunpack.c.h.s8.bf16 %v1603_v19  ;;  %v1634_v17 = vld [vmem:[#allocation11 + $0x2c0] sm:$0xff]  ;;  %v1639_v19 = vld [vmem:[#allocation11 + $0x2e8] sm:$0xff] }
 0x2e6   :  { %2018 = vmatpush1.bf16.msra.mxu0 %v1730_v23  ;;  %v1602_v23 = vld [vmem:[#allocation11 + $0x1c0] sm:$0xff] }
 0x2e7   :  { %2019 = vmatprep.subr.bf16.mxu0 %v1735_v24  ;;  %v1786_v24 = vunpack.c.l.s8.bf16 %v1602_v23 }
 0x2ea   :  { %2020 = vmatpush1.bf16.msra.mxu0 %v1734_v37  ;;  %v1607_v37 = vld [vmem:[#allocation11 + $0x1e8] sm:$0xff] }
 0x2eb   :  { %2030 = vmatprep.subr.bf16.mxu0 %v1739_v26  ;;  %v1790_v26 = vunpack.c.h.s8.bf16 %v1602_v23  ;;  %v1795_v30 = vunpack.c.l.s8.bf16 %v1607_v37  ;;  %v1799_v40 = vunpack.c.h.s8.bf16 %v1607_v37  ;;  %v1638_v23 = vld [vmem:[#allocation11 + $0x2e0] sm:$0xff]  ;;  %v1643_v37 = vld [vmem:[#allocation11 + $0x308] sm:$0xff] }
 0x2ed   :  { %2022 = vmatmul.mubr.bf16.vlgmr.msra.gmra.mrb[4].mxu0 %v6488_v31 }
 0x2ee   :  { %2031 = vmatpush1.bf16.msra.mxu0 %v1738_v34  ;;  %2062 = vmatprep.mubr.bf16.mxu0 %v6492_v35  ;;  %v1794_v34 = vunpack.c.l.s8.bf16 %v1606_v33 }
 0x2ef   :  { %2032 = vmatprep.subr.bf16.mxu0 %v1743_v39  ;;  %v6499_v39 = vrot.slane %v1932_v28, %v6425_v36  ;;  %v1867_v28 = vunpack.c.l.s8.bf16 %v1643_v37 }
 0x2f1   :  { %v6514_v33 = vrot.slane %v6499_v39, %v6425_v36 }
 0x2f2   :  { %2033 = vmatpush1.bf16.msra.mxu0 %v1742_v32  ;;  %v1948_v32 = vcombine.high %v6499_v39, %v6499_v39 }
 0x2f3   :  { %2034 = vmatprep.subr.bf16.mxu0 %v1747_v43  ;;  %v1803_v43 = vunpack.c.l.s8.bf16 %v1611_v54 }
 0x2f4   :  { %v6508_v47 = vrot.slane %v1948_v32, %v6425_v36  ;;  %v1874_v36 = vunpack.c.l.s8.bf16 %v1646_v44 }
 0x2f6   :  { %2035 = vmatpush1.bf16.msra.mxu0 %v1746_v48  ;;  %v1807_v48 = vunpack.c.h.s8.bf16 %v1611_v54  ;;  %v1871_v54 = vunpack.c.h.s8.bf16 %v1643_v37 }
 0x2f7   :  { %2036 = vmatprep.subr.bf16.mxu0 %v1751_v49  ;;  %v1615_v49 = vld [vmem:[#allocation11 + $0x228] sm:$0xff] }
 0x2f8   :  { %v1811_v51 = vunpack.c.l.s8.bf16 %v1615_v49 }
 0x2fa   :  { %2037 = vmatpush1.bf16.msra.mxu0 %v1750_v53  ;;  %v1810_v53 = vunpack.c.l.s8.bf16 %v1614_v5 }
 0x2fb   :  { %2038 = vmatprep.subr.bf16.mxu0 %v1755_v55  ;;  %v1815_v55 = vunpack.c.h.s8.bf16 %v1615_v49 }
 0x2fe   :  { %2039 = vmatpush1.bf16.msra.mxu0 %v1754_v59  ;;  %v1618_v59 = vld [vmem:[#allocation11 + $0x240] sm:$0xff] }
 0x2ff   :  { %2040 = vmatprep.subr.bf16.mxu0 %v1759_v60  ;;  %v1818_v60 = vunpack.c.l.s8.bf16 %v1618_v59  ;;  %v1822_v42 = vunpack.c.h.s8.bf16 %v1618_v59  ;;  %v1655_v59 = vld [vmem:[#allocation11 + $0x368] sm:$0xff] }
 0x302   :  { %2041 = vmatpush1.bf16.msra.mxu0 %v1758_v63  ;;  %v1827_v63 = vunpack.c.l.s8.bf16 %v1623_v62 }
 0x303   :  { %2042 = vmatprep.subr.bf16.mxu0 %v1763_v0  ;;  %v1622_v0 = vld [vmem:[#allocation11 + $0x260] sm:$0xff] }
 0x304   :  { %v1826_v1 = vunpack.c.l.s8.bf16 %v1622_v0 }
 0x306   :  { %2043 = vmatpush1.bf16.msra.mxu0 %v1762_v52  ;;  %v1830_v52 = vunpack.c.h.s8.bf16 %v1622_v0  ;;  %v1891_v0 = vunpack.c.l.s8.bf16 %v1655_v59 }
 0x307   :  { %2044 = vmatprep.subr.bf16.mxu0 %v1767_v4  ;;  %v1835_v4 = vunpack.c.l.s8.bf16 %v1627_v3 }
 0x30a   :  { %2045 = vmatpush1.bf16.msra.mxu0 %v1766_v9  ;;  %v1631_v9 = vld [vmem:[#allocation11 + $0x2a8] sm:$0xff] }
 0x30b   :  { %2046 = vmatprep.subr.bf16.mxu0 %v1771_v10  ;;  %v1838_v10 = vunpack.c.h.s8.bf16 %v1626_v6  ;;  %v1843_v11 = vunpack.c.l.s8.bf16 %v1631_v9 }
 0x30e   :  { %2047 = vmatpush1.bf16.msra.mxu0 %v1770_v21  ;;  %v1842_v21 = vunpack.c.l.s8.bf16 %v1630_v12 }
 0x30f   :  { %2048 = vmatprep.subr.bf16.mxu0 %v1775_v13  ;;  %v1847_v13 = vunpack.c.h.s8.bf16 %v1631_v9 }
 0x312   :  { %2049 = vmatpush1.bf16.msra.mxu0 %v1774_v15  ;;  %v1846_v15 = vunpack.c.h.s8.bf16 %v1630_v12 }
 0x313   :  { %2050 = vmatprep.subr.bf16.mxu0 %v1779_v16  ;;  %v1851_v16 = vunpack.c.l.s8.bf16 %v1635_v14 }
 0x316   :  { %2051 = vmatpush1.bf16.msra.mxu0 %v1778_v18  ;;  %v1850_v18 = vunpack.c.l.s8.bf16 %v1634_v17 }
 0x317   :  { %2052 = vmatprep.subr.bf16.mxu0 %v1783_v38  ;;  %v1855_v38 = vunpack.c.h.s8.bf16 %v1635_v14 }
 0x31a   :  { %2053 = vmatpush1.bf16.msra.mxu0 %v1782_v20  ;;  %v1854_v20 = vunpack.c.h.s8.bf16 %v1634_v17 }
 0x31b   :  { %2054 = vmatprep.subr.bf16.mxu0 %v1787_v22  ;;  %v1859_v22 = vunpack.c.l.s8.bf16 %v1639_v19 }
 0x31e   :  { %2055 = vmatpush1.bf16.msra.mxu0 %v1786_v24  ;;  %v1858_v24 = vunpack.c.l.s8.bf16 %v1638_v23 }
 0x31f   :  { %2056 = vmatprep.subr.bf16.mxu0 %v1791_v25  ;;  %v1863_v25 = vunpack.c.h.s8.bf16 %v1639_v19 }
 0x322   :  { %2057 = vmatpush1.bf16.msra.mxu0 %v1790_v26  ;;  %v1862_v26 = vunpack.c.h.s8.bf16 %v1638_v23 }
 0x323   :  { %2058 = vmatprep.subr.bf16.mxu0 %v1795_v30  ;;  %v1642_v30 = vld [vmem:[#allocation11 + $0x300] sm:$0xff] }
 0x324   :  { %v1870_v32 = vunpack.c.h.s8.bf16 %v1642_v30 }
 0x326   :  { %2059 = vmatpush1.bf16.msra.mxu0 %v1794_v34  ;;  %v1866_v34 = vunpack.c.l.s8.bf16 %v1642_v30  ;;  %v5277_v30 = vld [vmem:[#allocation8 + $0xc8] sm:$0xff]  }
 0x327   :  { %2060 = vmatprep.subr.bf16.mxu0 %v1799_v40  ;;  %v6518_v40 = vcombine.high %v6508_v47, %v6508_v47 }
 0x32a   :  { %2061 = vmatpush1.bf16.msra.mxu0 %v1798_v41  ;;  %v1647_v41 = vld [vmem:[#allocation11 + $0x328] sm:$0xff] }
 0x32b   :  { %2071 = vmatprep.subr.bf16.mxu0 %v1803_v43  ;;  %v1875_v43 = vunpack.c.l.s8.bf16 %v1647_v41  ;;  %v1879_v39 = vunpack.c.h.s8.bf16 %v1647_v41 }
 0x32d   :  { %2063 = vmatmul.mubr.bf16.vlgmr.msra.gmra.mrb[4].mxu0 %v6505_v29 }
 0x32e   :  { %2072 = vmatpush1.bf16.msra.mxu0 %v1802_v45  ;;  %2103 = vmatprep.mubr.bf16.mxu0 %v6508_v47  ;;  %v1651_v45 = vld [vmem:[#allocation11 + $0x348] sm:$0xff] }
 0x32f   :  { %2073 = vmatprep.subr.bf16.mxu0 %v1807_v48  ;;  %v1878_v48 = vunpack.c.h.s8.bf16 %v1646_v44  ;;  %v1883_v49 = vunpack.c.l.s8.bf16 %v1651_v45  ;;  %v5279_v44 = vld [vmem:[#allocation8 + $0xd0] sm:$0xff]  }
 0x332   :  { %2074 = vmatpush1.bf16.msra.mxu0 %v1806_v50  ;;  %v1650_v50 = vld [vmem:[#allocation11 + $0x340] sm:$0xff] }
 0x333   :  { %2075 = vmatprep.subr.bf16.mxu0 %v1811_v51  ;;  %v6523_v51 = vsub.s32 0, %v6422_v27  ;;  %v1882_v5 = vunpack.c.l.s8.bf16 %v1650_v50 }
 0x336   :  { %2076 = vmatpush1.bf16.msra.mxu0 %v1810_v53  ;;  %v6525_v53 = vld [vmem:[#allocation5] sm:$0xf] }
 0x337   :  { %2077 = vmatprep.subr.bf16.mxu0 %v1815_v55  ;;  %v6528_v55 = vsub.s32 1, %v6422_v27  ;;  %v1160_v62 = vrot.slane %v6525_v53, %v6531_v56 }
 0x33a   :  { %2078 = vmatpush1.bf16.msra.mxu0 %v1814_v57  ;;  %v1887_v57 = vunpack.c.h.s8.bf16 %v1651_v45  ;;  %v1662_v45 = vld [vmem:[#allocation11 + $0x3a0] sm:$0xff] }
 0x33b   :  { %2079 = vmatprep.subr.bf16.mxu0 %v1819_v58  ;;  %v6533_v58 = vld [vmem:[#allocation7] sm:$0xf] }
 0x33e   :  { %2080 = vmatpush1.bf16.msra.mxu0 %v1818_v60  ;;  %v1148_v60 = vrot.slane %v6525_v53, %v6523_v51 }
 0x33f   :  { %2081 = vmatprep.subr.bf16.mxu0 %v1823_v61  ;;  %v1152_v61 = vrot.slane %v6525_v53, %v6528_v55 }
 0x342   :  { %2082 = vmatpush1.bf16.msra.mxu0 %v1822_v42  ;;  %v1886_v42 = vunpack.c.h.s8.bf16 %v1650_v50  ;;  %v1906_v50 = vunpack.c.l.s8.bf16 %v1662_v45 }
 0x343   :  { %2083 = vmatprep.subr.bf16.mxu0 %v1827_v63  ;;  %v1174_v63 = vrot.slane %v6533_v58, %v6523_v51 }
 0x346   :  { %2084 = vmatpush1.bf16.msra.mxu0 %v1826_v1  ;;  %v1654_v1 = vld [vmem:[#allocation11 + $0x360] sm:$0xff] }
 0x347   :  { %2085 = vmatprep.subr.bf16.mxu0 %v1831_v2  ;;  %v1894_v23 = vunpack.c.h.s8.bf16 %v1654_v1 }
 0x34a   :  { %2086 = vmatpush1.bf16.msra.mxu0 %v1830_v52  ;;  %v1178_v52 = vrot.slane %v6533_v58, %v6528_v55 }
 0x34b   :  { %2087 = vmatprep.subr.bf16.mxu0 %v1835_v4  ;;  %v1186_v4 = vrot.slane %v6533_v58, %v6531_v56 }
 0x34e   :  { %2088 = vmatpush1.bf16.msra.mxu0 %v1834_v7 }
 0x34f   :  { %2089 = vmatprep.subr.bf16.mxu0 %v1839_v8 }
 0x352   :  { %2090 = vmatpush1.bf16.msra.mxu0 %v1838_v10 }
 0x353   :  { %2091 = vmatprep.subr.bf16.mxu0 %v1843_v11 }
 0x356   :  { %2092 = vmatpush1.bf16.msra.mxu0 %v1842_v21  ;;  %v1890_v21 = vunpack.c.l.s8.bf16 %v1654_v1 }
 0x357   :  { %2093 = vmatprep.subr.bf16.mxu0 %v1847_v13 }
 0x35a   :  { %2094 = vmatpush1.bf16.msra.mxu0 %v1846_v15 }
 0x35b   :  { %2095 = vmatprep.subr.bf16.mxu0 %v1851_v16  ;;  %v1895_v16 = vunpack.c.h.s8.bf16 %v1655_v59  ;;  %v1667_v59 = vld [vmem:[#allocation11 + $0x3c8] sm:$0xff] }
 0x35e   :  { %2096 = vmatpush1.bf16.msra.mxu0 %v1850_v18 }
 0x35f   :  { %2097 = vmatprep.subr.bf16.mxu0 %v1855_v38  ;;  %v1659_v38 = vld [vmem:[#allocation11 + $0x388] sm:$0xff] }
 0x360   :  { %v1903_v41 = vunpack.c.h.s8.bf16 %v1659_v38 }
 0x362   :  { %2098 = vmatpush1.bf16.msra.mxu0 %v1854_v20 }
 0x363   :  { %2099 = vmatprep.subr.bf16.mxu0 %v1859_v22 }
 0x366   :  { %2100 = vmatpush1.bf16.msra.mxu0 %v1858_v24  ;;  %v1899_v24 = vunpack.c.l.s8.bf16 %v1659_v38 }
 0x367   :  { %2101 = vmatprep.subr.bf16.mxu0 %v1863_v25  ;;  %v1658_v25 = vld [vmem:[#allocation11 + $0x380] sm:$0xff] }
 0x36a   :  { %2102 = vmatpush1.bf16.msra.mxu0 %v1862_v26  ;;  %v5276_v26 = vld [vmem:[#allocation8 + $0x80] sm:$0xff]  }
 0x36b   :  { %2112 = vmatprep.subr.bf16.mxu0 %v1867_v28 }
 0x36d   :  { %2104 = vmatmul.mubr.bf16.vlgmr.msra.gmra.mrb[4].mxu0 %v6514_v33 }
 0x36e   :  { %2113 = vmatpush1.bf16.msra.mxu0 %v1866_v34  ;;  %2144 = vmatprep.mubr.bf16.mxu0 %v6518_v40 }
 0x36f   :  { %2114 = vmatprep.subr.bf16.mxu0 %v1871_v54  ;;  %v1898_v54 = vunpack.c.l.s8.bf16 %v1658_v25 }
 0x372   :  { %2115 = vmatpush1.bf16.msra.mxu0 %v1870_v32  ;;  %v5278_v32 = vld [vmem:[#allocation8 + $0x88] sm:$0xff]  }
 0x373   :  { %2116 = vmatprep.subr.bf16.mxu0 %v1875_v43  ;;  %v1663_v43 = vld [vmem:[#allocation11 + $0x3a8] sm:$0xff] }
 0x376   :  { %2117 = vmatpush1.bf16.msra.mxu0 %v1874_v36  ;;  %v1902_v36 = vunpack.c.h.s8.bf16 %v1658_v25 }
 0x377   :  { %2118 = vmatprep.subr.bf16.mxu0 %v1879_v39  ;;  %v1907_v39 = vunpack.c.l.s8.bf16 %v1663_v43 }
 0x37a   :  { %2119 = vmatpush1.bf16.msra.mxu0 %v1878_v48  ;;  %v5280_v48 = vld [vmem:[#allocation8 + $0x90] sm:$0xff]  }
 0x37b   :  { %2120 = vmatprep.subr.bf16.mxu0 %v1883_v49  ;;  %v5281_v49 = vld [vmem:[#allocation8 + $0xd8] sm:$0xff]  }
 0x37e   :  { %2121 = vmatpush1.bf16.msra.mxu0 %v1882_v5  ;;  %v1911_v5 = vunpack.c.h.s8.bf16 %v1663_v43 }
 0x37f   :  { %2122 = vmatprep.subr.bf16.mxu0 %v1887_v57  ;;  %v5282_v57 = vld [vmem:[#allocation8 + $0x98] sm:$0xff]  }
 0x380   :  { %v972_v2 = vpop.f32.mrb[0].mxu0  ;;  %v6543_v3 = vpop.f32.mrb[0].mxu1 }
 0x381   :  { %v1165_v6 = vmul.f32 %v1148_v60, %v972_v2  ;;  %v974_v7 = vpop.f32.mrb[1].mxu0  ;;  %v1138_v8 = vpop.f32.mrb[1].mxu1  ;;  %v6550_v60 = vsub.s32 2, %v6422_v27  ;;  %v5285_v2 = vld [vmem:[#allocation8 + $0xe8] sm:$0xff]  }
 0x382   :  { %v1166_v9 = vmul.f32 %v1152_v61, %v974_v7  ;;  %v1168_v10 = vmul.f32 %v1160_v62, %v1138_v8  ;;  %v976_v11 = vpop.f32.mrb[2].mxu0  ;;  %v1140_v12 = vpop.f32.mrb[2].mxu1  ;;  %2123 = vmatpush1.bf16.msra.mxu0 %v1886_v42  ;;  %v5283_v61 = vld [vmem:[#allocation8 + $0xe0] sm:$0xff]   ;;  %v1910_v62 = vunpack.c.h.s8.bf16 %v1662_v45  ;;  %v1915_v42 = vunpack.c.l.s8.bf16 %v1667_v59  ;;  %v5286_v27 = vld [vmem:[#allocation8 + $0xa8] sm:$0xff]   ;;  %v1560_v45 = vld [vmem:[#allocation11 + $0x70] sm:$0xff] }
 0x383   :  { %v1191_v13 = vadd.f32 %v1174_v63, %v1165_v6  ;;  %v977_v14 = vpop.f32.mrb[3].mxu0  ;;  %v1141_v15 = vpop.f32.mrb[3].mxu1  ;;  %2124 = vmatprep.subr.bf16.mxu0 %v1891_v0  ;;  %v1666_v63 = vld [vmem:[#allocation11 + $0x3c0] sm:$0xff]  ;;  %v1156_v1 = vrot.slane %v6525_v53, %v6550_v60  ;;  %v1671_v6 = vld [vmem:[#allocation11 + $0x3e8] sm:$0xff]  ;;  %v1182_v8 = vrot.slane %v6533_v58, %v6550_v60 }
 0x384   :  { %v1192_v17 = vadd.f32 %v1178_v52, %v1166_v9  ;;  %v1194_v18 = vadd.f32 %v1186_v4, %v1168_v10  ;;  %v5284_v0 = vld [vmem:[#allocation8 + $0xa0] sm:$0xff]   ;;  %v1914_v52 = vunpack.c.l.s8.bf16 %v1666_v63  ;;  %v1919_v4 = vunpack.c.h.s8.bf16 %v1667_v59  ;;  %v5287_v9 = vld [vmem:[#allocation8 + $0xf0] sm:$0xff]  }
 0x385   :  { %v1195_v19 = vmax.f32 %v1191_v13, 0.0  ;;  %v1167_v7 = vmul.f32 %v1156_v1, %v6543_v3  ;;  %v1918_v10 = vunpack.c.h.s8.bf16 %v1666_v63  ;;  %v1923_v53 = vunpack.c.l.s8.bf16 %v1671_v6  ;;  %v1670_v11 = vld [vmem:[#allocation11 + $0x3e0] sm:$0xff]  ;;  %v5288_v12 = vld [vmem:[#allocation8 + $0xb0] sm:$0xff]   ;;  %v5289_v13 = vld [vmem:[#allocation8 + $0xf8] sm:$0xff]  }
 0x386   :  { %v1196_v20 = vmax.f32 %v1192_v17, 0.0  ;;  %v1198_v22 = vmax.f32 %v1194_v18, 0.0  ;;  %2125 = vmatpush1.bf16.msra.mxu0 %v1890_v21  ;;  %v1922_v14 = vunpack.c.l.s8.bf16 %v1670_v11  ;;  %v1549_v15 = vld [vmem:[#allocation11 + $0x18] sm:$0xff]  ;;  %v1927_v3 = vunpack.c.h.s8.bf16 %v1671_v6  ;;  %v1548_v18 = vld [vmem:[#allocation11 + $0x10] sm:$0xff] }
 0x387   :  { %2126 = vmatprep.subr.bf16.mxu0 %v1895_v16  ;;  %v1199_v28 = vpack.c.bf16 %v1195_v19, %v1195_v19  ;;  %v1193_v21 = vadd.f32 %v1182_v8, %v1167_v7  ;;  %v5290_v16 = vld [vmem:[#allocation8 + $0xb8] sm:$0xff]   ;;  %v1677_v17 = vunpack.c.l.s8.bf16 %v1549_v15  ;;  %v1926_v38 = vunpack.c.h.s8.bf16 %v1670_v11 }
 0x388   :  { %v1200_v37 = vpack.c.bf16 %v1196_v20, %v1196_v20  ;;  %v1202_v34 = vpack.c.bf16 %v1198_v22, %v1198_v22  ;;  %v1676_v19 = vunpack.c.l.s8.bf16 %v1548_v18  ;;  %v6559_v22 = vcombine.high %v6514_v33, %v6514_v33  ;;  %v1564_v59 = vld [vmem:[#allocation11 + $0x90] sm:$0xff] }
 0x389   :  { %v1197_v58 = vmax.f32 %v1193_v21, 0.0  ;;  %v1680_v25 = vunpack.c.h.s8.bf16 %v1548_v18  ;;  %v1712_v63 = vunpack.c.h.s8.bf16 %v1564_v59  ;;  %v1568_v1 = vld [vmem:[#allocation11 + $0xb0] sm:$0xff]  ;;  %v1585_v18 = vld [vmem:[#allocation11 + $0x138] sm:$0xff] }
 0x38a   :  { %1498 = vmatprep.mubr.bf16.mxu1 %v1200_v37  ;;  %2127 = vmatpush1.bf16.msra.mxu0 %v1894_v23  ;;  %v1681_v23 = vunpack.c.h.s8.bf16 %v1549_v15  ;;  %v1572_v7 = vld [vmem:[#allocation11 + $0xd0] sm:$0xff] }
 0x38b   :  { %1499 = vmatmul.mubr.bf16.vlgmr.msra.gmra.mrb[4].mxu1 %v1199_v28  ;;  %2128 = vmatprep.subr.bf16.mxu0 %v1899_v24  ;;  %v1201_v20 = vpack.c.bf16 %v1197_v58, %v1197_v58  ;;  %v1553_v24 = vld [vmem:[#allocation11 + $0x38] sm:$0xff]  ;;  %v1724_v8 = vunpack.c.l.s8.bf16 %v1572_v7 }
 0x38c   :  { %5006 = vmatpush3.bf16.msra.mxu1 %v5276_v26  ;;  %1538 = vmatprep.mubr.bf16.mxu1 %v1202_v34  ;;  %v1685_v37 = vunpack.c.l.s8.bf16 %v1553_v24  ;;  %v1552_v26 = vld [vmem:[#allocation11 + $0x30] sm:$0xff]  ;;  %v1557_v34 = vld [vmem:[#allocation11 + $0x58] sm:$0xff] }
 0x38d   :  { %5007 = vmatprep.subr.bf16.mxu1 %v5277_v30  ;;  %v1684_v28 = vunpack.c.l.s8.bf16 %v1552_v26  ;;  %v1689_v30 = vunpack.c.h.s8.bf16 %v1553_v24  ;;  %v1584_v24 = vld [vmem:[#allocation11 + $0x130] sm:$0xff] }
 0x38e   :  { %2129 = vmatpush1.bf16.msra.mxu0 %v1898_v54  ;;  %v1688_v54 = vunpack.c.h.s8.bf16 %v1552_v26  ;;  %v1748_v26 = vunpack.c.l.s8.bf16 %v1584_v24 }
 0x38f   :  { %2130 = vmatprep.subr.bf16.mxu0 %v1903_v41  ;;  %v1693_v41 = vunpack.c.l.s8.bf16 %v1557_v34 }
 0x390   :  { %5008 = vmatpush3.bf16.msra.mxu1 %v5278_v32  ;;  %v1556_v32 = vld [vmem:[#allocation11 + $0x50] sm:$0xff] }
 0x391   :  { %5009 = vmatprep.subr.bf16.mxu1 %v5279_v44  ;;  %v1692_v43 = vunpack.c.l.s8.bf16 %v1556_v32  ;;  %v1697_v44 = vunpack.c.h.s8.bf16 %v1557_v34  ;;  %v5296_v34 = vld [vmem:[#allocation16 + $0x10] sm:$0xff]  }
 0x392   :  { %2131 = vmatpush1.bf16.msra.mxu0 %v1902_v36  ;;  %v1696_v36 = vunpack.c.h.s8.bf16 %v1556_v32  ;;  %v5297_v32 = vld [vmem:[#allocation16 + $0x58] sm:$0xff]  }
 0x393   :  { %2132 = vmatprep.subr.bf16.mxu0 %v1907_v39 }
 0x394   :  { %5010 = vmatpush3.bf16.msra.mxu1 %v5280_v48  ;;  %v1700_v48 = vunpack.c.l.s8.bf16 %v1560_v45 }
 0x395   :  { %5011 = vmatprep.subr.bf16.mxu1 %v5281_v49 }
 0x396   :  { %2133 = vmatpush1.bf16.msra.mxu0 %v1906_v50  ;;  %v1565_v50 = vld [vmem:[#allocation11 + $0x98] sm:$0xff] }
 0x397   :  { %2134 = vmatprep.subr.bf16.mxu0 %v1911_v5  ;;  %v1704_v5 = vunpack.c.h.s8.bf16 %v1560_v45  ;;  %v5300_v45 = vld [vmem:[#allocation16 + $0x20] sm:$0xff]  }
 0x398   :  { %5012 = vmatpush3.bf16.msra.mxu1 %v5282_v57  ;;  %v1709_v57 = vunpack.c.l.s8.bf16 %v1565_v50 }
 0x399   :  { %5013 = vmatprep.subr.bf16.mxu1 %v5283_v61  ;;  %v1708_v61 = vunpack.c.l.s8.bf16 %v1564_v59 }
 0x39a   :  { %2135 = vmatpush1.bf16.msra.mxu0 %v1910_v62  ;;  %v1713_v62 = vunpack.c.h.s8.bf16 %v1565_v50  ;;  %v1592_v50 = vld [vmem:[#allocation11 + $0x170] sm:$0xff] }
 0x39b   :  { %2136 = vmatprep.subr.bf16.mxu0 %v1915_v42  ;;  %v1569_v42 = vld [vmem:[#allocation11 + $0xb8] sm:$0xff]  ;;  %v1764_v59 = vunpack.c.l.s8.bf16 %v1592_v50 }
 0x39c   :  { %5014 = vmatpush3.bf16.msra.mxu1 %v5284_v0  ;;  %v1717_v0 = vunpack.c.l.s8.bf16 %v1569_v42 }
 0x39d   :  { %5015 = vmatprep.subr.bf16.mxu1 %v5285_v2  ;;  %v1716_v2 = vunpack.c.l.s8.bf16 %v1568_v1 }
 0x39e   :  { %2137 = vmatpush1.bf16.msra.mxu0 %v1914_v52  ;;  %v1721_v52 = vunpack.c.h.s8.bf16 %v1569_v42  ;;  %v5303_v42 = vld [vmem:[#allocation16 + $0x70] sm:$0xff]  }
 0x39f   :  { %2138 = vmatprep.subr.bf16.mxu0 %v1919_v4  ;;  %v1573_v4 = vld [vmem:[#allocation11 + $0xd8] sm:$0xff] }
 0x3a0   :  { %5016 = vmatpush3.bf16.msra.mxu1 %v5286_v27  ;;  %v1720_v27 = vunpack.c.h.s8.bf16 %v1568_v1  ;;  %v1725_v6 = vunpack.c.l.s8.bf16 %v1573_v4 }
 0x3a1   :  { %5017 = vmatprep.subr.bf16.mxu1 %v5287_v9  ;;  %v1729_v9 = vunpack.c.h.s8.bf16 %v1573_v4  ;;  %v5306_v4 = vld [vmem:[#allocation16 + $0x38] sm:$0xff]  }
 0x3a2   :  { %2139 = vmatpush1.bf16.msra.mxu0 %v1918_v10  ;;  %v1577_v10 = vld [vmem:[#allocation11 + $0xf8] sm:$0xff] }
 0x3a3   :  { %2140 = vmatprep.subr.bf16.mxu0 %v1923_v53  ;;  %v1728_v53 = vunpack.c.h.s8.bf16 %v1572_v7  ;;  %v1733_v11 = vunpack.c.l.s8.bf16 %v1577_v10  ;;  %v1601_v7 = vld [vmem:[#allocation11 + $0x1b8] sm:$0xff] }
 0x3a4   :  { %5018 = vmatpush3.bf16.msra.mxu1 %v5288_v12  ;;  %v1576_v12 = vld [vmem:[#allocation11 + $0xf0] sm:$0xff] }
 0x3a5   :  { %5019 = vmatprep.subr.bf16.mxu1 %v5289_v13  ;;  %v1732_v21 = vunpack.c.l.s8.bf16 %v1576_v12  ;;  %v1737_v13 = vunpack.c.h.s8.bf16 %v1577_v10  ;;  %v1736_v15 = vunpack.c.h.s8.bf16 %v1576_v12  ;;  %v1600_v10 = vld [vmem:[#allocation11 + $0x1b0] sm:$0xff]  ;;  %v1605_v12 = vld [vmem:[#allocation11 + $0x1d8] sm:$0xff] }
 0x3a6   :  { %2141 = vmatpush1.bf16.msra.mxu0 %v1922_v14  ;;  %v1581_v14 = vld [vmem:[#allocation11 + $0x118] sm:$0xff] }
 0x3a7   :  { %2142 = vmatprep.subr.bf16.mxu0 %v1927_v3  ;;  %v1741_v3 = vunpack.c.l.s8.bf16 %v1581_v14 }
 0x3a8   :  { %5020 = vmatpush3.bf16.msra.mxu1 %v5290_v16  ;;  %v1580_v16 = vld [vmem:[#allocation11 + $0x110] sm:$0xff] }
 0x3a9   :  { %2153 = vmatprep.subr.bf16.mxu1 %v1677_v17  ;;  %v1740_v58 = vunpack.c.l.s8.bf16 %v1580_v16  ;;  %v1745_v17 = vunpack.c.h.s8.bf16 %v1581_v14  ;;  %v1604_v14 = vld [vmem:[#allocation11 + $0x1d0] sm:$0xff] }
 0x3aa   :  { %2143 = vmatpush1.bf16.msra.mxu0 %v1926_v38  ;;  %v5291_v38 = vld [vmem:[#allocation16 + $0x40] sm:$0xff]  }
 0x3ab   :  { %1539 = vmatmul.mubr.bf16.vlgmr.msra.gmra.mrb[8].mxu1 %v1201_v20  ;;  %v1744_v20 = vunpack.c.h.s8.bf16 %v1580_v16  ;;  %5027 = vmatprep.subr.bf16.mxu0 %v5291_v38  ;;  %v1609_v16 = vld [vmem:[#allocation11 + $0x1f8] sm:$0xff] }
 0x3ac   :  { %2154 = vmatpush1.bf16.msra.mxu1 %v1676_v19  ;;  %2185 = vmatprep.mubr.bf16.mxu1 %v6483_v46  ;;  %v1561_v46 = vld [vmem:[#allocation11 + $0x78] sm:$0xff]  ;;  %v5292_v19 = vld [vmem:[#allocation16] sm:$0xff]  }
 0x3ad   :  { %2145 = vmatmul.mubr.bf16.vlgmr.msra.gmra.mrb[4].mxu0 %v6559_v22  ;;  %2155 = vmatprep.subr.bf16.mxu1 %v1681_v23  ;;  %v1701_v39 = vunpack.c.l.s8.bf16 %v1561_v46  ;;  %v1705_v49 = vunpack.c.h.s8.bf16 %v1561_v46  ;;  %v1749_v23 = vunpack.c.l.s8.bf16 %v1585_v18 }
 0x3ae   :  { %5028 = vmatpush3.bf16.msra.mxu0 %v5292_v19  ;;  %v1801_v19 = vunpack.c.h.s8.bf16 %v1609_v16 }
 0x3b0   :  { %2156 = vmatpush1.bf16.msra.mxu1 %v1680_v25  ;;  %v5293_v25 = vld [vmem:[#allocation16 + $0x48] sm:$0xff]  }
 0x3b1   :  { %2157 = vmatprep.subr.bf16.mxu1 %v1685_v37  ;;  %v5294_v37 = vld [vmem:[#allocation16 + $0x8] sm:$0xff]   ;;  %5029 = vmatprep.subr.bf16.mxu0 %v5293_v25 }
 0x3b2   :  { %5030 = vmatpush3.bf16.msra.mxu0 %v5294_v37  ;;  %v1612_v25 = vld [vmem:[#allocation11 + $0x210] sm:$0xff] }
 0x3b3   :  { %v1804_v37 = vunpack.c.l.s8.bf16 %v1612_v25 }
 0x3b4   :  { %2158 = vmatpush1.bf16.msra.mxu1 %v1684_v28  ;;  %v1753_v28 = vunpack.c.h.s8.bf16 %v1585_v18  ;;  %v1608_v18 = vld [vmem:[#allocation11 + $0x1f0] sm:$0xff] }
 0x3b5   :  { %2159 = vmatprep.subr.bf16.mxu1 %v1689_v30  ;;  %v1589_v30 = vld [vmem:[#allocation11 + $0x158] sm:$0xff]  ;;  %v1796_v38 = vunpack.c.l.s8.bf16 %v1608_v18 }
 0x3b6   :  { %v1761_v46 = vunpack.c.h.s8.bf16 %v1589_v30 }
 0x3b8   :  { %2160 = vmatpush1.bf16.msra.mxu1 %v1688_v54  ;;  %v1752_v54 = vunpack.c.h.s8.bf16 %v1584_v24 }
 0x3b9   :  { %2161 = vmatprep.subr.bf16.mxu1 %v1693_v41  ;;  %v1588_v41 = vld [vmem:[#allocation11 + $0x150] sm:$0xff] }
 0x3bc   :  { %2162 = vmatpush1.bf16.msra.mxu1 %v1692_v43  ;;  %v5298_v43 = vld [vmem:[#allocation16 + $0x18] sm:$0xff]  }
 0x3bd   :  { %2163 = vmatprep.subr.bf16.mxu1 %v1697_v44  ;;  %v1756_v44 = vunpack.c.l.s8.bf16 %v1588_v41 }
 0x3c0   :  { %2164 = vmatpush1.bf16.msra.mxu1 %v1696_v36  ;;  %v1593_v36 = vld [vmem:[#allocation11 + $0x178] sm:$0xff] }
 0x3c1   :  { %2165 = vmatprep.subr.bf16.mxu1 %v1701_v39  ;;  %v5299_v39 = vld [vmem:[#allocation16 + $0x60] sm:$0xff]  }
 0x3c4   :  { %2166 = vmatpush1.bf16.msra.mxu1 %v1700_v48  ;;  %v1760_v48 = vunpack.c.h.s8.bf16 %v1588_v41 }
 0x3c5   :  { %2167 = vmatprep.subr.bf16.mxu1 %v1705_v49  ;;  %v1765_v49 = vunpack.c.l.s8.bf16 %v1593_v36 }
 0x3c8   :  { %2168 = vmatpush1.bf16.msra.mxu1 %v1704_v5  ;;  %v5301_v5 = vld [vmem:[#allocation16 + $0x68] sm:$0xff]  }
 0x3c9   :  { %2169 = vmatprep.subr.bf16.mxu1 %v1709_v57  ;;  %v5302_v57 = vld [vmem:[#allocation16 + $0x28] sm:$0xff]  }
 0x3cc   :  { %2170 = vmatpush1.bf16.msra.mxu1 %v1708_v61  ;;  %v1769_v61 = vunpack.c.h.s8.bf16 %v1593_v36 }
 0x3cd   :  { %2171 = vmatprep.subr.bf16.mxu1 %v1713_v62  ;;  %v1597_v62 = vld [vmem:[#allocation11 + $0x198] sm:$0xff] }
 0x3ce   :  { %v1773_v1 = vunpack.c.l.s8.bf16 %v1597_v62 }
 0x3d0   :  { %2172 = vmatpush1.bf16.msra.mxu1 %v1712_v63  ;;  %v5304_v63 = vld [vmem:[#allocation16 + $0x30] sm:$0xff]  }
 0x3d1   :  { %2173 = vmatprep.subr.bf16.mxu1 %v1717_v0  ;;  %v1768_v0 = vunpack.c.h.s8.bf16 %v1592_v50 }
 0x3d4   :  { %2174 = vmatpush1.bf16.msra.mxu1 %v1716_v2  ;;  %v1596_v2 = vld [vmem:[#allocation11 + $0x190] sm:$0xff] }
 0x3d5   :  { %2175 = vmatprep.subr.bf16.mxu1 %v1721_v52  ;;  %v5305_v52 = vld [vmem:[#allocation16 + $0x78] sm:$0xff]  }
 0x3d8   :  { %2176 = vmatpush1.bf16.msra.mxu1 %v1720_v27  ;;  %v1772_v27 = vunpack.c.l.s8.bf16 %v1596_v2 }
 0x3d9   :  { %2177 = vmatprep.subr.bf16.mxu1 %v1725_v6  ;;  %v1777_v6 = vunpack.c.h.s8.bf16 %v1597_v62 }
 0x3dc   :  { %2178 = vmatpush1.bf16.msra.mxu1 %v1724_v8  ;;  %v1776_v8 = vunpack.c.h.s8.bf16 %v1596_v2  ;;  %v1632_v2 = vld [vmem:[#allocation11 + $0x2b0] sm:$0xff] }
 0x3dd   :  { %2179 = vmatprep.subr.bf16.mxu1 %v1729_v9  ;;  %v1781_v9 = vunpack.c.l.s8.bf16 %v1601_v7 }
 0x3e0   :  { %2180 = vmatpush1.bf16.msra.mxu1 %v1728_v53  ;;  %v1780_v53 = vunpack.c.l.s8.bf16 %v1600_v10 }
 0x3e1   :  { %2181 = vmatprep.subr.bf16.mxu1 %v1733_v11  ;;  %v1785_v11 = vunpack.c.h.s8.bf16 %v1601_v7 }
 0x3e4   :  { %2182 = vmatpush1.bf16.msra.mxu1 %v1732_v21  ;;  %v1784_v21 = vunpack.c.h.s8.bf16 %v1600_v10 }
 0x3e5   :  { %2183 = vmatprep.subr.bf16.mxu1 %v1737_v13  ;;  %v1789_v13 = vunpack.c.l.s8.bf16 %v1605_v12 }
 0x3e8   :  { %2184 = vmatpush1.bf16.msra.mxu1 %v1736_v15  ;;  %v1788_v15 = vunpack.c.l.s8.bf16 %v1604_v14 }
 0x3e9   :  { %2194 = vmatprep.subr.bf16.mxu1 %v1741_v3  ;;  %v1793_v3 = vunpack.c.h.s8.bf16 %v1605_v12 }
 0x3eb   :  { %2186 = vmatmul.mubr.bf16.vlgmr.msra.gmra.mrb[12].mxu1 %v6488_v31  ;;  %v5295_v31 = vld [vmem:[#allocation16 + $0x50] sm:$0xff]  }
 0x3ec   :  { %2195 = vmatpush1.bf16.msra.mxu1 %v1740_v58  ;;  %2226 = vmatprep.mubr.bf16.mxu1 %v6492_v35  ;;  %v1757_v35 = vunpack.c.l.s8.bf16 %v1589_v30  ;;  %v1792_v58 = vunpack.c.h.s8.bf16 %v1604_v14  ;;  %v5309_v30 = vld [vmem:[%s6744_s6 + $0x4] ss:$8 sps:$4 sm:$0xff]  }
 0x3ed   :  { %2196 = vmatprep.subr.bf16.mxu1 %v1745_v17  ;;  %5031 = vmatprep.subr.bf16.mxu0 %v5295_v31  ;;  %v1797_v17 = vunpack.c.l.s8.bf16 %v1609_v16  ;;  %v1808_v31 = vunpack.c.h.s8.bf16 %v1612_v25  ;;  %v1649_v25 = vld [vmem:[#allocation11 + $0x338] sm:$0xff] }
 0x3ee   :  { %5032 = vmatpush3.bf16.msra.mxu0 %v5296_v34 }
 0x3ef   :  { %5033 = vmatprep.subr.bf16.mxu0 %v5297_v32  ;;  %v1621_v32 = vld [vmem:[#allocation11 + $0x258] sm:$0xff] }
 0x3f0   :  { %2197 = vmatpush1.bf16.msra.mxu1 %v1744_v20  ;;  %v1613_v20 = vld [vmem:[#allocation11 + $0x218] sm:$0xff]  ;;  %v1825_v36 = vunpack.c.h.s8.bf16 %v1621_v32 }
 0x3f1   :  { %2198 = vmatprep.subr.bf16.mxu1 %v1749_v23  ;;  %v1800_v23 = vunpack.c.h.s8.bf16 %v1608_v18  ;;  %v1805_v24 = vunpack.c.l.s8.bf16 %v1613_v20  ;;  %v1645_v18 = vld [vmem:[#allocation11 + $0x318] sm:$0xff] }
 0x3f2   :  { %5034 = vmatpush3.bf16.msra.mxu0 %v5298_v43 }
 0x3f3   :  { %5035 = vmatprep.subr.bf16.mxu0 %v5299_v39  ;;  %v1625_v39 = vld [vmem:[#allocation11 + $0x278] sm:$0xff] }
 0x3f4   :  { %2199 = vmatpush1.bf16.msra.mxu1 %v1748_v26  ;;  %v1809_v26 = vunpack.c.h.s8.bf16 %v1613_v20  ;;  %v1833_v50 = vunpack.c.h.s8.bf16 %v1625_v39  ;;  %v1644_v20 = vld [vmem:[#allocation11 + $0x310] sm:$0xff] }
 0x3f5   :  { %2200 = vmatprep.subr.bf16.mxu1 %v1753_v28  ;;  %v1617_v28 = vld [vmem:[#allocation11 + $0x238] sm:$0xff] }
 0x3f6   :  { %5036 = vmatpush3.bf16.msra.mxu0 %v5300_v45  ;;  %v1813_v34 = vunpack.c.l.s8.bf16 %v1617_v28  ;;  %v1817_v41 = vunpack.c.h.s8.bf16 %v1617_v28  ;;  %v1829_v45 = vunpack.c.l.s8.bf16 %v1625_v39  ;;  %v1648_v28 = vld [vmem:[#allocation11 + $0x330] sm:$0xff] }
 0x3f7   :  { %5037 = vmatprep.subr.bf16.mxu0 %v5301_v5  ;;  %v1629_v5 = vld [vmem:[#allocation11 + $0x298] sm:$0xff] }
 0x3f8   :  { %2201 = vmatpush1.bf16.msra.mxu1 %v1752_v54  ;;  %v1616_v54 = vld [vmem:[#allocation11 + $0x230] sm:$0xff] }
 0x3f9   :  { %2202 = vmatprep.subr.bf16.mxu1 %v1757_v35  ;;  %v1812_v35 = vunpack.c.l.s8.bf16 %v1616_v54  ;;  %v1816_v43 = vunpack.c.h.s8.bf16 %v1616_v54  ;;  %v1880_v54 = vunpack.c.h.s8.bf16 %v1648_v28 }
 0x3fa   :  { %5038 = vmatpush3.bf16.msra.mxu0 %v5302_v57 }
 0x3fb   :  { %5039 = vmatprep.subr.bf16.mxu0 %v5303_v42  ;;  %v1841_v42 = vunpack.c.h.s8.bf16 %v1629_v5 }
 0x3fc   :  { %2203 = vmatpush1.bf16.msra.mxu1 %v1756_v44  ;;  %v1821_v44 = vunpack.c.l.s8.bf16 %v1621_v32 }
 0x3fd   :  { %2204 = vmatprep.subr.bf16.mxu1 %v1761_v46  ;;  %v1620_v46 = vld [vmem:[#allocation11 + $0x250] sm:$0xff] }
 0x3fe   :  { %5040 = vmatpush3.bf16.msra.mxu0 %v5304_v63  ;;  %v1633_v63 = vld [vmem:[#allocation11 + $0x2b8] sm:$0xff] }
 0x3ff   :  { %5041 = vmatprep.subr.bf16.mxu0 %v5305_v52  ;;  %v1844_v52 = vunpack.c.l.s8.bf16 %v1632_v2 }
 0x400   :  { %2205 = vmatpush1.bf16.msra.mxu1 %v1760_v48  ;;  %v1624_v48 = vld [vmem:[#allocation11 + $0x270] sm:$0xff] }
 0x401   :  { %2206 = vmatprep.subr.bf16.mxu1 %v1765_v49  ;;  %v1828_v49 = vunpack.c.l.s8.bf16 %v1624_v48  ;;  %v1832_v57 = vunpack.c.h.s8.bf16 %v1624_v48 }
 0x402   :  { %5042 = vmatpush3.bf16.msra.mxu0 %v5306_v4  ;;  %v1849_v4 = vunpack.c.h.s8.bf16 %v1633_v63 }
 0x403   :  { %2779 = vmatprep.subr.bf16.mxu0 %v5309_v30  ;;  %v1876_v30 = vunpack.c.l.s8.bf16 %v1648_v28 }
 0x404   :  { %2207 = vmatpush1.bf16.msra.mxu1 %v1764_v59  ;;  %v1837_v59 = vunpack.c.l.s8.bf16 %v1629_v5 }
 0x405   :  { %2208 = vmatprep.subr.bf16.mxu1 %v1769_v61  ;;  %v1628_v61 = vld [vmem:[#allocation11 + $0x290] sm:$0xff] }
 0x406   :  { %v1836_v62 = vunpack.c.l.s8.bf16 %v1628_v61 }
 0x408   :  { %2209 = vmatpush1.bf16.msra.mxu1 %v1768_v0  ;;  %v1840_v0 = vunpack.c.h.s8.bf16 %v1628_v61 }
 0x409   :  { %2210 = vmatprep.subr.bf16.mxu1 %v1773_v1  ;;  %v1845_v1 = vunpack.c.l.s8.bf16 %v1633_v63 }
 0x40c   :  { %2211 = vmatpush1.bf16.msra.mxu1 %v1772_v27  ;;  %v1637_v27 = vld [vmem:[#allocation11 + $0x2d8] sm:$0xff] }
 0x40d   :  { %2212 = vmatprep.subr.bf16.mxu1 %v1777_v6  ;;  %v1848_v6 = vunpack.c.h.s8.bf16 %v1632_v2  ;;  %v1853_v7 = vunpack.c.l.s8.bf16 %v1637_v27  ;;  %v1857_v10 = vunpack.c.h.s8.bf16 %v1637_v27 }
 0x410   :  { %2213 = vmatpush1.bf16.msra.mxu1 %v1776_v8  ;;  %v1636_v8 = vld [vmem:[#allocation11 + $0x2d0] sm:$0xff] }
 0x411   :  { %2214 = vmatprep.subr.bf16.mxu1 %v1781_v9  ;;  %v1852_v9 = vunpack.c.l.s8.bf16 %v1636_v8 }
 0x414   :  { %2215 = vmatpush1.bf16.msra.mxu1 %v1780_v53  ;;  %v1641_v53 = vld [vmem:[#allocation11 + $0x2f8] sm:$0xff] }
 0x415   :  { %2216 = vmatprep.subr.bf16.mxu1 %v1785_v11  ;;  %v1856_v11 = vunpack.c.h.s8.bf16 %v1636_v8  ;;  %v1861_v12 = vunpack.c.l.s8.bf16 %v1641_v53 }
 0x418   :  { %2217 = vmatpush1.bf16.msra.mxu1 %v1784_v21  ;;  %v1640_v21 = vld [vmem:[#allocation11 + $0x2f0] sm:$0xff] }
 0x419   :  { %2218 = vmatprep.subr.bf16.mxu1 %v1789_v13  ;;  %v1860_v16 = vunpack.c.l.s8.bf16 %v1640_v21 }
 0x41c   :  { %2219 = vmatpush1.bf16.msra.mxu1 %v1788_v15 }
 0x41d   :  { %2220 = vmatprep.subr.bf16.mxu1 %v1793_v3 }
 0x420   :  { %2221 = vmatpush1.bf16.msra.mxu1 %v1792_v58 }
 0x421   :  { %2222 = vmatprep.subr.bf16.mxu1 %v1797_v17  ;;  %v1865_v17 = vunpack.c.h.s8.bf16 %v1641_v53 }
 0x424   :  { %2223 = vmatpush1.bf16.msra.mxu1 %v1796_v38  ;;  %v1864_v38 = vunpack.c.h.s8.bf16 %v1640_v21 }
 0x425   :  { %2224 = vmatprep.subr.bf16.mxu1 %v1801_v19  ;;  %v1869_v19 = vunpack.c.l.s8.bf16 %v1645_v18 }
 0x428   :  { %2225 = vmatpush1.bf16.msra.mxu1 %v1800_v23  ;;  %v1868_v23 = vunpack.c.l.s8.bf16 %v1644_v20 }
 0x429   :  { %2235 = vmatprep.subr.bf16.mxu1 %v1805_v24  ;;  %v1873_v24 = vunpack.c.h.s8.bf16 %v1645_v18 }
 0x42b   :  { %2227 = vmatmul.mubr.bf16.vlgmr.msra.gmra.mrb[12].mxu1 %v6505_v29  ;;  %v1820_v29 = vunpack.c.l.s8.bf16 %v1620_v46 }
 0x42c   :  { %2236 = vmatpush1.bf16.msra.mxu1 %v1804_v37  ;;  %2267 = vmatprep.mubr.bf16.mxu1 %v6508_v47  ;;  %v1824_v47 = vunpack.c.h.s8.bf16 %v1620_v46  ;;  %v1872_v37 = vunpack.c.h.s8.bf16 %v1644_v20  ;;  %v6572_v46 = vld [vmem:[#allocation14] sm:$0xf] }
 0x42d   :  { %2237 = vmatprep.subr.bf16.mxu1 %v1809_v26  ;;  %v1877_v26 = vunpack.c.l.s8.bf16 %v1649_v25 }
 0x430   :  { %2238 = vmatpush1.bf16.msra.mxu1 %v1808_v31  ;;  %v1881_v31 = vunpack.c.h.s8.bf16 %v1649_v25  ;;  %v6134_v25 = vmov 0  }
 0x431   :  { %2239 = vmatprep.subr.bf16.mxu1 %v1813_v34  ;;  %v1653_v34 = vld [vmem:[#allocation11 + $0x358] sm:$0xff] }
 0x434   :  { %2240 = vmatpush1.bf16.msra.mxu1 %v1812_v35  ;;  %v1885_v35 = vunpack.c.l.s8.bf16 %v1653_v34 }
 0x435   :  { %2241 = vmatprep.subr.bf16.mxu1 %v1817_v41  ;;  %v1652_v41 = vld [vmem:[#allocation11 + $0x350] sm:$0xff] }
 0x436   :  { %v1884_v32 = vunpack.c.l.s8.bf16 %v1652_v41 }
 0x438   :  { %2242 = vmatpush1.bf16.msra.mxu1 %v1816_v43  ;;  %v6570_v43 = vld [vmem:[#allocation13] sm:$0xf] }
 0x439   :  { %2243 = vmatprep.subr.bf16.mxu1 %v1821_v44  ;;  %v1888_v44 = vunpack.c.h.s8.bf16 %v1652_v41  ;;  %v2326_v48 = vrot.slane %v6570_v43, %v6528_v55  ;;  %v1668_v41 = vld [vmem:[#allocation11 + $0x3d0] sm:$0xff] }
 0x43c   :  { %2244 = vmatpush1.bf16.msra.mxu1 %v1820_v29  ;;  %v4704_v29 = vld [vmem:[#allocation10] ss:$0 sm:$0xff] }
 0x43d   :  { %2245 = vmatprep.subr.bf16.mxu1 %v1825_v36  ;;  %v2322_v36 = vrot.slane %v6570_v43, %v6523_v51 }
 0x440   :  { %2246 = vmatpush1.bf16.msra.mxu1 %v1824_v47  ;;  %v1656_v47 = vld [vmem:[#allocation11 + $0x370] sm:$0xff] }
 0x441   :  { %2247 = vmatprep.subr.bf16.mxu1 %v1829_v45 }
 0x444   :  { %2248 = vmatpush1.bf16.msra.mxu1 %v1828_v49 }
 0x445   :  { %2249 = vmatprep.subr.bf16.mxu1 %v1833_v50  ;;  %v2348_v50 = vrot.slane %v6572_v46, %v6523_v51 }
 0x448   :  { %2250 = vmatpush1.bf16.msra.mxu1 %v1832_v57 }
 0x449   :  { %2251 = vmatprep.subr.bf16.mxu1 %v1837_v59 }
 0x44c   :  { %2252 = vmatpush1.bf16.msra.mxu1 %v1836_v62  ;;  %v2352_v62 = vrot.slane %v6572_v46, %v6528_v55 }
 0x44d   :  { %2253 = vmatprep.subr.bf16.mxu1 %v1841_v42  ;;  %v1892_v42 = vunpack.c.l.s8.bf16 %v1656_v47 }
 0x450   :  { %2254 = vmatpush1.bf16.msra.mxu1 %v1840_v0 }
 0x451   :  { %2255 = vmatprep.subr.bf16.mxu1 %v1845_v1 }
 0x454   :  { %2256 = vmatpush1.bf16.msra.mxu1 %v1844_v52 }
 0x455   :  { %2257 = vmatprep.subr.bf16.mxu1 %v1849_v4 }
 0x458   :  { %2258 = vmatpush1.bf16.msra.mxu1 %v1848_v6  ;;  %v1661_v6 = vld [vmem:[#allocation11 + $0x398] sm:$0xff] }
 0x459   :  { %2259 = vmatprep.subr.bf16.mxu1 %v1853_v7 }
 0x45c   :  { %2260 = vmatpush1.bf16.msra.mxu1 %v1852_v9 }
 0x45d   :  { %2261 = vmatprep.subr.bf16.mxu1 %v1857_v10  ;;  %v1896_v10 = vunpack.c.h.s8.bf16 %v1656_v47 }
 0x45e   :  { %v4999_v13 = vpop.f32.mrb[4].mxu1 }
 0x45f   :  { %v5000_v14 = vpop.f32.mrb[5].mxu1 }
 0x460   :  { %v5001_v15 = vadd.f32 %v5000_v14, %v4999_v13  ;;  %2262 = vmatpush1.bf16.msra.mxu1 %v1856_v11  ;;  %v5002_v3 = vpop.f32.mrb[6].mxu1  ;;  %v1901_v11 = vunpack.c.l.s8.bf16 %v1661_v6 }
 0x461   :  { %v5003_v58 = vpop.f32.mrb[7].mxu1  ;;  %2263 = vmatprep.subr.bf16.mxu1 %v1861_v12  ;;  %v1660_v12 = vld [vmem:[#allocation11 + $0x390] sm:$0xff] }
 0x462   :  { %v1501_v5 = vadd.f32 %v5001_v15, %v4704_v29  ;;  %v1900_v14 = vunpack.c.l.s8.bf16 %v1660_v12  ;;  %v5307_v15 = vld [vmem:[%s6744_s6] ss:$8 sps:$4 sm:$0xff]   ;;  %v5312_v58 = vld [vmem:[%s6744_s6 + $0x14] ss:$8 sps:$4 sm:$0xff]   ;;  %v1904_v18 = vunpack.c.h.s8.bf16 %v1660_v12 }
 0x463   :  { %v5368_v12 = vld [vmem:[#allocation23 + $0x64] ss:$16 sps:$4 sm:$0xff]  }
 0x464   :  { %2264 = vmatpush1.bf16.msra.mxu1 %v1860_v16  ;;  %v1905_v16 = vunpack.c.h.s8.bf16 %v1661_v6  ;;  %v5332_v6 = vld [vmem:[%s6746_s20 + $0x40] sm:$0xff]  }
 0x465   :  { %2265 = vmatprep.subr.bf16.mxu1 %v1865_v17  ;;  %v1665_v17 = vld [vmem:[#allocation11 + $0x3b8] sm:$0xff] }
 0x466   :  { %v1909_v20 = vunpack.c.l.s8.bf16 %v1665_v17  ;;  %v1913_v28 = vunpack.c.h.s8.bf16 %v1665_v17 }
 0x468   :  { %2266 = vmatpush1.bf16.msra.mxu1 %v1864_v38  ;;  %v1664_v38 = vld [vmem:[#allocation11 + $0x3b0] sm:$0xff] }
 0x469   :  { %2276 = vmatprep.subr.bf16.mxu1 %v1869_v19  ;;  %v5310_v19 = vld [vmem:[%s6744_s6 + $0x10] ss:$8 sps:$4 sm:$0xff]  }
 0x46b   :  { %2268 = vmatmul.mubr.bf16.vlgmr.msra.gmra.mrb[12].mxu1 %v6514_v33  ;;  %v1889_v33 = vunpack.c.h.s8.bf16 %v1653_v34 }
 0x46c   :  { %2277 = vmatpush1.bf16.msra.mxu1 %v1868_v23  ;;  %2308 = vmatprep.mubr.bf16.mxu1 %v6518_v40  ;;  %v1657_v40 = vld [vmem:[#allocation11 + $0x378] sm:$0xff] }
 0x46d   :  { %2278 = vmatprep.subr.bf16.mxu1 %v1873_v24  ;;  %v1893_v39 = vunpack.c.l.s8.bf16 %v1657_v40  ;;  %v1897_v2 = vunpack.c.h.s8.bf16 %v1657_v40  ;;  %v5313_v23 = vld [vmem:[%s6744_s6 + $0x24] ss:$8 sps:$4 sm:$0x7f]   ;;  %v5315_v24 = vld [vmem:[%s6744_s6 + $0x20] ss:$8 sps:$4 sm:$0x7f]  }
 0x46e   :  { %v1673_v40 = vld [vmem:[#allocation11 + $0x3f8] sm:$0xff] }
 0x46f   :  { %v1925_v29 = vunpack.c.l.s8.bf16 %v1673_v40  ;;  %v1929_v47 = vunpack.c.h.s8.bf16 %v1673_v40 }
 0x470   :  { %2279 = vmatpush1.bf16.msra.mxu1 %v1872_v37  ;;  %v1908_v37 = vunpack.c.l.s8.bf16 %v1664_v38 }
 0x471   :  { %2280 = vmatprep.subr.bf16.mxu1 %v1877_v26  ;;  %v2720_v26 = vld [vmem:[%s6745_s28] sm:$0x3] }
 0x472   :  { %v2721_v34 = vpack.c.bf16 %v2720_v26, %v2720_v26 }
 0x474   :  { %2281 = vmatpush1.bf16.msra.mxu1 %v1876_v30  ;;  %v2774_v30 = vsel %vm2772_vm0, %v5315_v24, 0 }
 0x475   :  { %2282 = vmatprep.subr.bf16.mxu1 %v1881_v31  ;;  %v1669_v31 = vld [vmem:[#allocation11 + $0x3d8] sm:$0xff] }
 0x478   :  { %2283 = vmatpush1.bf16.msra.mxu1 %v1880_v54  ;;  %v1912_v54 = vunpack.c.h.s8.bf16 %v1664_v38 }
 0x479   :  { %2284 = vmatprep.subr.bf16.mxu1 %v1885_v35  ;;  %v1917_v35 = vunpack.c.l.s8.bf16 %v1669_v31 }
 0x47c   :  { %2285 = vmatpush1.bf16.msra.mxu1 %v1884_v32  ;;  %v1916_v32 = vunpack.c.l.s8.bf16 %v1668_v41 }
 0x47d   :  { %2286 = vmatprep.subr.bf16.mxu1 %v1889_v33  ;;  %v1921_v33 = vunpack.c.h.s8.bf16 %v1669_v31  ;;  %v2330_v31 = vrot.slane %v6570_v43, %v6550_v60 }
 0x47e   :  { %v5021_v45 = vpop.f32.mrb[8].mxu1 }
 0x47f   :  { %v5022_v49 = vpop.f32.mrb[9].mxu1 }
 0x480   :  { %v5023_v57 = vadd.f32 %v5022_v49, %v5021_v45  ;;  %v5024_v59 = vpop.f32.mrb[10].mxu1  ;;  %2287 = vmatpush1.bf16.msra.mxu1 %v1888_v44  ;;  %v2146_v61 = vpop.f32.mrb[4].mxu0  ;;  %v1920_v44 = vunpack.c.h.s8.bf16 %v1668_v41  ;;  %v5317_v49 = vld [vmem:[#allocation16 + $0x80] sm:$0xff]   ;;  %v2360_v41 = vrot.slane %v6572_v46, %v6531_v56 }
 0x481   :  { %v5025_v63 = vpop.f32.mrb[11].mxu1  ;;  %v2339_v0 = vmul.f32 %v2322_v36, %v2146_v61  ;;  %v2148_v1 = vpop.f32.mrb[5].mxu0  ;;  %2288 = vmatprep.subr.bf16.mxu1 %v1893_v39  ;;  %v1672_v36 = vld [vmem:[#allocation11 + $0x3f0] sm:$0xff]  ;;  %v5321_v59 = vld [vmem:[#allocation16 + $0x90] sm:$0xff]   ;;  %v5322_v61 = vld [vmem:[#allocation16 + $0xd8] sm:$0xff]  }
 0x482   :  { %v6582_v52 = vadd.f32 %v5023_v57, %v1501_v5  ;;  %v2340_v4 = vmul.f32 %v2326_v48, %v2148_v1  ;;  %v2150_v27 = vpop.f32.mrb[6].mxu0  ;;  %v1924_v39 = vunpack.c.l.s8.bf16 %v1672_v36  ;;  %v1928_v45 = vunpack.c.h.s8.bf16 %v1672_v36  ;;  %v5316_v48 = vld [vmem:[#allocation16 + $0xc0] sm:$0xff]   ;;  %v5319_v5 = vld [vmem:[#allocation16 + $0x88] sm:$0xff]   ;;  %v5320_v57 = vld [vmem:[#allocation16 + $0xd0] sm:$0xff]  }
 0x483   :  { %v2365_v7 = vadd.f32 %v2348_v50, %v2339_v0  ;;  %v2151_v8 = vpop.f32.mrb[7].mxu0  ;;  %v5318_v50 = vld [vmem:[#allocation16 + $0xc8] sm:$0xff]   ;;  %v5325_v63 = vld [vmem:[#allocation16 + $0xa0] sm:$0xff]   ;;  %v5328_v1 = vld [vmem:[#allocation16 + $0xf0] sm:$0xff]  }
 0x484   :  { %v2366_v9 = vadd.f32 %v2352_v62, %v2340_v4  ;;  %2289 = vmatpush1.bf16.msra.mxu1 %v1892_v42  ;;  %v5323_v62 = vld [vmem:[#allocation16 + $0x98] sm:$0xff]   ;;  %v5324_v42 = vld [vmem:[#allocation16 + $0xe0] sm:$0xff]   ;;  %v5327_v0 = vld [vmem:[#allocation16 + $0xa8] sm:$0xff]  }
 0x485   :  { %v2369_v53 = vmax.f32 %v2365_v7, 0.0  ;;  %2290 = vmatprep.subr.bf16.mxu1 %v1897_v2  ;;  %v5329_v2 = vld [vmem:[#allocation16 + $0xb0] sm:$0xff]   ;;  %v5330_v4 = vld [vmem:[#allocation16 + $0xf8] sm:$0xff]  }
 0x486   :  { %v2370_v21 = vmax.f32 %v2366_v9, 0.0  ;;  %v5331_v27 = vld [vmem:[#allocation16 + $0xb8] sm:$0xff]  }
 0x487   :  { %v2373_v3 = vpack.c.bf16 %v2369_v53, %v2369_v53  ;;  %v5348_v7 = vld [vmem:[#allocation23] ss:$16 sps:$4 sm:$0xff]   ;;  %v5350_v8 = vld [vmem:[#allocation23 + $0x4] ss:$16 sps:$4 sm:$0xff]  }
 0x488   :  { %v2374_v13 = vpack.c.bf16 %v2370_v21, %v2370_v21  ;;  %2291 = vmatpush1.bf16.msra.mxu1 %v1896_v10  ;;  %v5356_v9 = vld [vmem:[#allocation23 + $0x24] ss:$16 sps:$4 sm:$0xff]   ;;  %v5354_v10 = vld [vmem:[#allocation23 + $0x20] ss:$16 sps:$4 sm:$0xff]  }
 0x489   :  { %2292 = vmatprep.subr.bf16.mxu1 %v1901_v11  ;;  %v5362_v53 = vld [vmem:[#allocation23 + $0x44] ss:$16 sps:$4 sm:$0xff]   ;;  %v5360_v11 = vld [vmem:[#allocation23 + $0x40] ss:$16 sps:$4 sm:$0xff]  }
 0x48a   :  { %2672 = vmatprep.mubr.bf16.mxu0 %v2374_v13  ;;  %v5366_v21 = vld [vmem:[#allocation23 + $0x60] ss:$16 sps:$4 sm:$0xff]   ;;  %v5374_v13 = vld [vmem:[#allocation23 + $0x84] ss:$16 sps:$4 sm:$0xff]  }
 0x48b   :  { %2673 = vmatmul.mubr.bf16.vlgmr.msra.gmra.mrb[8].mxu0 %v2373_v3  ;;  %v5378_v3 = vld [vmem:[#allocation23 + $0xa0] ss:$16 sps:$4 sm:$0xff]  }
 0x48c   :  { %2293 = vmatpush1.bf16.msra.mxu1 %v1900_v14  ;;  %2780 = vmatpush1.bf16.msra.mxu0 %v5307_v15  ;;  %v5372_v14 = vld [vmem:[#allocation23 + $0x80] ss:$16 sps:$4 sm:$0xff]   ;;  %v5380_v15 = vld [vmem:[#allocation23 + $0xa4] ss:$16 sps:$4 sm:$0xff]  }
 0x48d   :  { %2294 = vmatprep.subr.bf16.mxu1 %v1905_v16  ;;  %2781 = vmatprep.subr.bf16.mxu0 %v5312_v58  ;;  %v5386_v16 = vld [vmem:[#allocation23 + $0xc4] ss:$16 sps:$4 sm:$0xff]   ;;  %v5384_v58 = vld [vmem:[#allocation23 + $0xc0] ss:$16 sps:$4 sm:$0xff]  }
 0x48e   :  { %2811 = vmatprep.mubr.bf16.mxu0 %v6134_v25 }
 0x490   :  { %2295 = vmatpush1.bf16.msra.mxu1 %v1904_v18  ;;  %2782 = vmatpush1.bf16.msra.mxu0 %v5310_v19 }
 0x491   :  { %2296 = vmatprep.subr.bf16.mxu1 %v1909_v20  ;;  %4776 = vmatprep.subr.msk.bf16.mxu0 %vm2772_vm0, %v5313_v23 }
 0x494   :  { %2297 = vmatpush1.bf16.msra.mxu1 %v1908_v37  ;;  %2784 = vmatpush1.bf16.msra.mxu0 %v2774_v30 }
 0x495   :  { %2298 = vmatprep.subr.bf16.mxu1 %v1913_v28  ;;  %3225 = vmatprep.subr.bf16.mxu0 %v5350_v8  ;;  %v2728_v28 = vld [vmem:[#allocation19] sm:$0x3]  ;;  %v5346_v8 = vld [vmem:[%s6746_s20 + $0x78] sm:$0xff]  }
 0x496   :  { %v2737_v30 = vrot.slane %v2728_v28, %v6528_v55 }
 0x497   :  { %4777 = vmatmul.mubr.msk.bf16.vlgmr.msra.gmra.mrb[12].mxu0 %vm2768_vm1, %v2721_v34  ;;  %v2334_v34 = vrot.slane %v6570_v43, %v6531_v56 }
 0x498   :  { %2299 = vmatpush1.bf16.msra.mxu1 %v1912_v54  ;;  %3257 = vmatprep.mubr.bf16.mxu0 %v6134_v25  ;;  %v2356_v54 = vrot.slane %v6572_v46, %v6550_v60 }
 0x499   :  { %2300 = vmatprep.subr.bf16.mxu1 %v1917_v35  ;;  %3226 = vmatpush1.bf16.msra.mxu0 %v5348_v7  ;;  %v5345_v7 = vld [vmem:[%s6746_s20 + $0x30] sm:$0xff]  }
 0x49a   :  { %3227 = vmatprep.subr.bf16.mxu0 %v5356_v9 }
 0x49c   :  { %2301 = vmatpush1.bf16.msra.mxu1 %v1916_v32 }
 0x49d   :  { %2302 = vmatprep.subr.bf16.mxu1 %v1921_v33  ;;  %3228 = vmatpush1.bf16.msra.mxu0 %v5354_v10  ;;  %v5347_v10 = vld [vmem:[%s6746_s20 + $0x38] sm:$0xff]  }
 0x49e   :  { %3229 = vmatprep.subr.bf16.mxu0 %v5362_v53  ;;  %v5353_v53 = vld [vmem:[#allocation23 + $0xc] ss:$16 sps:$4 sm:$0xff]  }
 0x4a0   :  { %2303 = vmatpush1.bf16.msra.mxu1 %v1920_v44 }
 0x4a1   :  { %2304 = vmatprep.subr.bf16.mxu1 %v1925_v29  ;;  %3230 = vmatpush1.bf16.msra.mxu0 %v5360_v11 }
 0x4a2   :  { %3231 = vmatprep.subr.bf16.mxu0 %v5368_v12  ;;  %v5351_v12 = vld [vmem:[#allocation23 + $0x8] ss:$16 sps:$4 sm:$0xff]  }
 0x4a4   :  { %2305 = vmatpush1.bf16.msra.mxu1 %v1924_v39 }
 0x4a5   :  { %2306 = vmatprep.subr.bf16.mxu1 %v1929_v47  ;;  %3232 = vmatpush1.bf16.msra.mxu0 %v5366_v21  ;;  %v5359_v21 = vld [vmem:[#allocation23 + $0x2c] ss:$16 sps:$4 sm:$0xff]  }
 0x4a6   :  { %3233 = vmatprep.subr.bf16.mxu0 %v5374_v13  ;;  %v5357_v13 = vld [vmem:[#allocation23 + $0x28] ss:$16 sps:$4 sm:$0xff]  }
 0x4a8   :  { %2307 = vmatpush1.bf16.msra.mxu1 %v1928_v45 }
 0x4a9   :  { %5049 = vmatprep.subr.bf16.mxu1 %v5316_v48  ;;  %3234 = vmatpush1.bf16.msra.mxu0 %v5372_v14  ;;  %v5365_v14 = vld [vmem:[#allocation23 + $0x4c] ss:$16 sps:$4 sm:$0xff]  }
 0x4aa   :  { %3235 = vmatprep.subr.bf16.mxu0 %v5380_v15  ;;  %v5363_v15 = vld [vmem:[#allocation23 + $0x48] ss:$16 sps:$4 sm:$0xff]  }
 0x4ab   :  { %2309 = vmatmul.mubr.bf16.vlgmr.msra.gmra.mrb[12].mxu1 %v6559_v22  ;;  %v5326_v22 = vld [vmem:[#allocation16 + $0xe8] sm:$0xff]  }
 0x4ac   :  { %5050 = vmatpush3.bf16.msra.mxu1 %v5317_v49 }
 0x4ad   :  { %5051 = vmatprep.subr.bf16.mxu1 %v5318_v50  ;;  %3236 = vmatpush1.bf16.msra.mxu0 %v5378_v3  ;;  %v5333_v50 = vld [vmem:[%s6746_s20] sm:$0xff]  }
 0x4ae   :  { %3237 = vmatprep.subr.bf16.mxu0 %v5386_v16  ;;  %v5371_v3 = vld [vmem:[#allocation23 + $0x6c] ss:$16 sps:$4 sm:$0xff]   ;;  %v5369_v16 = vld [vmem:[#allocation23 + $0x68] ss:$16 sps:$4 sm:$0xff]  }
 0x4b0   :  { %5052 = vmatpush3.bf16.msra.mxu1 %v5319_v5 }
 0x4b1   :  { %5053 = vmatprep.subr.bf16.mxu1 %v5320_v57  ;;  %3238 = vmatpush1.bf16.msra.mxu0 %v5384_v58  ;;  %v5334_v57 = vld [vmem:[%s6746_s20 + $0x48] sm:$0xff]  }
 0x4b2   :  { %v5377_v58 = vld [vmem:[#allocation23 + $0x8c] ss:$16 sps:$4 sm:$0xff]  }
 0x4b4   :  { %5054 = vmatpush3.bf16.msra.mxu1 %v5321_v59  ;;  %v5335_v59 = vld [vmem:[%s6746_s20 + $0x8] sm:$0xff]  }
 0x4b5   :  { %5055 = vmatprep.subr.bf16.mxu1 %v5322_v61  ;;  %v5336_v61 = vld [vmem:[%s6746_s20 + $0x50] sm:$0xff]  }
 0x4b8   :  { %5056 = vmatpush3.bf16.msra.mxu1 %v5323_v62  ;;  %v5337_v62 = vld [vmem:[%s6746_s20 + $0x10] sm:$0xff]  }
 0x4b9   :  { %5057 = vmatprep.subr.bf16.mxu1 %v5324_v42  ;;  %v5338_v42 = vld [vmem:[%s6746_s20 + $0x58] sm:$0xff]  }
 0x4bc   :  { %5058 = vmatpush3.bf16.msra.mxu1 %v5325_v63  ;;  %v5339_v63 = vld [vmem:[%s6746_s20 + $0x18] sm:$0xff]  }
 0x4bd   :  { %5059 = vmatprep.subr.bf16.mxu1 %v5326_v22  ;;  %v5340_v22 = vld [vmem:[%s6746_s20 + $0x60] sm:$0xff]  }
 0x4c0   :  { %5060 = vmatpush3.bf16.msra.mxu1 %v5327_v0  ;;  %v5341_v0 = vld [vmem:[%s6746_s20 + $0x20] sm:$0xff]  }
 0x4c1   :  { %5061 = vmatprep.subr.bf16.mxu1 %v5328_v1  ;;  %v5342_v1 = vld [vmem:[%s6746_s20 + $0x68] sm:$0xff]  }
 0x4c4   :  { %5062 = vmatpush3.bf16.msra.mxu1 %v5329_v2  ;;  %v2733_v2 = vrot.slane %v2728_v28, %v6523_v51  ;;  %v5393_v28 = vld [vmem:[#allocation23 + $0xe8] ss:$16 sps:$4 sm:$0xff]  }
 0x4c5   :  { %5063 = vmatprep.subr.bf16.mxu1 %v5330_v4  ;;  %v5343_v4 = vld [vmem:[%s6746_s20 + $0x28] sm:$0xff]  }
 0x4c8   :  { %5064 = vmatpush3.bf16.msra.mxu1 %v5331_v27  ;;  %v5344_v27 = vld [vmem:[%s6746_s20 + $0x70] sm:$0xff]  }
 0x4c9   :  { %5071 = vmatprep.subr.bf16.mxu1 %v5332_v6 }
 0x55e   :  { %v5043_v17 = vpop.f32.mrb[8].mxu0 }
 0x55f   :  { %v5044_v18 = vpop.f32.mrb[9].mxu0 }
 0x560   :  { %v6594_v38 = vadd.f32 %v5044_v18, %v5043_v17  ;;  %v5046_v19 = vpop.f32.mrb[10].mxu0  ;;  %v5375_v17 = vld [vmem:[#allocation23 + $0x88] ss:$16 sps:$4 sm:$0xff]   ;;  %v5383_v18 = vld [vmem:[#allocation23 + $0xac] ss:$16 sps:$4 sm:$0xff]  }
 0x561   :  { %v5047_v20 = vpop.f32.mrb[11].mxu0  ;;  %v5381_v19 = vld [vmem:[#allocation23 + $0xa8] ss:$16 sps:$4 sm:$0xff]  }
 0x562   :  { %v5389_v20 = vld [vmem:[#allocation23 + $0xcc] ss:$16 sps:$4 sm:$0xff]  }
 0x56a   :  { %v2813_v23 = vpop.f32.mrb[12].mxu0 }
 0x56b   :  { %v2815_v24 = vpop.f32.mrb[13].mxu0  ;;  %v2814_v6 = vadd.f32 %v2813_v23, %v2733_v2  ;;  %v5387_v23 = vld [vmem:[#allocation23 + $0xc8] ss:$16 sps:$4 sm:$0xff]   ;;  %v5426_v2 = vld [vmem:[#allocation22 + $0xa0] ss:$16 sps:$4 sm:$0xff]  }
 0x56c   :  { %v2817_v37 = vpop.f32.mrb[14].mxu0  ;;  %v2816_v32 = vadd.f32 %v2815_v24, %v2737_v30  ;;  %v5392_v24 = vld [vmem:[#allocation23 + $0xe4] ss:$16 sps:$4 sm:$0xff]  }
 0x56d   :  { %v2818_v26 = vpop.f32.mrb[15].mxu0  ;;  %v2820_v9 = vmax.f32 %v2814_v6, 0.0  ;;  %v5395_v37 = vld [vmem:[#allocation23 + $0xec] ss:$16 sps:$4 sm:$0xff]   ;;  %3239 = vmatprep.subr.bf16.mxu0 %v5392_v24  ;;  %v5398_v30 = vld [vmem:[#allocation22 + $0x4] ss:$16 sps:$4 sm:$0xff]  }
 0x56e   :  { %v2821_v43 = vmax.f32 %v2816_v32, 0.0  ;;  %v5390_v26 = vld [vmem:[#allocation23 + $0xe0] ss:$16 sps:$4 sm:$0xff]   ;;  %v5437_v6 = vld [vmem:[#allocation22 + $0xcc] ss:$16 sps:$4 sm:$0xff]  }
 0x56f   :  { %v2822_v11 = vpack.c.bf16 %v2820_v9, %v2820_v9  ;;  %3240 = vmatpush1.bf16.msra.mxu0 %v5390_v26  ;;  %v5440_v9 = vld [vmem:[#allocation22 + $0xe4] ss:$16 sps:$4 sm:$0xff]   ;;  %v5453_v24 = vld [vmem:[#allocation25 + $0x28] ss:$16 sps:$4 sm:$0xff]   ;;  %v5461_v26 = vld [vmem:[#allocation25 + $0x4c] ss:$16 sps:$4 sm:$0xff]  }
 0x570   :  { %v2823_v46 = vpack.c.bf16 %v2821_v43, %v2821_v43  ;;  %3467 = vmatprep.subr.bf16.mxu0 %v5398_v30  ;;  %v5407_v43 = vld [vmem:[#allocation22 + $0x2c] ss:$16 sps:$4 sm:$0xff]   ;;  %v5464_v30 = vld [vmem:[#allocation25 + $0x64] ss:$16 sps:$4 sm:$0xff]  }
 0x57e   :  { %v2310_v35 = vpop.f32.mrb[12].mxu1 }
 0x57f   :  { %v2341_v33 = vmul.f32 %v2330_v31, %v2310_v35  ;;  %v2312_v40 = vpop.f32.mrb[13].mxu1  ;;  %v5401_v31 = vld [vmem:[#allocation22 + $0xc] ss:$16 sps:$4 sm:$0xff]  }
 0x580   :  { %v2342_v44 = vmul.f32 %v2334_v34, %v2312_v40  ;;  %v2314_v29 = vpop.f32.mrb[14].mxu1  ;;  %v4737_v34 = vld [vmem:[#allocation17] ss:$0 sm:$0xff] }
 0x581   :  { %v2367_v36 = vadd.f32 %v2356_v54, %v2341_v33  ;;  %v2315_v39 = vpop.f32.mrb[15].mxu1  ;;  %v5396_v29 = vld [vmem:[#allocation22] ss:$16 sps:$4 sm:$0xff]  }
 0x582   :  { %v2368_v47 = vadd.f32 %v2360_v41, %v2342_v44  ;;  %v2675_v41 = vadd.f32 %v6594_v38, %v4737_v34  ;;  %v5408_v38 = vld [vmem:[#allocation22 + $0x40] ss:$16 sps:$4 sm:$0xff]  }
 0x583   :  { %v2371_v45 = vmax.f32 %v2367_v36, 0.0  ;;  %v5399_v36 = vld [vmem:[#allocation22 + $0x8] ss:$16 sps:$4 sm:$0xff]   ;;  %v5462_v34 = vld [vmem:[#allocation25 + $0x60] ss:$16 sps:$4 sm:$0xff]  }
 0x584   :  { %v2372_v48 = vmax.f32 %v2368_v47, 0.0  ;;  %v5404_v47 = vld [vmem:[#allocation22 + $0x24] ss:$16 sps:$4 sm:$0xff]  }
 0x585   :  { %v2375_v5 = vpack.c.bf16 %v2371_v45, %v2371_v45  ;;  %v5402_v45 = vld [vmem:[#allocation22 + $0x20] ss:$16 sps:$4 sm:$0xff]  }
 0x586   :  { %v2376_v49 = vpack.c.bf16 %v2372_v48, %v2372_v48  ;;  %v5405_v48 = vld [vmem:[#allocation22 + $0x28] ss:$16 sps:$4 sm:$0xff]  }
 0x588   :  { %2712 = vmatprep.mubr.bf16.mxu1 %v2376_v49  ;;  %v5410_v49 = vld [vmem:[#allocation22 + $0x44] ss:$16 sps:$4 sm:$0xff]  }
 0x589   :  { %2713 = vmatmul.mubr.bf16.vlgmr.msra.gmra.mrb[16].mxu1 %v2375_v5  ;;  %v5416_v5 = vld [vmem:[#allocation22 + $0x64] ss:$16 sps:$4 sm:$0xff]  }
 0x58a   :  { %5072 = vmatpush3.bf16.msra.mxu1 %v5333_v50  ;;  %2991 = vmatprep.mubr.bf16.mxu1 %v2823_v46  ;;  %v5413_v50 = vld [vmem:[#allocation22 + $0x4c] ss:$16 sps:$4 sm:$0xff]   ;;  %v5411_v46 = vld [vmem:[#allocation22 + $0x48] ss:$16 sps:$4 sm:$0xff]  }
 0x58b   :  { %5073 = vmatprep.subr.bf16.mxu1 %v5334_v57  ;;  %v5419_v57 = vld [vmem:[#allocation22 + $0x6c] ss:$16 sps:$4 sm:$0xff]  }
 0x58e   :  { %5074 = vmatpush3.bf16.msra.mxu1 %v5335_v59  ;;  %v5414_v59 = vld [vmem:[#allocation22 + $0x60] ss:$16 sps:$4 sm:$0xff]  }
 0x58f   :  { %5075 = vmatprep.subr.bf16.mxu1 %v5336_v61  ;;  %v5417_v61 = vld [vmem:[#allocation22 + $0x68] ss:$16 sps:$4 sm:$0xff]  }
 0x592   :  { %5076 = vmatpush3.bf16.msra.mxu1 %v5337_v62  ;;  %v5422_v62 = vld [vmem:[#allocation22 + $0x84] ss:$16 sps:$4 sm:$0xff]  }
 0x593   :  { %5077 = vmatprep.subr.bf16.mxu1 %v5338_v42  ;;  %v5425_v42 = vld [vmem:[#allocation22 + $0x8c] ss:$16 sps:$4 sm:$0xff]  }
 0x596   :  { %5078 = vmatpush3.bf16.msra.mxu1 %v5339_v63  ;;  %v5420_v63 = vld [vmem:[#allocation22 + $0x80] ss:$16 sps:$4 sm:$0xff]  }
 0x597   :  { %5079 = vmatprep.subr.bf16.mxu1 %v5340_v22  ;;  %v5423_v22 = vld [vmem:[#allocation22 + $0x88] ss:$16 sps:$4 sm:$0xff]  }
 0x59a   :  { %5080 = vmatpush3.bf16.msra.mxu1 %v5341_v0  ;;  %v5428_v0 = vld [vmem:[#allocation22 + $0xa4] ss:$16 sps:$4 sm:$0xff]  }
 0x59b   :  { %5081 = vmatprep.subr.bf16.mxu1 %v5342_v1  ;;  %v5431_v1 = vld [vmem:[#allocation22 + $0xac] ss:$16 sps:$4 sm:$0xff]  }
 0x59e   :  { %5082 = vmatpush3.bf16.msra.mxu1 %v5343_v4  ;;  %v5429_v4 = vld [vmem:[#allocation22 + $0xa8] ss:$16 sps:$4 sm:$0xff]  }
 0x59f   :  { %5083 = vmatprep.subr.bf16.mxu1 %v5344_v27  ;;  %v5434_v27 = vld [vmem:[#allocation22 + $0xc4] ss:$16 sps:$4 sm:$0xff]  }
 0x5a2   :  { %5084 = vmatpush3.bf16.msra.mxu1 %v5345_v7  ;;  %v5432_v7 = vld [vmem:[#allocation22 + $0xc0] ss:$16 sps:$4 sm:$0xff]  }
 0x5a3   :  { %5085 = vmatprep.subr.bf16.mxu1 %v5346_v8  ;;  %v5435_v8 = vld [vmem:[#allocation22 + $0xc8] ss:$16 sps:$4 sm:$0xff]  }
 0x5a6   :  { %5086 = vmatpush3.bf16.msra.mxu1 %v5347_v10  ;;  %v5443_v10 = vld [vmem:[#allocation22 + $0xec] ss:$16 sps:$4 sm:$0xff]  }
 0x5a7   :  { %3266 = vmatprep.subr.bf16.mxu1 %v5353_v53 }
 0x5a9   :  { %2992 = vmatmul.mubr.bf16.vlgmr.msra.gmra.mrb[20].mxu1 %v2822_v11  ;;  %v5438_v11 = vld [vmem:[#allocation22 + $0xe0] ss:$16 sps:$4 sm:$0xff]  }
 0x5aa   :  { %3267 = vmatpush1.bf16.msra.mxu1 %v5351_v12  ;;  %3298 = vmatprep.mubr.bf16.mxu1 %v6134_v25  ;;  %v5441_v12 = vld [vmem:[#allocation22 + $0xe8] ss:$16 sps:$4 sm:$0xff]  }
 0x5ab   :  { %3268 = vmatprep.subr.bf16.mxu1 %v5359_v21 }
 0x5ae   :  { %3269 = vmatpush1.bf16.msra.mxu1 %v5357_v13  ;;  %v5446_v13 = vld [vmem:[#allocation25 + $0x4] ss:$16 sps:$4 sm:$0xff]  }
 0x5af   :  { %3270 = vmatprep.subr.bf16.mxu1 %v5365_v14  ;;  %v5449_v14 = vld [vmem:[#allocation25 + $0xc] ss:$16 sps:$4 sm:$0xff]  }
 0x5b2   :  { %3271 = vmatpush1.bf16.msra.mxu1 %v5363_v15 }
 0x5b3   :  { %3272 = vmatprep.subr.bf16.mxu1 %v5371_v3 }
 0x5b6   :  { %3273 = vmatpush1.bf16.msra.mxu1 %v5369_v16 }
 0x5b7   :  { %3274 = vmatprep.subr.bf16.mxu1 %v5377_v58  ;;  %v5444_v58 = vld [vmem:[#allocation25] ss:$16 sps:$4 sm:$0xff]  }
 0x5ba   :  { %3275 = vmatpush1.bf16.msra.mxu1 %v5375_v17  ;;  %v5447_v17 = vld [vmem:[#allocation25 + $0x8] ss:$16 sps:$4 sm:$0xff]  }
 0x5bb   :  { %3276 = vmatprep.subr.bf16.mxu1 %v5383_v18  ;;  %v2999_v18 = vpack.c.bf16 %v6582_v52, %v6582_v52  ;;  %v5456_v52 = vld [vmem:[#allocation25 + $0x40] ss:$16 sps:$4 sm:$0xff]  }
 0x5be   :  { %3277 = vmatpush1.bf16.msra.mxu1 %v5381_v19  ;;  %v5452_v19 = vld [vmem:[#allocation25 + $0x24] ss:$16 sps:$4 sm:$0xff]  }
 0x5bf   :  { %3278 = vmatprep.subr.bf16.mxu1 %v5389_v20  ;;  %v5455_v20 = vld [vmem:[#allocation25 + $0x2c] ss:$16 sps:$4 sm:$0xff]  }
 0x5c2   :  { %3279 = vmatpush1.bf16.msra.mxu1 %v5387_v23  ;;  %v5450_v23 = vld [vmem:[#allocation25 + $0x20] ss:$16 sps:$4 sm:$0xff]  }
 0x5c3   :  { %3280 = vmatprep.subr.bf16.mxu1 %v5395_v37  ;;  %v5458_v37 = vld [vmem:[#allocation25 + $0x44] ss:$16 sps:$4 sm:$0xff]  }
 0x5c6   :  { %3281 = vmatpush1.bf16.msra.mxu1 %v5393_v28  ;;  %v5459_v28 = vld [vmem:[#allocation25 + $0x48] ss:$16 sps:$4 sm:$0xff]  }
 0x5c7   :  { %3508 = vmatprep.subr.bf16.mxu1 %v5401_v31  ;;  %v5467_v31 = vld [vmem:[#allocation25 + $0x6c] ss:$16 sps:$4 sm:$0xff]  }
 0x65c   :  { %v5065_v54 = vpop.f32.mrb[16].mxu1 }
 0x65d   :  { %v5066_v35 = vpop.f32.mrb[17].mxu1 }
 0x65e   :  { %v5067_v32 = vadd.f32 %v5066_v35, %v5065_v54  ;;  %v5068_v33 = vpop.f32.mrb[18].mxu1  ;;  %v5465_v54 = vld [vmem:[#allocation25 + $0x68] ss:$16 sps:$4 sm:$0xff]   ;;  %v5470_v35 = vld [vmem:[#allocation25 + $0x84] ss:$16 sps:$4 sm:$0xff]  }
 0x65f   :  { %v5069_v40 = vpop.f32.mrb[19].mxu1  ;;  %v5476_v33 = vld [vmem:[#allocation25 + $0xa4] ss:$16 sps:$4 sm:$0xff]  }
 0x660   :  { %v2715_v44 = vadd.f32 %v5067_v32, %v2675_v41  ;;  %v5473_v41 = vld [vmem:[#allocation25 + $0x8c] ss:$16 sps:$4 sm:$0xff]   ;;  %v5468_v32 = vld [vmem:[#allocation25 + $0x80] ss:$16 sps:$4 sm:$0xff]  }
 0x661   :  { %v5479_v40 = vld [vmem:[#allocation25 + $0xac] ss:$16 sps:$4 sm:$0xff]  }
 0x662   :  { %v3032_v39 = vpack.c.bf16 %v2715_v44, %v2715_v44  ;;  %v5474_v44 = vld [vmem:[#allocation25 + $0xa0] ss:$16 sps:$4 sm:$0xff]  }
 0x664   :  { %3258 = vmatmul.mubr.bf16.vlgmr.msra.gmra.mrb[16].mxu0 %v3032_v39  ;;  %3299 = vmatmul.mubr.bf16.vlgmr.msra.gmra.mrb[24].mxu1 %v3032_v39  ;;  %v5485_v39 = vld [vmem:[#allocation25 + $0xcc] ss:$16 sps:$4 sm:$0xff]  }
 0x665   :  { %3468 = vmatpush1.bf16.msra.mxu0 %v5396_v29  ;;  %3509 = vmatpush1.bf16.msra.mxu1 %v5399_v36  ;;  %v5477_v29 = vld [vmem:[#allocation25 + $0xa8] ss:$16 sps:$4 sm:$0xff]   ;;  %v5482_v36 = vld [vmem:[#allocation25 + $0xc4] ss:$16 sps:$4 sm:$0xff]  }
 0x666   :  { %3469 = vmatprep.subr.bf16.mxu0 %v5404_v47  ;;  %3510 = vmatprep.subr.bf16.mxu1 %v5407_v43  ;;  %v5480_v47 = vld [vmem:[#allocation25 + $0xc0] ss:$16 sps:$4 sm:$0xff]   ;;  %v5483_v43 = vld [vmem:[#allocation25 + $0xc8] ss:$16 sps:$4 sm:$0xff]  }
 0x667   :  { %3499 = vmatprep.mubr.bf16.mxu0 %v6134_v25  ;;  %3540 = vmatprep.mubr.bf16.mxu1 %v6134_v25 }
 0x669   :  { %3470 = vmatpush1.bf16.msra.mxu0 %v5402_v45  ;;  %3511 = vmatpush1.bf16.msra.mxu1 %v5405_v48  ;;  %v5488_v45 = vld [vmem:[#allocation25 + $0xe4] ss:$16 sps:$4 sm:$0xff]   ;;  %v5491_v48 = vld [vmem:[#allocation25 + $0xec] ss:$16 sps:$4 sm:$0xff]  }
 0x66a   :  { %3471 = vmatprep.subr.bf16.mxu0 %v5410_v49  ;;  %3512 = vmatprep.subr.bf16.mxu1 %v5413_v50  ;;  %v4778_v49 = vld [vmem:[#allocation20] ss:$0 sm:$0xff]  ;;  %v5486_v50 = vld [vmem:[#allocation25 + $0xe0] ss:$16 sps:$4 sm:$0xff]  }
 0x66d   :  { %3472 = vmatpush1.bf16.msra.mxu0 %v5408_v38  ;;  %3513 = vmatpush1.bf16.msra.mxu1 %v5411_v46  ;;  %v5489_v38 = vld [vmem:[#allocation25 + $0xe8] ss:$16 sps:$4 sm:$0xff]  }
 0x66e   :  { %3473 = vmatprep.subr.bf16.mxu0 %v5416_v5  ;;  %3514 = vmatprep.subr.bf16.mxu1 %v5419_v57  ;;  %v5492_v57 = vld [vmem:[%s6747_s24] ss:$8 sps:$4 sm:$0xff]  }
 0x671   :  { %3474 = vmatpush1.bf16.msra.mxu0 %v5414_v59  ;;  %3515 = vmatpush1.bf16.msra.mxu1 %v5417_v61  ;;  %v5494_v59 = vld [vmem:[%s6747_s24 + $0x4] ss:$8 sps:$4 sm:$0xff]   ;;  %v5497_v61 = vld [vmem:[%s6747_s24 + $0x14] ss:$8 sps:$4 sm:$0xff]  }
 0x672   :  { %3475 = vmatprep.subr.bf16.mxu0 %v5422_v62  ;;  %3516 = vmatprep.subr.bf16.mxu1 %v5425_v42  ;;  %v5495_v62 = vld [vmem:[%s6747_s24 + $0x10] ss:$8 sps:$4 sm:$0xff]   ;;  %v5500_v42 = vld [vmem:[%s6747_s24 + $0x24] ss:$8 sps:$4 sm:$0xff]  }
 0x675   :  { %3476 = vmatpush1.bf16.msra.mxu0 %v5420_v63  ;;  %3517 = vmatpush1.bf16.msra.mxu1 %v5423_v22  ;;  %v5498_v63 = vld [vmem:[%s6747_s24 + $0x20] ss:$8 sps:$4 sm:$0xff]   ;;  %v5503_v22 = vld [vmem:[%s6747_s24 + $0x34] ss:$8 sps:$4 sm:$0xff]  }
 0x676   :  { %3477 = vmatprep.subr.bf16.mxu0 %v5428_v0  ;;  %3518 = vmatprep.subr.bf16.mxu1 %v5431_v1  ;;  %v5501_v0 = vld [vmem:[%s6747_s24 + $0x30] ss:$8 sps:$4 sm:$0xff]   ;;  %v5506_v1 = vld [vmem:[%s6747_s24 + $0x44] ss:$8 sps:$4 sm:$0xff]  }
 0x679   :  { %3478 = vmatpush1.bf16.msra.mxu0 %v5426_v2  ;;  %3519 = vmatpush1.bf16.msra.mxu1 %v5429_v4  ;;  %v5504_v2 = vld [vmem:[%s6747_s24 + $0x40] ss:$8 sps:$4 sm:$0xff]   ;;  %v5509_v4 = vld [vmem:[%s6747_s24 + $0x54] ss:$8 sps:$4 sm:$0xff]  }
 0x67a   :  { %3479 = vmatprep.subr.bf16.mxu0 %v5434_v27  ;;  %3520 = vmatprep.subr.bf16.mxu1 %v5437_v6  ;;  %v5507_v27 = vld [vmem:[%s6747_s24 + $0x50] ss:$8 sps:$4 sm:$0xff]   ;;  %v5512_v6 = vld [vmem:[%s6747_s24 + $0x64] ss:$8 sps:$4 sm:$0xff]  }
 0x67c   :  { %v5087_v53 = vpop.f32.mrb[20].mxu1 }
 0x67d   :  { %3480 = vmatpush1.bf16.msra.mxu0 %v5432_v7  ;;  %3521 = vmatpush1.bf16.msra.mxu1 %v5435_v8  ;;  %v5088_v21 = vpop.f32.mrb[21].mxu1  ;;  %v5510_v7 = vld [vmem:[%s6747_s24 + $0x60] ss:$8 sps:$4 sm:$0xff]   ;;  %v5513_v8 = vld [vmem:[%s6747_s24 + $0x70] ss:$8 sps:$4 sm:$0xff]  }
 0x67e   :  { %3481 = vmatprep.subr.bf16.mxu0 %v5440_v9  ;;  %3522 = vmatprep.subr.bf16.mxu1 %v5443_v10  ;;  %v6625_v15 = vadd.f32 %v5088_v21, %v5087_v53  ;;  %v5090_v3 = vpop.f32.mrb[22].mxu1  ;;  %v5515_v9 = vld [vmem:[%s6747_s24 + $0x74] ss:$8 sps:$4 sm:$0xff]   ;;  %v5518_v10 = vld [vmem:[%s6747_s24 + $0x84] ss:$8 sps:$4 sm:$0xff]  }
 0x67f   :  { %v5091_v16 = vpop.f32.mrb[23].mxu1  ;;  %v5516_v53 = vld [vmem:[%s6747_s24 + $0x80] ss:$8 sps:$4 sm:$0xff]   ;;  %v5524_v21 = vld [vmem:[%s6747_s24 + $0xa4] ss:$8 sps:$4 sm:$0xff]  }
 0x680   :  { %v2994_v46 = vadd.f32 %v6625_v15, %v4778_v49  ;;  %v5525_v15 = vld [vmem:[%s6747_s24 + $0xb0] ss:$8 sps:$4 sm:$0xff]   ;;  %v5530_v3 = vld [vmem:[%s6747_s24 + $0xc4] ss:$8 sps:$4 sm:$0xff]   ;;  %v5528_v16 = vld [vmem:[%s6747_s24 + $0xc0] ss:$8 sps:$4 sm:$0xff]  }
 0x681   :  { %3482 = vmatpush1.bf16.msra.mxu0 %v5438_v11  ;;  %3523 = vmatpush1.bf16.msra.mxu1 %v5441_v12  ;;  %v5521_v11 = vld [vmem:[%s6747_s24 + $0x94] ss:$8 sps:$4 sm:$0xff]   ;;  %v5519_v12 = vld [vmem:[%s6747_s24 + $0x90] ss:$8 sps:$4 sm:$0xff]  }
 0x682   :  { %3742 = vmatprep.subr.bf16.mxu0 %v5446_v13  ;;  %3783 = vmatprep.subr.bf16.mxu1 %v5449_v14  ;;  %v3549_v5 = vpack.c.bf16 %v2994_v46, %v2994_v46  ;;  %v5522_v13 = vld [vmem:[%s6747_s24 + $0xa0] ss:$8 sps:$4 sm:$0xff]   ;;  %v5527_v14 = vld [vmem:[%s6747_s24 + $0xb4] ss:$8 sps:$4 sm:$0xff]  }
 0x684   :  { %3500 = vmatmul.mubr.bf16.vlgmr.msra.gmra.mrb[20].mxu0 %v2999_v18  ;;  %3541 = vmatmul.mubr.bf16.vlgmr.msra.gmra.mrb[28].mxu1 %v2999_v18  ;;  %v5536_v18 = vld [vmem:[%s6747_s24 + $0xe4] ss:$8 sps:$4 sm:$0xff]  }
 0x685   :  { %3743 = vmatpush1.bf16.msra.mxu0 %v5444_v58  ;;  %3784 = vmatpush1.bf16.msra.mxu1 %v5447_v17  ;;  %v5533_v58 = vld [vmem:[%s6747_s24 + $0xd4] ss:$8 sps:$4 sm:$0xff]   ;;  %v5531_v17 = vld [vmem:[%s6747_s24 + $0xd0] ss:$8 sps:$4 sm:$0xff]  }
 0x686   :  { %3744 = vmatprep.subr.bf16.mxu0 %v5452_v19  ;;  %3785 = vmatprep.subr.bf16.mxu1 %v5455_v20  ;;  %v5534_v19 = vld [vmem:[%s6747_s24 + $0xe0] ss:$8 sps:$4 sm:$0xff]   ;;  %v5539_v20 = vld [vmem:[%s6747_s24 + $0xf4] ss:$8 sps:$4 sm:$0xff]  }
 0x687   :  { %3774 = vmatprep.mubr.bf16.mxu0 %v6134_v25  ;;  %3815 = vmatprep.mubr.bf16.mxu1 %v6134_v25  ;;  %v5471_v25 = vld [vmem:[#allocation25 + $0x88] ss:$16 sps:$4 sm:$0xff]  }
 0x689   :  { %3745 = vmatpush1.bf16.msra.mxu0 %v5450_v23  ;;  %3786 = vmatpush1.bf16.msra.mxu1 %v5453_v24  ;;  %v5537_v23 = vld [vmem:[%s6747_s24 + $0xf0] ss:$8 sps:$4 sm:$0xff]   ;;  %v5542_v24 = vld [vmem:[%s6747_s24 + $0x104] ss:$8 sps:$4 sm:$0xff]  }
 0x68a   :  { %3746 = vmatprep.subr.bf16.mxu0 %v5458_v37  ;;  %3787 = vmatprep.subr.bf16.mxu1 %v5461_v26 }
 0x68d   :  { %3747 = vmatpush1.bf16.msra.mxu0 %v5456_v52  ;;  %3788 = vmatpush1.bf16.msra.mxu1 %v5459_v28 }
 0x68e   :  { %3748 = vmatprep.subr.bf16.mxu0 %v5464_v30  ;;  %3789 = vmatprep.subr.bf16.mxu1 %v5467_v31 }
 0x691   :  { %3749 = vmatpush1.bf16.msra.mxu0 %v5462_v34  ;;  %3790 = vmatpush1.bf16.msra.mxu1 %v5465_v54 }
 0x692   :  { %3750 = vmatprep.subr.bf16.mxu0 %v5470_v35  ;;  %3791 = vmatprep.subr.bf16.mxu1 %v5473_v41  ;;  %v5588_v35 = vld [vmem:[#allocation29 + $0x40] sm:$0xff]  }
 0x693   :  { %v5589_v41 = vld [vmem:[#allocation29] sm:$0xff]  }
 0x695   :  { %3751 = vmatpush1.bf16.msra.mxu0 %v5468_v32  ;;  %3792 = vmatpush1.bf16.msra.mxu1 %v5471_v25  ;;  %v5590_v32 = vld [vmem:[#allocation29 + $0x48] sm:$0xff]  }
 0x696   :  { %3752 = vmatprep.subr.bf16.mxu0 %v5476_v33  ;;  %3793 = vmatprep.subr.bf16.mxu1 %v5479_v40  ;;  %v5591_v25 = vld [vmem:[#allocation29 + $0x8] sm:$0xff]   ;;  %v5592_v33 = vld [vmem:[#allocation29 + $0x50] sm:$0xff]  }
 0x697   :  { %v5593_v40 = vld [vmem:[#allocation29 + $0x10] sm:$0xff]  }
 0x699   :  { %3753 = vmatpush1.bf16.msra.mxu0 %v5474_v44  ;;  %3794 = vmatpush1.bf16.msra.mxu1 %v5477_v29  ;;  %v5594_v44 = vld [vmem:[#allocation29 + $0x58] sm:$0xff]  }
 0x69a   :  { %3754 = vmatprep.subr.bf16.mxu0 %v5482_v36  ;;  %3795 = vmatprep.subr.bf16.mxu1 %v5485_v39  ;;  %v5595_v29 = vld [vmem:[#allocation29 + $0x18] sm:$0xff]   ;;  %v5596_v36 = vld [vmem:[#allocation29 + $0x60] sm:$0xff]  }
 0x69b   :  { %v5597_v39 = vld [vmem:[#allocation29 + $0x20] sm:$0xff]  }
 0x69d   :  { %3755 = vmatpush1.bf16.msra.mxu0 %v5480_v47  ;;  %3796 = vmatpush1.bf16.msra.mxu1 %v5483_v43  ;;  %v5598_v47 = vld [vmem:[#allocation29 + $0x68] sm:$0xff]  }
 0x69e   :  { %3756 = vmatprep.subr.bf16.mxu0 %v5488_v45  ;;  %3797 = vmatprep.subr.bf16.mxu1 %v5491_v48  ;;  %v5599_v43 = vld [vmem:[#allocation29 + $0x28] sm:$0xff]  }
 0x6a1   :  { %3757 = vmatpush1.bf16.msra.mxu0 %v5486_v50  ;;  %3798 = vmatpush1.bf16.msra.mxu1 %v5489_v38 }
 0x6a2   :  { %4258 = vmatprep.subr.bf16.mxu0 %v5494_v59  ;;  %5093 = vmatprep.subr.bf16.mxu1 %v5588_v35  ;;  %v5560_v35 = vld [vmem:[%s6747_s24 + $0x164] ss:$8 sps:$4 sm:$0xff]  }
 0x6a4   :  { %3775 = vmatmul.mubr.bf16.vlgmr.msra.gmra.mrb[24].mxu0 %v3549_v5  ;;  %3816 = vmatmul.mubr.bf16.vlgmr.msra.gmra.mrb[32].mxu1 %v3549_v5 }
 0x6a5   :  { %4259 = vmatpush1.bf16.msra.mxu0 %v5492_v57  ;;  %5094 = vmatpush3.bf16.msra.mxu1 %v5589_v41  ;;  %v5558_v41 = vld [vmem:[%s6747_s24 + $0x160] ss:$8 sps:$4 sm:$0xff]  }
 0x6a6   :  { %4260 = vmatprep.subr.bf16.mxu0 %v5497_v61  ;;  %5095 = vmatprep.subr.bf16.mxu1 %v5590_v32  ;;  %v5563_v32 = vld [vmem:[%s6747_s24 + $0x174] ss:$8 sps:$4 sm:$0xff]  }
 0x6a9   :  { %4261 = vmatpush1.bf16.msra.mxu0 %v5495_v62  ;;  %5096 = vmatpush3.bf16.msra.mxu1 %v5591_v25  ;;  %v5561_v25 = vld [vmem:[%s6747_s24 + $0x170] ss:$8 sps:$4 sm:$0xff]  }
 0x6aa   :  { %4262 = vmatprep.subr.bf16.mxu0 %v5500_v42  ;;  %5097 = vmatprep.subr.bf16.mxu1 %v5592_v33  ;;  %v5566_v33 = vld [vmem:[%s6747_s24 + $0x184] ss:$8 sps:$4 sm:$0xff]  }
 0x6ad   :  { %4263 = vmatpush1.bf16.msra.mxu0 %v5498_v63  ;;  %5098 = vmatpush3.bf16.msra.mxu1 %v5593_v40  ;;  %v3828_v63 = vld [vmem:[#allocation26] sm:$0xf]  ;;  %v5564_v40 = vld [vmem:[%s6747_s24 + $0x180] ss:$8 sps:$4 sm:$0xff]  }
 0x6ae   :  { %4264 = vmatprep.subr.bf16.mxu0 %v5503_v22  ;;  %5099 = vmatprep.subr.bf16.mxu1 %v5594_v44  ;;  %v3833_v22 = vrot.slane %v3828_v63, %v6523_v51  ;;  %v5569_v44 = vld [vmem:[%s6747_s24 + $0x194] ss:$8 sps:$4 sm:$0xff]  }
 0x6b1   :  { %4265 = vmatpush1.bf16.msra.mxu0 %v5501_v0  ;;  %5100 = vmatpush3.bf16.msra.mxu1 %v5595_v29  ;;  %v3841_v0 = vrot.slane %v3828_v63, %v6550_v60  ;;  %v5567_v29 = vld [vmem:[%s6747_s24 + $0x190] ss:$8 sps:$4 sm:$0xff]  }
 0x6b2   :  { %4266 = vmatprep.subr.bf16.mxu0 %v5506_v1  ;;  %5101 = vmatprep.subr.bf16.mxu1 %v5596_v36  ;;  %v5572_v36 = vld [vmem:[%s6747_s24 + $0x1a4] ss:$8 sps:$4 sm:$0xff]  }
 0x6b5   :  { %4267 = vmatpush1.bf16.msra.mxu0 %v5504_v2  ;;  %5102 = vmatpush3.bf16.msra.mxu1 %v5597_v39  ;;  %v5570_v39 = vld [vmem:[%s6747_s24 + $0x1a0] ss:$8 sps:$4 sm:$0xff]  }
 0x6b6   :  { %4268 = vmatprep.subr.bf16.mxu0 %v5509_v4  ;;  %5103 = vmatprep.subr.bf16.mxu1 %v5598_v47  ;;  %v3837_v4 = vrot.slane %v3828_v63, %v6528_v55  ;;  %v5575_v47 = vld [vmem:[%s6747_s24 + $0x1b4] ss:$8 sps:$4 sm:$0xff]  }
 0x6b9   :  { %4269 = vmatpush1.bf16.msra.mxu0 %v5507_v27  ;;  %5104 = vmatpush3.bf16.msra.mxu1 %v5599_v43  ;;  %v3845_v27 = vrot.slane %v3828_v63, %v6531_v56  ;;  %v5573_v43 = vld [vmem:[%s6747_s24 + $0x1b0] ss:$8 sps:$4 sm:$0xff]  }
 0x6ba   :  { %4270 = vmatprep.subr.bf16.mxu0 %v5512_v6  ;;  %v5602_v63 = vld [vmem:[#allocation29 + $0x78] sm:$0xff]  }
 0x6bd   :  { %4271 = vmatpush1.bf16.msra.mxu0 %v5510_v7 }
 0x6be   :  { %4272 = vmatprep.subr.bf16.mxu0 %v5515_v9 }
 0x6c1   :  { %4273 = vmatpush1.bf16.msra.mxu0 %v5513_v8 }
 0x6c2   :  { %4274 = vmatprep.subr.bf16.mxu0 %v5518_v10 }
 0x6c5   :  { %4275 = vmatpush1.bf16.msra.mxu0 %v5516_v53 }
 0x6c6   :  { %4276 = vmatprep.subr.bf16.mxu0 %v5521_v11 }
 0x6c9   :  { %4277 = vmatpush1.bf16.msra.mxu0 %v5519_v12 }
 0x6ca   :  { %4278 = vmatprep.subr.bf16.mxu0 %v5524_v21 }
 0x6cd   :  { %4279 = vmatpush1.bf16.msra.mxu0 %v5522_v13 }
 0x6ce   :  { %4280 = vmatprep.subr.bf16.mxu0 %v5527_v14 }
 0x6d1   :  { %4281 = vmatpush1.bf16.msra.mxu0 %v5525_v15 }
 0x6d2   :  { %4282 = vmatprep.subr.bf16.mxu0 %v5530_v3 }
 0x6d5   :  { %4283 = vmatpush1.bf16.msra.mxu0 %v5528_v16 }
 0x6d6   :  { %4284 = vmatprep.subr.bf16.mxu0 %v5533_v58 }
 0x6d9   :  { %4285 = vmatpush1.bf16.msra.mxu0 %v5531_v17 }
 0x6da   :  { %4286 = vmatprep.subr.bf16.mxu0 %v5536_v18  ;;  %v5540_v18 = vld [vmem:[%s6747_s24 + $0x100] ss:$8 sps:$4 sm:$0xff]  }
 0x6dd   :  { %4287 = vmatpush1.bf16.msra.mxu0 %v5534_v19 }
 0x6de   :  { %4288 = vmatprep.subr.bf16.mxu0 %v5539_v20  ;;  %v5545_v20 = vld [vmem:[%s6747_s24 + $0x114] ss:$8 sps:$4 sm:$0xff]  }
 0x6e1   :  { %4289 = vmatpush1.bf16.msra.mxu0 %v5537_v23 }
 0x6e2   :  { %4299 = vmatprep.subr.bf16.mxu0 %v5542_v24  ;;  %v5543_v24 = vld [vmem:[%s6747_s24 + $0x110] ss:$8 sps:$4 sm:$0xff]  }
 0x737   :  { %v3259_v37 = vpop.f32.mrb[16].mxu0  ;;  %v3300_v26 = vpop.f32.mrb[24].mxu1 }
 0x738   :  { %v3261_v52 = vpop.f32.mrb[17].mxu0  ;;  %v3302_v28 = vpop.f32.mrb[25].mxu1 }
 0x739   :  { %v3263_v30 = vpop.f32.mrb[18].mxu0  ;;  %v3304_v31 = vpop.f32.mrb[26].mxu1 }
 0x73a   :  { %v3264_v34 = vpop.f32.mrb[19].mxu0  ;;  %v3305_v54 = vpop.f32.mrb[27].mxu1  ;;  %v5554_v30 = vld [vmem:[%s6747_s24 + $0x144] ss:$8 sps:$4 sm:$0xff]   ;;  %v5552_v31 = vld [vmem:[%s6747_s24 + $0x140] ss:$8 sps:$4 sm:$0xff]  }
 0x73b   :  { %v5557_v34 = vld [vmem:[%s6747_s24 + $0x154] ss:$8 sps:$4 sm:$0xff]   ;;  %v5555_v54 = vld [vmem:[%s6747_s24 + $0x150] ss:$8 sps:$4 sm:$0xff]  }
 0x757   :  { %v3501_v45 = vpop.f32.mrb[20].mxu0  ;;  %v3542_v48 = vpop.f32.mrb[28].mxu1 }
 0x758   :  { %v3502_v49 = vadd.f32 %v3501_v45, %v3259_v37  ;;  %v3543_v50 = vadd.f32 %v3542_v48, %v3300_v26  ;;  %v3503_v38 = vpop.f32.mrb[21].mxu0  ;;  %v3544_v46 = vpop.f32.mrb[29].mxu1  ;;  %v5548_v37 = vld [vmem:[%s6747_s24 + $0x124] ss:$8 sps:$4 sm:$0xff]   ;;  %v5546_v26 = vld [vmem:[%s6747_s24 + $0x120] ss:$8 sps:$4 sm:$0xff]  }
 0x759   :  { %v3504_v5 = vadd.f32 %v3503_v38, %v3261_v52  ;;  %v3545_v57 = vadd.f32 %v3544_v46, %v3302_v28  ;;  %v3505_v59 = vpop.f32.mrb[22].mxu0  ;;  %v3546_v61 = vpop.f32.mrb[30].mxu1  ;;  %v5551_v52 = vld [vmem:[%s6747_s24 + $0x134] ss:$8 sps:$4 sm:$0xff]   ;;  %v5549_v28 = vld [vmem:[%s6747_s24 + $0x130] ss:$8 sps:$4 sm:$0xff]  }
 0x75a   :  { %v3506_v62 = vpop.f32.mrb[23].mxu0  ;;  %v3547_v42 = vpop.f32.mrb[31].mxu1  ;;  %v5578_v45 = vld [vmem:[%s6747_s24 + $0x1c4] ss:$8 sps:$4 sm:$0xff]   ;;  %v5576_v48 = vld [vmem:[%s6747_s24 + $0x1c0] ss:$8 sps:$4 sm:$0xff]  }
 0x75b   :  { %v5584_v38 = vld [vmem:[%s6747_s24 + $0x1e4] ss:$8 sps:$4 sm:$0xff]   ;;  %v5582_v46 = vld [vmem:[%s6747_s24 + $0x1e0] ss:$8 sps:$4 sm:$0xff]  }
 0x75c   :  { %v5600_v62 = vld [vmem:[#allocation29 + $0x70] sm:$0xff]  }
 0x75d   :  { %v5601_v42 = vld [vmem:[#allocation29 + $0x30] sm:$0xff]   ;;  %5105 = vmatprep.subr.bf16.mxu1 %v5600_v62 }
 0x75e   :  { %5106 = vmatpush3.bf16.msra.mxu1 %v5601_v42 }
 0x75f   :  { %5107 = vmatprep.subr.bf16.mxu1 %v5602_v63 }
 0x777   :  { %v3776_v1 = vpop.f32.mrb[24].mxu0  ;;  %v3817_v2 = vpop.f32.mrb[32].mxu1 }
 0x778   :  { %v3824_v6 = vadd.f32 %v3776_v1, %v3502_v49  ;;  %v3826_v7 = vadd.f32 %v3817_v2, %v3543_v50  ;;  %v3778_v8 = vpop.f32.mrb[25].mxu0  ;;  %v3819_v9 = vpop.f32.mrb[33].mxu1  ;;  %v5581_v49 = vld [vmem:[%s6747_s24 + $0x1d4] ss:$8 sps:$4 sm:$0xff]   ;;  %v5579_v50 = vld [vmem:[%s6747_s24 + $0x1d0] ss:$8 sps:$4 sm:$0xff]  }
 0x779   :  { %v3825_v10 = vadd.f32 %v3778_v8, %v3504_v5  ;;  %v3827_v53 = vadd.f32 %v3819_v9, %v3545_v57  ;;  %v3780_v11 = vpop.f32.mrb[26].mxu0  ;;  %v3821_v12 = vpop.f32.mrb[34].mxu1  ;;  %v5587_v5 = vld [vmem:[%s6747_s24 + $0x1f4] ss:$8 sps:$4 sm:$0xff]   ;;  %v5585_v57 = vld [vmem:[%s6747_s24 + $0x1f0] ss:$8 sps:$4 sm:$0xff]  }
 0x77a   :  { %v3850_v21 = vadd.f32 %v3833_v22, %v3824_v6  ;;  %v6669_v13 = vadd.f32 %v3841_v0, %v3826_v7  ;;  %v3781_v60 = vpop.f32.mrb[27].mxu0  ;;  %v3822_v14 = vpop.f32.mrb[35].mxu1  ;;  %v5603_v22 = vld [vmem:[#allocation29 + $0x38] sm:$0xff]   ;;  %v6135_v0 = vmov 0.0  }
 0x77b   :  { %v3851_v15 = vadd.f32 %v3837_v4, %v3825_v10  ;;  %v3853_v3 = vadd.f32 %v3845_v27, %v3827_v53  ;;  %5108 = vmatpush3.bf16.msra.mxu1 %v5603_v22  ;;  %v3926_v1 = vld [vmem:[#allocation28] sm:$0x3]  ;;  %v5608_v14 = vld [vmem:[%s6748_s22 + $0x20] sm:$0xff]  }
 0x77c   :  { %v3854_v56 = vmax.f32 %v3850_v21, 0.0  ;;  %v3856_v59 = vmax.f32 %v6669_v13, 0.0  ;;  %5124 = vmatprep.subr.bf16.mxu1 %v6135_v0  ;;  %v3931_v2 = vrot.slane %v3926_v1, %v6523_v51  ;;  %v3935_v4 = vrot.slane %v3926_v1, %v6528_v55  ;;  %v5604_v21 = vld [vmem:[%s6748_s22] sm:$0xff]   ;;  %v5605_v51 = vld [vmem:[%s6748_s22 + $0x8] sm:$0xff]   ;;  %v5606_v55 = vld [vmem:[%s6748_s22 + $0x10] sm:$0xff]  }
 0x77d   :  { %v3855_v16 = vmax.f32 %v3851_v15, 0.0  ;;  %v3857_v58 = vmax.f32 %v3853_v3, 0.0  ;;  %v5607_v60 = vld [vmem:[%s6748_s22 + $0x18] sm:$0xff]   ;;  %v5609_v15 = vld [vmem:[%s6748_s22 + $0x28] sm:$0xff]   ;;  %v5610_v3 = vld [vmem:[%s6748_s22 + $0x30] sm:$0xff]  }
 0x77e   :  { %v3858_v19 = vpack.c.bf16 %v3854_v56, %v3854_v56  ;;  %v3860_v61 = vpack.c.bf16 %v3856_v59, %v3856_v59  ;;  %v5611_v56 = vld [vmem:[%s6748_s22 + $0x38] sm:$0xff]  }
 0x77f   :  { %v3859_v17 = vpack.c.bf16 %v3855_v16, %v3855_v16  ;;  %v3861_v23 = vpack.c.bf16 %v3857_v58, %v3857_v58  ;;  %v4955_v58 = vld [vmem:[#allocation31] ss:$0 sm:$0xff] }
 0x781   :  { %4290 = vmatprep.mubr.bf16.mxu0 %v3859_v17 }
 0x782   :  { %4291 = vmatmul.mubr.bf16.vlgmr.msra.gmra.mrb[28].mxu0 %v3858_v19 }
 0x783   :  { %4300 = vmatpush1.bf16.msra.mxu0 %v5540_v18  ;;  %4331 = vmatprep.mubr.bf16.mxu0 %v3861_v23 }
 0x784   :  { %4301 = vmatprep.subr.bf16.mxu0 %v5545_v20 }
 0x787   :  { %4302 = vmatpush1.bf16.msra.mxu0 %v5543_v24 }
 0x788   :  { %4303 = vmatprep.subr.bf16.mxu0 %v5548_v37 }
 0x78b   :  { %4304 = vmatpush1.bf16.msra.mxu0 %v5546_v26  ;;  %v4972_v26 = vld [vmem:[#allocation32] ss:$0 sm:$0xff] }
 0x78c   :  { %4305 = vmatprep.subr.bf16.mxu0 %v5551_v52 }
 0x78f   :  { %4306 = vmatpush1.bf16.msra.mxu0 %v5549_v28 }
 0x790   :  { %4307 = vmatprep.subr.bf16.mxu0 %v5554_v30 }
 0x793   :  { %4308 = vmatpush1.bf16.msra.mxu0 %v5552_v31 }
 0x794   :  { %4309 = vmatprep.subr.bf16.mxu0 %v5557_v34  ;;  %v4981_v34 = vld [vmem:[%s6280_s12] ss:$0 sm:$0xff] }
 0x797   :  { %4310 = vmatpush1.bf16.msra.mxu0 %v5555_v54 }
 0x798   :  { %4311 = vmatprep.subr.bf16.mxu0 %v5560_v35 }
 0x79b   :  { %4312 = vmatpush1.bf16.msra.mxu0 %v5558_v41 }
 0x79c   :  { %4313 = vmatprep.subr.bf16.mxu0 %v5563_v32 }
 0x79f   :  { %4314 = vmatpush1.bf16.msra.mxu0 %v5561_v25  ;;  %v4982_v25 = vld [vmem:[#allocation2] ss:$0 sm:$0xff] }
 0x7a0   :  { %4315 = vmatprep.subr.bf16.mxu0 %v5566_v33 }
 0x7a3   :  { %4316 = vmatpush1.bf16.msra.mxu0 %v5564_v40 }
 0x7a4   :  { %4317 = vmatprep.subr.bf16.mxu0 %v5569_v44 }
 0x7a7   :  { %4318 = vmatpush1.bf16.msra.mxu0 %v5567_v29 }
 0x7a8   :  { %4319 = vmatprep.subr.bf16.mxu0 %v5572_v36 }
 0x7ab   :  { %4320 = vmatpush1.bf16.msra.mxu0 %v5570_v39 }
 0x7ac   :  { %4321 = vmatprep.subr.bf16.mxu0 %v5575_v47 }
 0x7af   :  { %4322 = vmatpush1.bf16.msra.mxu0 %v5573_v43 }
 0x7b0   :  { %4323 = vmatprep.subr.bf16.mxu0 %v5578_v45 }
 0x7b3   :  { %4324 = vmatpush1.bf16.msra.mxu0 %v5576_v48 }
 0x7b4   :  { %4325 = vmatprep.subr.bf16.mxu0 %v5581_v49 }
 0x7b7   :  { %4326 = vmatpush1.bf16.msra.mxu0 %v5579_v50 }
 0x7b8   :  { %4327 = vmatprep.subr.bf16.mxu0 %v5584_v38 }
 0x7bb   :  { %4328 = vmatpush1.bf16.msra.mxu0 %v5582_v46 }
 0x7bc   :  { %4329 = vmatprep.subr.bf16.mxu0 %v5587_v5 }
 0x7bf   :  { %4330 = vmatpush1.bf16.msra.mxu0 %v5585_v57 }
 0x7c2   :  { %4332 = vmatmul.mubr.bf16.vlgmr.msra.gmra.mrb[28].mxu0 %v3860_v61 }
 0x895   :  { %v4333_v27 = vpop.f32.mrb[28].mxu0 }
 0x896   :  { %v5144_v6 = vadd.f32 %v4333_v27, %v3931_v2  ;;  %v4335_v7 = vpop.f32.mrb[29].mxu0 }
 0x897   :  { %v5145_v8 = vadd.f32 %v4335_v7, %v3935_v4  ;;  %v4337_v9 = vpop.f32.mrb[30].mxu0 }
 0x898   :  { %v4340_v10 = vmax.f32 %v5144_v6, 0.0  ;;  %v4338_v53 = vpop.f32.mrb[31].mxu0 }
 0x899   :  { %v4341_v11 = vmax.f32 %v5145_v8, 0.0 }
 0x89a   :  { %v4342_v13 = vpack.c.bf16 %v4340_v10, %v4340_v10 }
 0x89b   :  { %v4343_v12 = vpack.c.bf16 %v4341_v11, %v4341_v11 }
 0x89d   :  { %4511 = vmatprep.mubr.bf16.mxu1 %v4343_v12 }
 0x89e   :  { %4512 = vmatmul.mubr.bf16.vlgmr.msra.gmra.mrb[36].mxu1 %v4342_v13 }
 0x89f   :  { %5125 = vmatpush3.bf16.msra.mxu1 %v5604_v21  ;;  %5140 = vmatprep.mubr.msk.bf16.mxu1 %vm6136_vm2, %v6135_v0 }
 0x8a0   :  { %5126 = vmatprep.subr.bf16.mxu1 %v6135_v0 }
 0x8a3   :  { %5127 = vmatpush3.bf16.msra.mxu1 %v5605_v51 }
 0x8a4   :  { %5128 = vmatprep.subr.bf16.mxu1 %v6135_v0 }
 0x8a7   :  { %5129 = vmatpush3.bf16.msra.mxu1 %v5606_v55 }
 0x8a8   :  { %5130 = vmatprep.subr.bf16.mxu1 %v6135_v0 }
 0x8ab   :  { %5131 = vmatpush3.bf16.msra.mxu1 %v5607_v60 }
 0x8ac   :  { %5132 = vmatprep.subr.bf16.mxu1 %v6135_v0 }
 0x8af   :  { %5133 = vmatpush3.bf16.msra.mxu1 %v5608_v14 }
 0x8b0   :  { %5134 = vmatprep.subr.bf16.mxu1 %v6135_v0 }
 0x8b3   :  { %5135 = vmatpush3.bf16.msra.mxu1 %v5609_v15 }
 0x8b4   :  { %5136 = vmatprep.subr.bf16.mxu1 %v6135_v0 }
 0x8b7   :  { %5137 = vmatpush3.bf16.msra.mxu1 %v5610_v3 }
 0x8b8   :  { %5138 = vmatprep.subr.bf16.mxu1 %v6135_v0 }
 0x8bb   :  { %5139 = vmatpush3.bf16.msra.mxu1 %v5611_v56 }
 0x971   :  { %v5109_v16 = vpop.f32.mrb[36].mxu1 }
 0x972   :  { %v5110_v17 = vpop.f32.mrb[37].mxu1 }
 0x973   :  { %v5111_v18 = vadd.f32 %v5110_v17, %v5109_v16  ;;  %v5112_v19 = vpop.f32.mrb[38].mxu1 }
 0x974   :  { %v5113_v20 = vpop.f32.mrb[39].mxu1 }
 0x975   :  { %v4514_v23 = vadd.f32 %v5111_v18, %v4955_v58 }
 0x977   :  { %v4519_v24 = vmax.f32 %v4514_v23, 0.0 }
 0x979   :  { %v4520_v37 = vpack.c.bf16 %v4519_v24, %v4519_v24 }
 0x97b   :  { %5141 = vmatmul.mubr.bf16.vlgmr.msra.gmra.mrb[40].mxu1 %v4520_v37 }
 0xa4e   :  { %v4626_v52 = vpop.f32.mrb[40].mxu1 }
 0xa4f   :  { %v4627_v28 = vadd.f32 %v4972_v26, %v4626_v52  ;;  %v5142_v30 = vpop.f32.mrb[41].mxu1 }
 0xa50   :  { %v4629_v31 = vpop.f32.mrb[42].mxu1 }
 0xa51   :  { %v4632_v54 = vmax.f32 %v4627_v28, 0.0  ;;  %v5143_v35 = vpop.f32.mrb[43].mxu1 }
 0xa53   :  { %v4640_v41 = vmul.f32 %v4981_v34, %v4632_v54 }
 0xa55   :  { %v4642_v32 = vsel %vm4641_vm3, %v4640_v41, 0.0 }
 0xa56   :  { %4643 = vadd.xlane.f32.xlu0 %v4642_v32 }
 0xae3   :  { %v4644_v33 = vpop.xlane.xlu0 %4643 }
 0xae4   :  { %v4652_v40 = vadd.f32 %v4982_v25, %v4644_v33 }
 0xae6   :  { %v4653_v44 = vsub.f32 0.0, %v4652_v40 }
 0xae8   :  { %v4654_v29 = vmul.f32 1.442695, %v4653_v44 }
 0xaea   :  { %5612 = vpow2.f32 %v4654_v29 }
 0xaf4   :  { %v5613_v36 = vpop.eup %5612 }
 0xaf5   :  { %v4656_v39 = vadd.f32 1.0, %v5613_v36 }
 0xaf7   :  { %5614 = vrcp.f32 %v4656_v39 }
 0xb01   :  { %v5615_v47 = vpop.eup %5614 }
 0xb02   :  { %4659 = vst.msk [vmem:[%s6288_s9] sm:$0x3] %vm4658_vm4, %v5615_v47 }
 0xb03   :  { %4664 = vsyncpa [#allocation4], 1 }
 0xb04   :  { %4665 = vsyncpa [#allocation6], 1 }
 0xb05   :  { %4666 = vsyncpa [#allocation9], 1 }
 0xb06   :  { %4667 = vsyncpa [#allocation12], 1 }
 0xb07   :  { %4668 = vsyncpa [#allocation15], 1 }
 0xb08   :  { %4669 = vsyncpa [#allocation18], 1 }
 0xb09   :  { %4670 = vsyncpa [#allocation21], 1 }
 0xb0a   :  { %4671 = vsyncpa [#allocation24], 1 }
 0xb0b   :  { %4672 = vsyncpa [#allocation27], 1 }
 0xb0c   :  { %4673 = vsyncpa [#allocation30], 1 }
 0xb0d   :  { %4674 = vsyncpa [#allocation33], 1 }

</bundles_post_ra>
